<compile_context>
chip_gen: v6e
topology: v6e:2x2x1
jax: 0.10.0
libtpu: 0.0.40
codegen_flags: <defaults>
</compile_context>

<pallas_src>
import functools
import math

import jax
import jax.numpy as jnp
from jax.experimental import pallas as pl
from jax.experimental.pallas import tpu as pltpu


# ---------------------------------------------------------------------------
# Fused kernel: all encoder layers; one (batch-tile, layer) pair per grid step.
# ---------------------------------------------------------------------------
def _tst_encoder_kernel(
    x_ref,     # (m_tile, d_model)      input activations (consumed at layer 0)
    wq_ref,    # (1, H, d_model, d_k)   head-split W_Q   (y = x @ w)
    wk_ref,    # (1, H, d_model, d_k)
    wv_ref,    # (1, H, d_model, d_k)
    wo_ref,    # (1, H, d_k, d_model)   head-split rows of W_O
    w1_ref,    # (1, d_model, d_ff)
    w2_ref,    # (1, d_ff, d_model)
    vec_ref,   # (1, 9, d_model) f32: b_q,b_k,b_v,b_o,bn1_s,bn1_b,b2,bn2_s,bn2_b
    b1_ref,    # (1, 1, d_ff)    f32
    o_ref,     # (m_tile, d_model)      output activations (written at last layer)
    acc_ref,   # (m_tile, d_model) f32 scratch: activation carried across layers
    *,
    n_heads: int,
    b_tile: int,
    q_len: int,
):
    layer = pl.program_id(1)

    # Layer 0: load this batch tile into the f32 VMEM carry.
    @pl.when(layer == 0)
    def _():
        acc_ref[...] = x_ref[...].astype(jnp.float32)

    x = acc_ref[...]                                    # (m_tile, d_model) f32
    m, d_model = x.shape
    d_k = d_model // n_heads
    scale = 1.0 / math.sqrt(d_k)
    w_dtype = wq_ref.dtype                              # f32 or bf16 weights

    vec = vec_ref[0]                                    # (9, d_model) f32
    b_q, b_k, b_v, b_o = vec[0:1], vec[1:2], vec[2:3], vec[3:4]
    bn1_s, bn1_b = vec[4:5], vec[5:6]
    b2 = vec[6:7]
    bn2_s, bn2_b = vec[7:8], vec[8:9]

    xw = x.astype(w_dtype)

    # --- multi-head self-attention -----------------------------------------
    # The head split lives entirely in the host-prepared weight layout, so the
    # kernel never lane-slices or concatenates activations (no XLU relayouts);
    # per-head contexts fold directly into the output-projection accumulator.
    attn_out = jnp.zeros((m, d_model), jnp.float32)
    for h in range(n_heads):                            # static, fully unrolled
        cols = slice(h * d_k, (h + 1) * d_k)
        qh = jnp.dot(xw, wq_ref[0, h], preferred_element_type=jnp.float32) + b_q[:, cols]
        kh = jnp.dot(xw, wk_ref[0, h], preferred_element_type=jnp.float32) + b_k[:, cols]
        vh = jnp.dot(xw, wv_ref[0, h], preferred_element_type=jnp.float32) + b_v[:, cols]
        # (m_tile, d_k) -> (b_tile, q_len, d_k): leading-dim split only.
        qh = qh.reshape(b_tile, q_len, d_k).astype(w_dtype)
        kh = kh.reshape(b_tile, q_len, d_k).astype(w_dtype)
        vh = vh.reshape(b_tile, q_len, d_k).astype(w_dtype)
        s = jnp.einsum("bqd,bkd->bqk", qh, kh,
                       preferred_element_type=jnp.float32) * scale
        s = s - jnp.max(s, axis=-1, keepdims=True)
        p = jnp.exp(s)
        p = p * pl.reciprocal(jnp.sum(p, axis=-1, keepdims=True), approx=True)
        ctx = jnp.einsum("bqk,bkd->bqd", p.astype(w_dtype), vh,
                         preferred_element_type=jnp.float32)
        ctx = ctx.reshape(m, d_k).astype(w_dtype)
        attn_out = attn_out + jnp.dot(ctx, wo_ref[0, h],
                                      preferred_element_type=jnp.float32)
    attn_out = attn_out + b_o

    # Residual + BatchNorm1d (eval-mode affine); dropout = identity.
    y = x + attn_out
    y = y * bn1_s + bn1_b

    # --- position-wise feed-forward -----------------------------------------
    h1 = jnp.dot(y.astype(w_dtype), w1_ref[0], preferred_element_type=jnp.float32)
    h1 = jax.nn.gelu(h1 + b1_ref[0], approximate=True)
    ff = jnp.dot(h1.astype(w_dtype), w2_ref[0], preferred_element_type=jnp.float32)
    ff = ff + b2

    y = y + ff
    y = y * bn2_s + bn2_b

    acc_ref[...] = y                                    # carry to next layer

    @pl.when(layer == pl.num_programs(1) - 1)
    def _():
        o_ref[...] = y.astype(o_ref.dtype)


# ---------------------------------------------------------------------------
# Batch-tile choice: feed >=~256 rows to the MXU per step, keep >=2 grid steps
# (v7x has 2 TensorCores), keep the sublane dim 8-aligned.
# ---------------------------------------------------------------------------
def _choose_b_tile(bs, q_len):
    target = max(1, 256 // q_len)
    best = bs                       # single tile: block dims == array dims (legal)
    for cand in range(1, bs + 1):
        if bs % cand:
            continue
        n_tiles = bs // cand
        if cand <= target and n_tiles >= min(2, bs) and (cand * q_len) % 8 == 0:
            best = cand
    return best


# ---------------------------------------------------------------------------
# Host-side parameter packing (head-split weights, fused BN affine).
# ---------------------------------------------------------------------------
def _pack_params(layer_params, *, n_heads, weight_dtype=jnp.float32, eps=1e-5):
    d_model = layer_params[0]["w_q"].shape[0]
    d_ff = layer_params[0]["w1"].shape[1]
    d_k = d_model // n_heads

    def head_cols(w):   # (d_model, d_model) -> (n_heads, d_model, d_k)
        return w.reshape(d_model, n_heads, d_k).transpose(1, 0, 2)

    def head_rows(w):   # (d_model, d_model) -> (n_heads, d_k, d_model)
        return w.reshape(n_heads, d_k, d_model)

    wq, wk, wv, wo, w1, w2, vec, b1 = [], [], [], [], [], [], [], []
    for p in layer_params:
        wq.append(head_cols(p["w_q"]))
        wk.append(head_cols(p["w_k"]))
        wv.append(head_cols(p["w_v"]))
        wo.append(head_rows(p["w_o"]))
        w1.append(p["w1"])
        w2.append(p["w2"])
        bn1_s = p["bn1_gamma"] / jnp.sqrt(p["bn1_var"] + eps)
        bn1_b = p["bn1_beta"] - p["bn1_mean"] * bn1_s
        bn2_s = p["bn2_gamma"] / jnp.sqrt(p["bn2_var"] + eps)
        bn2_b = p["bn2_beta"] - p["bn2_mean"] * bn2_s
        vec.append(jnp.stack([p["b_q"], p["b_k"], p["b_v"], p["b_o"],
                              bn1_s, bn1_b, p["b2"], bn2_s, bn2_b], axis=0))
        b1.append(p["b1"].reshape(1, d_ff))

    return dict(
        wq=jnp.stack(wq).astype(weight_dtype),
        wk=jnp.stack(wk).astype(weight_dtype),
        wv=jnp.stack(wv).astype(weight_dtype),
        wo=jnp.stack(wo).astype(weight_dtype),
        w1=jnp.stack(w1).astype(weight_dtype),
        w2=jnp.stack(w2).astype(weight_dtype),
        vec=jnp.stack(vec).astype(jnp.float32),   # biases / BN affine stay f32
        b1=jnp.stack(b1).astype(jnp.float32),
    )


# ---------------------------------------------------------------------------
# Wrapper: one pallas_call for the whole encoder stack.
# ---------------------------------------------------------------------------
def tst_encoder_forward(x, layer_params, *, n_heads,
                        weight_dtype=jnp.float32, b_tile=None):
    """TSTEncoder forward (res_attention=False, eval mode).

    x: [bs, q_len, d_model]; layer_params: list of per-layer param dicts with
    torch-layout linear weights stored transposed ([in, out]) and raw BatchNorm
    (gamma, beta, running_mean, running_var).
    """
    bs, q_len, d_model = x.shape
    assert d_model % n_heads == 0
    d_k = d_model // n_heads
    n_layers = len(layer_params)
    d_ff = layer_params[0]["w1"].shape[1]

    packed = _pack_params(layer_params, n_heads=n_heads, weight_dtype=weight_dtype)

    if b_tile is None:
        b_tile = _choose_b_tile(bs, q_len)
    assert bs % b_tile == 0
    n_bt = bs // b_tile
    m_tile = b_tile * q_len

    x2 = x.reshape(bs * q_len, d_model)          # lane-dense 2-D activation slab

    kernel = functools.partial(_tst_encoder_kernel, n_heads=n_heads,
                               b_tile=b_tile, q_len=q_len)

    # Advisory cost estimate (the kernel is launch/relayout/mem bound here).
    flops = 2 * n_layers * bs * q_len * (
        4 * d_model * d_model + 2 * q_len * d_model + 2 * d_model * d_ff)
    transcendentals = n_layers * bs * (n_heads * q_len * q_len + q_len * d_ff)
    act_bytes = 2 * x2.size * x2.dtype.itemsize
    weight_bytes = sum(int(a.size) * a.dtype.itemsize for a in packed.values()) * n_bt
    bytes_accessed = act_bytes + weight_bytes

    out2 = pl.pallas_call(
        kernel,
        out_shape=jax.ShapeDtypeStruct((bs * q_len, d_model), x.dtype),
        grid_spec=pltpu.PrefetchScalarGridSpec(
            num_scalar_prefetch=0,
            grid=(n_bt, n_layers),
            in_specs=[
                pl.BlockSpec((m_tile, d_model), lambda b, l: (b, 0)),                 # x
                pl.BlockSpec((1, n_heads, d_model, d_k), lambda b, l: (l, 0, 0, 0)),  # wq
                pl.BlockSpec((1, n_heads, d_model, d_k), lambda b, l: (l, 0, 0, 0)),  # wk
                pl.BlockSpec((1, n_heads, d_model, d_k), lambda b, l: (l, 0, 0, 0)),  # wv
                pl.BlockSpec((1, n_heads, d_k, d_model), lambda b, l: (l, 0, 0, 0)),  # wo
                pl.BlockSpec((1, d_model, d_ff), lambda b, l: (l, 0, 0)),             # w1
                pl.BlockSpec((1, d_ff, d_model), lambda b, l: (l, 0, 0)),             # w2
                pl.BlockSpec((1, 9, d_model), lambda b, l: (l, 0, 0)),                # vec
                pl.BlockSpec((1, 1, d_ff), lambda b, l: (l, 0, 0)),                   # b1
            ],
            out_specs=pl.BlockSpec((m_tile, d_model), lambda b, l: (b, 0)),
            scratch_shapes=[pltpu.VMEM((m_tile, d_model), jnp.float32)],
        ),
        compiler_params=pltpu.CompilerParams(
            dimension_semantics=("parallel", "arbitrary"),
            vmem_limit_bytes=32 * 1024 * 1024,
        ),
        cost_estimate=pl.CostEstimate(flops=flops,
                                      transcendentals=transcendentals,
                                      bytes_accessed=bytes_accessed),
    )(x2, packed["wq"], packed["wk"], packed["wv"], packed["wo"],
      packed["w1"], packed["w2"], packed["vec"], packed["b1"])

    return out2.reshape(bs, q_len, d_model)


# ---------------------------------------------------------------------------
# Pure-JAX reference (mirrors the PyTorch module, eval mode).
# ---------------------------------------------------------------------------
def _reference_layer(x, p, n_heads):
    hi = jax.lax.Precision.HIGHEST
    d_model = x.shape[-1]
    d_k = d_model // n_heads
    eps = 1e-5

    def proj(t, w, b):
        return jnp.einsum("bqd,de->bqe", t, w, precision=hi) + b

    q = proj(x, p["w_q"], p["b_q"])
    k = proj(x, p["w_k"], p["b_k"])
    v = proj(x, p["w_v"], p["b_v"])

    def split(t):
        b, L, _ = t.shape
        return t.reshape(b, L, n_heads, d_k).transpose(0, 2, 1, 3)

    qh, kh, vh = split(q), split(k), split(v)
    scores = jnp.einsum("bhqd,bhkd->bhqk", qh, kh, precision=hi) / math.sqrt(d_k)
    attn = jax.nn.softmax(scores, axis=-1)
    ctx = jnp.einsum("bhqk,bhkd->bhqd", attn, vh, precision=hi)
    ctx = ctx.transpose(0, 2, 1, 3).reshape(x.shape)

    src = x + proj(ctx, p["w_o"], p["b_o"])

    def bn(t, g, b_, m_, v_):
        return (t - m_) / jnp.sqrt(v_ + eps) * g + b_

    src = bn(src, p["bn1_gamma"], p["bn1_beta"], p["bn1_mean"], p["bn1_var"])
    h1 = jax.nn.gelu(
        jnp.einsum("bqd,df->bqf", src, p["w1"], precision=hi) + p["b1"],
        approximate=True)
    ff = jnp.einsum("bqf,fd->bqd", h1, p["w2"], precision=hi) + p["b2"]
    src = src + ff
    src = bn(src, p["bn2_gamma"], p["bn2_beta"], p["bn2_mean"], p["bn2_var"])
    return src


def _reference_forward(x, layer_params, n_heads):
    out = x
    for p in layer_params:
        out = _reference_layer(out, p, n_heads)
    return out


# ---------------------------------------------------------------------------
# Deterministic parameter construction (torch-like init, eval-mode BN stats).
# ---------------------------------------------------------------------------
def _init_layer_params(key, d_model, d_ff, dtype=jnp.float32):
    ks = jax.random.split(key, 20)

    def linear(kw, kb, fan_in, fan_out):
        bound = 1.0 / math.sqrt(fan_in)
        w = jax.random.uniform(kw, (fan_in, fan_out), dtype, -bound, bound)
        b = jax.random.uniform(kb, (fan_out,), dtype, -bound, bound)
        return w, b

    def batchnorm(kg, kb, km, kv):
        gamma = jax.random.uniform(kg, (d_model,), dtype, 0.5, 1.5)
        beta = 0.1 * jax.random.normal(kb, (d_model,), dtype)
        mean = 0.1 * jax.random.normal(km, (d_model,), dtype)
        var = jax.random.uniform(kv, (d_model,), dtype, 0.5, 1.5)
        return gamma, beta, mean, var

    w_q, b_q = linear(ks[0], ks[1], d_model, d_model)
    w_k, b_k = linear(ks[2], ks[3], d_model, d_model)
    w_v, b_v = linear(ks[4], ks[5], d_model, d_model)
    w_o, b_o = linear(ks[6], ks[7], d_model, d_model)
    w1, b1 = linear(ks[8], ks[9], d_model, d_ff)
    w2, b2 = linear(ks[10], ks[11], d_ff, d_model)
    g1, be1, m1, v1 = batchnorm(ks[12], ks[13], ks[14], ks[15])
    g2, be2, m2, v2 = batchnorm(ks[16], ks[17], ks[18], ks[19])

    return dict(w_q=w_q, b_q=b_q, w_k=w_k, b_k=b_k, w_v=w_v, b_v=b_v,
                w_o=w_o, b_o=b_o, w1=w1, b1=b1, w2=w2, b2=b2,
                bn1_gamma=g1, bn1_beta=be1, bn1_mean=m1, bn1_var=v1,
                bn2_gamma=g2, bn2_beta=be2, bn2_mean=m2, bn2_var=v2)


if __name__ == "__main__":
    # Small shapes consistent with the module: [bs, q_len, d_model].
    bs, q_len, d_model, n_heads, d_ff, n_layers = 16, 16, 64, 4, 128, 2

    key = jax.random.PRNGKey(0)
    kx, kp = jax.random.split(key)
    x = jax.random.normal(kx, (bs, q_len, d_model), dtype=jnp.float32)
    layer_keys = jax.random.split(kp, n_layers)
    raw_params = [_init_layer_params(layer_keys[i], d_model, d_ff)
                  for i in range(n_layers)]

    ref = _reference_forward(x, raw_params, n_heads)

    # f32 weights / f32 activations: tight numeric check.
    fwd32 = jax.jit(functools.partial(tst_encoder_forward, n_heads=n_heads,
                                      weight_dtype=jnp.float32))
    out32 = jax.block_until_ready(fwd32(x, raw_params))
    assert out32.shape == (bs, q_len, d_model), out32.shape
    assert jnp.allclose(out32, ref, rtol=5e-3, atol=5e-3), (
        float(jnp.max(jnp.abs(out32 - ref))))

    # bf16 weights + bf16 activation I/O (perf-review item): loose check
    # (f32 path above is the tight correctness check).
    fwd16 = jax.jit(functools.partial(tst_encoder_forward, n_heads=n_heads,
                                      weight_dtype=jnp.bfloat16))
    out16 = jax.block_until_ready(fwd16(x.astype(jnp.bfloat16), raw_params))
    assert out16.shape == (bs, q_len, d_model), out16.shape
    assert jnp.allclose(out16.astype(jnp.float32), ref, rtol=1e-1, atol=1e-1), (
        float(jnp.max(jnp.abs(out16.astype(jnp.float32) - ref))))

    print("KERNEL_OK")
</pallas_src>

<mosaic_0001>
module attributes {stable_mosaic.version = 11 : i64} {
  func.func @_tst_encoder_kernel(%arg0: i32, %arg1: i32, %arg2: memref<128x64xf32, #tpu.memory_space<vmem>>, %arg3: memref<1x4x64x16xf32, #tpu.memory_space<vmem>>, %arg4: memref<1x4x64x16xf32, #tpu.memory_space<vmem>>, %arg5: memref<1x4x64x16xf32, #tpu.memory_space<vmem>>, %arg6: memref<1x4x16x64xf32, #tpu.memory_space<vmem>>, %arg7: memref<1x64x128xf32, #tpu.memory_space<vmem>>, %arg8: memref<1x128x64xf32, #tpu.memory_space<vmem>>, %arg9: memref<1x9x64xf32, #tpu.memory_space<vmem>>, %arg10: memref<1x1x128xf32, #tpu.memory_space<vmem>>, %arg11: memref<128x64xf32, #tpu.memory_space<vmem>>, %arg12: memref<128x64xf32, #tpu.memory_space<vmem>>) attributes {dimension_semantics = [#tpu.dimension_semantics<parallel>, #tpu.dimension_semantics<arbitrary>], iteration_bounds = array<i64: 2, 2>, scalar_prefetch = 0 : i64, scratch_operands = 1 : i64, tpu.core_type = #tpu.core_type<tc>, window_params = [{transform_indices = @transform_0, window_bounds = array<i64: 128, 64>}, {transform_indices = @transform_1, window_bounds = array<i64: 1, 4, 64, 16>}, {transform_indices = @transform_2, window_bounds = array<i64: 1, 4, 64, 16>}, {transform_indices = @transform_3, window_bounds = array<i64: 1, 4, 64, 16>}, {transform_indices = @transform_4, window_bounds = array<i64: 1, 4, 16, 64>}, {transform_indices = @transform_5, window_bounds = array<i64: 1, 64, 128>}, {transform_indices = @transform_6, window_bounds = array<i64: 1, 128, 64>}, {transform_indices = @transform_7, window_bounds = array<i64: 1, 9, 64>}, {transform_indices = @transform_8, window_bounds = array<i64: 1, 1, 128>}, {transform_indices = @transform_9, window_bounds = array<i64: 128, 64>}]} {
    %c0_i32 = arith.constant 0 : i32
    %0 = arith.cmpi eq, %arg1, %c0_i32 : i32
    %1 = arith.extui %0 : i1 to i32
    %c0_i32_0 = arith.constant 0 : i32
    %2 = arith.cmpi ne, %1, %c0_i32_0 : i32
    scf.if %2 {
      %c0_120 = arith.constant 0 : index
      %c0_121 = arith.constant 0 : index
      %217 = vector.load %arg2[%c0_120, %c0_121] : memref<128x64xf32, #tpu.memory_space<vmem>>, vector<128x64xf32>
      %c0_122 = arith.constant 0 : index
      %c0_123 = arith.constant 0 : index
      %218 = vector.load %arg12[%c0_122, %c0_123] : memref<128x64xf32, #tpu.memory_space<vmem>>, vector<128x64xf32>
      tpu.vector_store %arg12[%c0_122, %c0_123], %217 {strides = array<i32>} : memref<128x64xf32, #tpu.memory_space<vmem>>, vector<128x64xf32>,
    } else {
    }
    %c0 = arith.constant 0 : index
    %c0_1 = arith.constant 0 : index
    %3 = vector.load %arg12[%c0, %c0_1] : memref<128x64xf32, #tpu.memory_space<vmem>>, vector<128x64xf32>
    %c0_2 = arith.constant 0 : index
    %c0_3 = arith.constant 0 : index
    %c0_4 = arith.constant 0 : index
    %4 = vector.load %arg9[%c0_2, %c0_3, %c0_4] : memref<1x9x64xf32, #tpu.memory_space<vmem>>, vector<1x9x64xf32>
    %5 = vector.shape_cast %4 : vector<1x9x64xf32> to vector<9x64xf32>
    %6 = vector.extract_strided_slice %5 {offsets = [0, 0], sizes = [1, 64], strides = [1, 1]} : vector<9x64xf32> to vector<1x64xf32>
    %7 = vector.extract_strided_slice %5 {offsets = [1, 0], sizes = [1, 64], strides = [1, 1]} : vector<9x64xf32> to vector<1x64xf32>
    %8 = vector.extract_strided_slice %5 {offsets = [2, 0], sizes = [1, 64], strides = [1, 1]} : vector<9x64xf32> to vector<1x64xf32>
    %9 = vector.extract_strided_slice %5 {offsets = [3, 0], sizes = [1, 64], strides = [1, 1]} : vector<9x64xf32> to vector<1x64xf32>
    %10 = vector.extract_strided_slice %5 {offsets = [4, 0], sizes = [1, 64], strides = [1, 1]} : vector<9x64xf32> to vector<1x64xf32>
    %11 = vector.extract_strided_slice %5 {offsets = [5, 0], sizes = [1, 64], strides = [1, 1]} : vector<9x64xf32> to vector<1x64xf32>
    %12 = vector.extract_strided_slice %5 {offsets = [6, 0], sizes = [1, 64], strides = [1, 1]} : vector<9x64xf32> to vector<1x64xf32>
    %13 = vector.extract_strided_slice %5 {offsets = [7, 0], sizes = [1, 64], strides = [1, 1]} : vector<9x64xf32> to vector<1x64xf32>
    %14 = vector.extract_strided_slice %5 {offsets = [8, 0], sizes = [1, 64], strides = [1, 1]} : vector<9x64xf32> to vector<1x64xf32>
    %cst = arith.constant 0.000000e+00 : f32
    %15 = vector.broadcast %cst : f32 to vector<128x64xf32>
    %c0_5 = arith.constant 0 : index
    %c0_6 = arith.constant 0 : index
    %c0_7 = arith.constant 0 : index
    %c0_8 = arith.constant 0 : index
    %16 = vector.load %arg3[%c0_5, %c0_6, %c0_7, %c0_8] : memref<1x4x64x16xf32, #tpu.memory_space<vmem>>, vector<1x1x64x16xf32>
    %17 = vector.shape_cast %16 : vector<1x1x64x16xf32> to vector<64x16xf32>
    %cst_9 = arith.constant dense<0.000000e+00> : vector<128x16xf32>
    %18 = tpu.matmul %3, %17, %cst_9 {dimension_numbers = #tpu.dot_dimension_numbers<[1], [0], [0], [1], [0, 0, 1, 1], [], []>} : vector<128x64xf32>, vector<64x16xf32>, vector<128x16xf32> -> vector<128x16xf32>
    %19 = vector.extract_strided_slice %6 {offsets = [0, 0], sizes = [1, 16], strides = [1, 1]} : vector<1x64xf32> to vector<1x16xf32>
    %20 = vector.broadcast %19 : vector<1x16xf32> to vector<128x16xf32>
    %21 = arith.addf %18, %20 : vector<128x16xf32>
    %c0_10 = arith.constant 0 : index
    %c0_11 = arith.constant 0 : index
    %c0_12 = arith.constant 0 : index
    %c0_13 = arith.constant 0 : index
    %22 = vector.load %arg4[%c0_10, %c0_11, %c0_12, %c0_13] : memref<1x4x64x16xf32, #tpu.memory_space<vmem>>, vector<1x1x64x16xf32>
    %23 = vector.shape_cast %22 : vector<1x1x64x16xf32> to vector<64x16xf32>
    %cst_14 = arith.constant dense<0.000000e+00> : vector<128x16xf32>
    %24 = tpu.matmul %3, %23, %cst_14 {dimension_numbers = #tpu.dot_dimension_numbers<[1], [0], [0], [1], [0, 0, 1, 1], [], []>} : vector<128x64xf32>, vector<64x16xf32>, vector<128x16xf32> -> vector<128x16xf32>
    %25 = vector.extract_strided_slice %7 {offsets = [0, 0], sizes = [1, 16], strides = [1, 1]} : vector<1x64xf32> to vector<1x16xf32>
    %26 = vector.broadcast %25 : vector<1x16xf32> to vector<128x16xf32>
    %27 = arith.addf %24, %26 : vector<128x16xf32>
    %c0_15 = arith.constant 0 : index
    %c0_16 = arith.constant 0 : index
    %c0_17 = arith.constant 0 : index
    %c0_18 = arith.constant 0 : index
    %28 = vector.load %arg5[%c0_15, %c0_16, %c0_17, %c0_18] : memref<1x4x64x16xf32, #tpu.memory_space<vmem>>, vector<1x1x64x16xf32>
    %29 = vector.shape_cast %28 : vector<1x1x64x16xf32> to vector<64x16xf32>
    %cst_19 = arith.constant dense<0.000000e+00> : vector<128x16xf32>
    %30 = tpu.matmul %3, %29, %cst_19 {dimension_numbers = #tpu.dot_dimension_numbers<[1], [0], [0], [1], [0, 0, 1, 1], [], []>} : vector<128x64xf32>, vector<64x16xf32>, vector<128x16xf32> -> vector<128x16xf32>
    %31 = vector.extract_strided_slice %8 {offsets = [0, 0], sizes = [1, 16], strides = [1, 1]} : vector<1x64xf32> to vector<1x16xf32>
    %32 = vector.broadcast %31 : vector<1x16xf32> to vector<128x16xf32>
    %33 = arith.addf %30, %32 : vector<128x16xf32>
    %34 = vector.shape_cast %21 : vector<128x16xf32> to vector<8x16x16xf32>
    %35 = vector.shape_cast %27 : vector<128x16xf32> to vector<8x16x16xf32>
    %36 = vector.shape_cast %33 : vector<128x16xf32> to vector<8x16x16xf32>
    "tpu.trace_start"() <{level = 10 : i32, message = "bqd,bkd->bqk"}> : () -> ()
    %cst_20 = arith.constant dense<0.000000e+00> : vector<8x16x16xf32>
    %37 = tpu.matmul %34, %35, %cst_20 {dimension_numbers = #tpu.dot_dimension_numbers<[2], [2], [1], [1], [0, 0, 0, 1, 1, 1], [0], [0]>} : vector<8x16x16xf32>, vector<8x16x16xf32>, vector<8x16x16xf32> -> vector<8x16x16xf32>
    "tpu.trace_stop"() : () -> ()
    %cst_21 = arith.constant 2.500000e-01 : f32
    %38 = vector.broadcast %cst_21 : f32 to vector<8x16x16xf32>
    %39 = arith.mulf %37, %38 : vector<8x16x16xf32>
    %cst_22 = arith.constant dense<0xFF800000> : vector<8x16xf32>
    %40 = vector.multi_reduction <maximumf>, %39, %cst_22 [2] : vector<8x16x16xf32> to vector<8x16xf32>
    %41 = vector.shape_cast %40 : vector<8x16xf32> to vector<8x16x1xf32>
    %42 = vector.broadcast %41 : vector<8x16x1xf32> to vector<8x16x16xf32>
    %43 = arith.subf %39, %42 : vector<8x16x16xf32>
    %44 = math.exp %43 : vector<8x16x16xf32>
    %cst_23 = arith.constant dense<0.000000e+00> : vector<8x16xf32>
    %45 = vector.multi_reduction <add>, %44, %cst_23 [2] : vector<8x16x16xf32> to vector<8x16xf32>
    %46 = vector.shape_cast %45 : vector<8x16xf32> to vector<8x16x1xf32>
    %47 = tpu.reciprocal %46 {approx = true} : vector<8x16x1xf32> -> vector<8x16x1xf32>
    %48 = vector.broadcast %47 : vector<8x16x1xf32> to vector<8x16x16xf32>
    %49 = arith.mulf %44, %48 : vector<8x16x16xf32>
    "tpu.trace_start"() <{level = 10 : i32, message = "bqk,bkd->bqd"}> : () -> ()
    %cst_24 = arith.constant dense<0.000000e+00> : vector<8x16x16xf32>
    %50 = tpu.matmul %49, %36, %cst_24 {dimension_numbers = #tpu.dot_dimension_numbers<[2], [1], [1], [2], [0, 0, 0, 1, 1, 2], [0], [0]>} : vector<8x16x16xf32>, vector<8x16x16xf32>, vector<8x16x16xf32> -> vector<8x16x16xf32>
    "tpu.trace_stop"() : () -> ()
    %51 = vector.shape_cast %50 : vector<8x16x16xf32> to vector<128x16xf32>
    %c0_25 = arith.constant 0 : index
    %c0_26 = arith.constant 0 : index
    %c0_27 = arith.constant 0 : index
    %c0_28 = arith.constant 0 : index
    %52 = vector.load %arg6[%c0_25, %c0_26, %c0_27, %c0_28] : memref<1x4x16x64xf32, #tpu.memory_space<vmem>>, vector<1x1x16x64xf32>
    %53 = vector.shape_cast %52 : vector<1x1x16x64xf32> to vector<16x64xf32>
    %cst_29 = arith.constant dense<0.000000e+00> : vector<128x64xf32>
    %54 = tpu.matmul %51, %53, %cst_29 {dimension_numbers = #tpu.dot_dimension_numbers<[1], [0], [0], [1], [0, 0, 1, 1], [], []>} : vector<128x16xf32>, vector<16x64xf32>, vector<128x64xf32> -> vector<128x64xf32>
    %55 = arith.addf %15, %54 : vector<128x64xf32>
    %c0_30 = arith.constant 0 : index
    %c1 = arith.constant 1 : index
    %c0_31 = arith.constant 0 : index
    %c0_32 = arith.constant 0 : index
    %56 = vector.load %arg3[%c0_30, %c1, %c0_31, %c0_32] : memref<1x4x64x16xf32, #tpu.memory_space<vmem>>, vector<1x1x64x16xf32>
    %57 = vector.shape_cast %56 : vector<1x1x64x16xf32> to vector<64x16xf32>
    %cst_33 = arith.constant dense<0.000000e+00> : vector<128x16xf32>
    %58 = tpu.matmul %3, %57, %cst_33 {dimension_numbers = #tpu.dot_dimension_numbers<[1], [0], [0], [1], [0, 0, 1, 1], [], []>} : vector<128x64xf32>, vector<64x16xf32>, vector<128x16xf32> -> vector<128x16xf32>
    %59 = vector.extract_strided_slice %6 {offsets = [0, 16], sizes = [1, 16], strides = [1, 1]} : vector<1x64xf32> to vector<1x16xf32>
    %60 = vector.broadcast %59 : vector<1x16xf32> to vector<128x16xf32>
    %61 = arith.addf %58, %60 : vector<128x16xf32>
    %c0_34 = arith.constant 0 : index
    %c1_35 = arith.constant 1 : index
    %c0_36 = arith.constant 0 : index
    %c0_37 = arith.constant 0 : index
    %62 = vector.load %arg4[%c0_34, %c1_35, %c0_36, %c0_37] : memref<1x4x64x16xf32, #tpu.memory_space<vmem>>, vector<1x1x64x16xf32>
    %63 = vector.shape_cast %62 : vector<1x1x64x16xf32> to vector<64x16xf32>
    %cst_38 = arith.constant dense<0.000000e+00> : vector<128x16xf32>
    %64 = tpu.matmul %3, %63, %cst_38 {dimension_numbers = #tpu.dot_dimension_numbers<[1], [0], [0], [1], [0, 0, 1, 1], [], []>} : vector<128x64xf32>, vector<64x16xf32>, vector<128x16xf32> -> vector<128x16xf32>
    %65 = vector.extract_strided_slice %7 {offsets = [0, 16], sizes = [1, 16], strides = [1, 1]} : vector<1x64xf32> to vector<1x16xf32>
    %66 = vector.broadcast %65 : vector<1x16xf32> to vector<128x16xf32>
    %67 = arith.addf %64, %66 : vector<128x16xf32>
    %c0_39 = arith.constant 0 : index
    %c1_40 = arith.constant 1 : index
    %c0_41 = arith.constant 0 : index
    %c0_42 = arith.constant 0 : index
    %68 = vector.load %arg5[%c0_39, %c1_40, %c0_41, %c0_42] : memref<1x4x64x16xf32, #tpu.memory_space<vmem>>, vector<1x1x64x16xf32>
    %69 = vector.shape_cast %68 : vector<1x1x64x16xf32> to vector<64x16xf32>
    %cst_43 = arith.constant dense<0.000000e+00> : vector<128x16xf32>
    %70 = tpu.matmul %3, %69, %cst_43 {dimension_numbers = #tpu.dot_dimension_numbers<[1], [0], [0], [1], [0, 0, 1, 1], [], []>} : vector<128x64xf32>, vector<64x16xf32>, vector<128x16xf32> -> vector<128x16xf32>
    %71 = vector.extract_strided_slice %8 {offsets = [0, 16], sizes = [1, 16], strides = [1, 1]} : vector<1x64xf32> to vector<1x16xf32>
    %72 = vector.broadcast %71 : vector<1x16xf32> to vector<128x16xf32>
    %73 = arith.addf %70, %72 : vector<128x16xf32>
    %74 = vector.shape_cast %61 : vector<128x16xf32> to vector<8x16x16xf32>
    %75 = vector.shape_cast %67 : vector<128x16xf32> to vector<8x16x16xf32>
    %76 = vector.shape_cast %73 : vector<128x16xf32> to vector<8x16x16xf32>
    "tpu.trace_start"() <{level = 10 : i32, message = "bqd,bkd->bqk"}> : () -> ()
    %cst_44 = arith.constant dense<0.000000e+00> : vector<8x16x16xf32>
    %77 = tpu.matmul %74, %75, %cst_44 {dimension_numbers = #tpu.dot_dimension_numbers<[2], [2], [1], [1], [0, 0, 0, 1, 1, 1], [0], [0]>} : vector<8x16x16xf32>, vector<8x16x16xf32>, vector<8x16x16xf32> -> vector<8x16x16xf32>
    "tpu.trace_stop"() : () -> ()
    %cst_45 = arith.constant 2.500000e-01 : f32
    %78 = vector.broadcast %cst_45 : f32 to vector<8x16x16xf32>
    %79 = arith.mulf %77, %78 : vector<8x16x16xf32>
    %cst_46 = arith.constant dense<0xFF800000> : vector<8x16xf32>
    %80 = vector.multi_reduction <maximumf>, %79, %cst_46 [2] : vector<8x16x16xf32> to vector<8x16xf32>
    %81 = vector.shape_cast %80 : vector<8x16xf32> to vector<8x16x1xf32>
    %82 = vector.broadcast %81 : vector<8x16x1xf32> to vector<8x16x16xf32>
    %83 = arith.subf %79, %82 : vector<8x16x16xf32>
    %84 = math.exp %83 : vector<8x16x16xf32>
    %cst_47 = arith.constant dense<0.000000e+00> : vector<8x16xf32>
    %85 = vector.multi_reduction <add>, %84, %cst_47 [2] : vector<8x16x16xf32> to vector<8x16xf32>
    %86 = vector.shape_cast %85 : vector<8x16xf32> to vector<8x16x1xf32>
    %87 = tpu.reciprocal %86 {approx = true} : vector<8x16x1xf32> -> vector<8x16x1xf32>
    %88 = vector.broadcast %87 : vector<8x16x1xf32> to vector<8x16x16xf32>
    %89 = arith.mulf %84, %88 : vector<8x16x16xf32>
    "tpu.trace_start"() <{level = 10 : i32, message = "bqk,bkd->bqd"}> : () -> ()
    %cst_48 = arith.constant dense<0.000000e+00> : vector<8x16x16xf32>
    %90 = tpu.matmul %89, %76, %cst_48 {dimension_numbers = #tpu.dot_dimension_numbers<[2], [1], [1], [2], [0, 0, 0, 1, 1, 2], [0], [0]>} : vector<8x16x16xf32>, vector<8x16x16xf32>, vector<8x16x16xf32> -> vector<8x16x16xf32>
    "tpu.trace_stop"() : () -> ()
    %91 = vector.shape_cast %90 : vector<8x16x16xf32> to vector<128x16xf32>
    %c0_49 = arith.constant 0 : index
    %c1_50 = arith.constant 1 : index
    %c0_51 = arith.constant 0 : index
    %c0_52 = arith.constant 0 : index
    %92 = vector.load %arg6[%c0_49, %c1_50, %c0_51, %c0_52] : memref<1x4x16x64xf32, #tpu.memory_space<vmem>>, vector<1x1x16x64xf32>
    %93 = vector.shape_cast %92 : vector<1x1x16x64xf32> to vector<16x64xf32>
    %cst_53 = arith.constant dense<0.000000e+00> : vector<128x64xf32>
    %94 = tpu.matmul %91, %93, %cst_53 {dimension_numbers = #tpu.dot_dimension_numbers<[1], [0], [0], [1], [0, 0, 1, 1], [], []>} : vector<128x16xf32>, vector<16x64xf32>, vector<128x64xf32> -> vector<128x64xf32>
    %95 = arith.addf %55, %94 : vector<128x64xf32>
    %c0_54 = arith.constant 0 : index
    %c2 = arith.constant 2 : index
    %c0_55 = arith.constant 0 : index
    %c0_56 = arith.constant 0 : index
    %96 = vector.load %arg3[%c0_54, %c2, %c0_55, %c0_56] : memref<1x4x64x16xf32, #tpu.memory_space<vmem>>, vector<1x1x64x16xf32>
    %97 = vector.shape_cast %96 : vector<1x1x64x16xf32> to vector<64x16xf32>
    %cst_57 = arith.constant dense<0.000000e+00> : vector<128x16xf32>
    %98 = tpu.matmul %3, %97, %cst_57 {dimension_numbers = #tpu.dot_dimension_numbers<[1], [0], [0], [1], [0, 0, 1, 1], [], []>} : vector<128x64xf32>, vector<64x16xf32>, vector<128x16xf32> -> vector<128x16xf32>
    %99 = vector.extract_strided_slice %6 {offsets = [0, 32], sizes = [1, 16], strides = [1, 1]} : vector<1x64xf32> to vector<1x16xf32>
    %100 = vector.broadcast %99 : vector<1x16xf32> to vector<128x16xf32>
    %101 = arith.addf %98, %100 : vector<128x16xf32>
    %c0_58 = arith.constant 0 : index
    %c2_59 = arith.constant 2 : index
    %c0_60 = arith.constant 0 : index
    %c0_61 = arith.constant 0 : index
    %102 = vector.load %arg4[%c0_58, %c2_59, %c0_60, %c0_61] : memref<1x4x64x16xf32, #tpu.memory_space<vmem>>, vector<1x1x64x16xf32>
    %103 = vector.shape_cast %102 : vector<1x1x64x16xf32> to vector<64x16xf32>
    %cst_62 = arith.constant dense<0.000000e+00> : vector<128x16xf32>
    %104 = tpu.matmul %3, %103, %cst_62 {dimension_numbers = #tpu.dot_dimension_numbers<[1], [0], [0], [1], [0, 0, 1, 1], [], []>} : vector<128x64xf32>, vector<64x16xf32>, vector<128x16xf32> -> vector<128x16xf32>
    %105 = vector.extract_strided_slice %7 {offsets = [0, 32], sizes = [1, 16], strides = [1, 1]} : vector<1x64xf32> to vector<1x16xf32>
    %106 = vector.broadcast %105 : vector<1x16xf32> to vector<128x16xf32>
    %107 = arith.addf %104, %106 : vector<128x16xf32>
    %c0_63 = arith.constant 0 : index
    %c2_64 = arith.constant 2 : index
    %c0_65 = arith.constant 0 : index
    %c0_66 = arith.constant 0 : index
    %108 = vector.load %arg5[%c0_63, %c2_64, %c0_65, %c0_66] : memref<1x4x64x16xf32, #tpu.memory_space<vmem>>, vector<1x1x64x16xf32>
    %109 = vector.shape_cast %108 : vector<1x1x64x16xf32> to vector<64x16xf32>
    %cst_67 = arith.constant dense<0.000000e+00> : vector<128x16xf32>
    %110 = tpu.matmul %3, %109, %cst_67 {dimension_numbers = #tpu.dot_dimension_numbers<[1], [0], [0], [1], [0, 0, 1, 1], [], []>} : vector<128x64xf32>, vector<64x16xf32>, vector<128x16xf32> -> vector<128x16xf32>
    %111 = vector.extract_strided_slice %8 {offsets = [0, 32], sizes = [1, 16], strides = [1, 1]} : vector<1x64xf32> to vector<1x16xf32>
    %112 = vector.broadcast %111 : vector<1x16xf32> to vector<128x16xf32>
    %113 = arith.addf %110, %112 : vector<128x16xf32>
    %114 = vector.shape_cast %101 : vector<128x16xf32> to vector<8x16x16xf32>
    %115 = vector.shape_cast %107 : vector<128x16xf32> to vector<8x16x16xf32>
    %116 = vector.shape_cast %113 : vector<128x16xf32> to vector<8x16x16xf32>
    "tpu.trace_start"() <{level = 10 : i32, message = "bqd,bkd->bqk"}> : () -> ()
    %cst_68 = arith.constant dense<0.000000e+00> : vector<8x16x16xf32>
    %117 = tpu.matmul %114, %115, %cst_68 {dimension_numbers = #tpu.dot_dimension_numbers<[2], [2], [1], [1], [0, 0, 0, 1, 1, 1], [0], [0]>} : vector<8x16x16xf32>, vector<8x16x16xf32>, vector<8x16x16xf32> -> vector<8x16x16xf32>
    "tpu.trace_stop"() : () -> ()
    %cst_69 = arith.constant 2.500000e-01 : f32
    %118 = vector.broadcast %cst_69 : f32 to vector<8x16x16xf32>
    %119 = arith.mulf %117, %118 : vector<8x16x16xf32>
    %cst_70 = arith.constant dense<0xFF800000> : vector<8x16xf32>
    %120 = vector.multi_reduction <maximumf>, %119, %cst_70 [2] : vector<8x16x16xf32> to vector<8x16xf32>
    %121 = vector.shape_cast %120 : vector<8x16xf32> to vector<8x16x1xf32>
    %122 = vector.broadcast %121 : vector<8x16x1xf32> to vector<8x16x16xf32>
    %123 = arith.subf %119, %122 : vector<8x16x16xf32>
    %124 = math.exp %123 : vector<8x16x16xf32>
    %cst_71 = arith.constant dense<0.000000e+00> : vector<8x16xf32>
    %125 = vector.multi_reduction <add>, %124, %cst_71 [2] : vector<8x16x16xf32> to vector<8x16xf32>
    %126 = vector.shape_cast %125 : vector<8x16xf32> to vector<8x16x1xf32>
    %127 = tpu.reciprocal %126 {approx = true} : vector<8x16x1xf32> -> vector<8x16x1xf32>
    %128 = vector.broadcast %127 : vector<8x16x1xf32> to vector<8x16x16xf32>
    %129 = arith.mulf %124, %128 : vector<8x16x16xf32>
    "tpu.trace_start"() <{level = 10 : i32, message = "bqk,bkd->bqd"}> : () -> ()
    %cst_72 = arith.constant dense<0.000000e+00> : vector<8x16x16xf32>
    %130 = tpu.matmul %129, %116, %cst_72 {dimension_numbers = #tpu.dot_dimension_numbers<[2], [1], [1], [2], [0, 0, 0, 1, 1, 2], [0], [0]>} : vector<8x16x16xf32>, vector<8x16x16xf32>, vector<8x16x16xf32> -> vector<8x16x16xf32>
    "tpu.trace_stop"() : () -> ()
    %131 = vector.shape_cast %130 : vector<8x16x16xf32> to vector<128x16xf32>
    %c0_73 = arith.constant 0 : index
    %c2_74 = arith.constant 2 : index
    %c0_75 = arith.constant 0 : index
    %c0_76 = arith.constant 0 : index
    %132 = vector.load %arg6[%c0_73, %c2_74, %c0_75, %c0_76] : memref<1x4x16x64xf32, #tpu.memory_space<vmem>>, vector<1x1x16x64xf32>
    %133 = vector.shape_cast %132 : vector<1x1x16x64xf32> to vector<16x64xf32>
    %cst_77 = arith.constant dense<0.000000e+00> : vector<128x64xf32>
    %134 = tpu.matmul %131, %133, %cst_77 {dimension_numbers = #tpu.dot_dimension_numbers<[1], [0], [0], [1], [0, 0, 1, 1], [], []>} : vector<128x16xf32>, vector<16x64xf32>, vector<128x64xf32> -> vector<128x64xf32>
    %135 = arith.addf %95, %134 : vector<128x64xf32>
    %c0_78 = arith.constant 0 : index
    %c3 = arith.constant 3 : index
    %c0_79 = arith.constant 0 : index
    %c0_80 = arith.constant 0 : index
    %136 = vector.load %arg3[%c0_78, %c3, %c0_79, %c0_80] : memref<1x4x64x16xf32, #tpu.memory_space<vmem>>, vector<1x1x64x16xf32>
    %137 = vector.shape_cast %136 : vector<1x1x64x16xf32> to vector<64x16xf32>
    %cst_81 = arith.constant dense<0.000000e+00> : vector<128x16xf32>
    %138 = tpu.matmul %3, %137, %cst_81 {dimension_numbers = #tpu.dot_dimension_numbers<[1], [0], [0], [1], [0, 0, 1, 1], [], []>} : vector<128x64xf32>, vector<64x16xf32>, vector<128x16xf32> -> vector<128x16xf32>
    %139 = vector.extract_strided_slice %6 {offsets = [0, 48], sizes = [1, 16], strides = [1, 1]} : vector<1x64xf32> to vector<1x16xf32>
    %140 = vector.broadcast %139 : vector<1x16xf32> to vector<128x16xf32>
    %141 = arith.addf %138, %140 : vector<128x16xf32>
    %c0_82 = arith.constant 0 : index
    %c3_83 = arith.constant 3 : index
    %c0_84 = arith.constant 0 : index
    %c0_85 = arith.constant 0 : index
    %142 = vector.load %arg4[%c0_82, %c3_83, %c0_84, %c0_85] : memref<1x4x64x16xf32, #tpu.memory_space<vmem>>, vector<1x1x64x16xf32>
    %143 = vector.shape_cast %142 : vector<1x1x64x16xf32> to vector<64x16xf32>
    %cst_86 = arith.constant dense<0.000000e+00> : vector<128x16xf32>
    %144 = tpu.matmul %3, %143, %cst_86 {dimension_numbers = #tpu.dot_dimension_numbers<[1], [0], [0], [1], [0, 0, 1, 1], [], []>} : vector<128x64xf32>, vector<64x16xf32>, vector<128x16xf32> -> vector<128x16xf32>
    %145 = vector.extract_strided_slice %7 {offsets = [0, 48], sizes = [1, 16], strides = [1, 1]} : vector<1x64xf32> to vector<1x16xf32>
    %146 = vector.broadcast %145 : vector<1x16xf32> to vector<128x16xf32>
    %147 = arith.addf %144, %146 : vector<128x16xf32>
    %c0_87 = arith.constant 0 : index
    %c3_88 = arith.constant 3 : index
    %c0_89 = arith.constant 0 : index
    %c0_90 = arith.constant 0 : index
    %148 = vector.load %arg5[%c0_87, %c3_88, %c0_89, %c0_90] : memref<1x4x64x16xf32, #tpu.memory_space<vmem>>, vector<1x1x64x16xf32>
    %149 = vector.shape_cast %148 : vector<1x1x64x16xf32> to vector<64x16xf32>
    %cst_91 = arith.constant dense<0.000000e+00> : vector<128x16xf32>
    %150 = tpu.matmul %3, %149, %cst_91 {dimension_numbers = #tpu.dot_dimension_numbers<[1], [0], [0], [1], [0, 0, 1, 1], [], []>} : vector<128x64xf32>, vector<64x16xf32>, vector<128x16xf32> -> vector<128x16xf32>
    %151 = vector.extract_strided_slice %8 {offsets = [0, 48], sizes = [1, 16], strides = [1, 1]} : vector<1x64xf32> to vector<1x16xf32>
    %152 = vector.broadcast %151 : vector<1x16xf32> to vector<128x16xf32>
    %153 = arith.addf %150, %152 : vector<128x16xf32>
    %154 = vector.shape_cast %141 : vector<128x16xf32> to vector<8x16x16xf32>
    %155 = vector.shape_cast %147 : vector<128x16xf32> to vector<8x16x16xf32>
    %156 = vector.shape_cast %153 : vector<128x16xf32> to vector<8x16x16xf32>
    "tpu.trace_start"() <{level = 10 : i32, message = "bqd,bkd->bqk"}> : () -> ()
    %cst_92 = arith.constant dense<0.000000e+00> : vector<8x16x16xf32>
    %157 = tpu.matmul %154, %155, %cst_92 {dimension_numbers = #tpu.dot_dimension_numbers<[2], [2], [1], [1], [0, 0, 0, 1, 1, 1], [0], [0]>} : vector<8x16x16xf32>, vector<8x16x16xf32>, vector<8x16x16xf32> -> vector<8x16x16xf32>
    "tpu.trace_stop"() : () -> ()
    %cst_93 = arith.constant 2.500000e-01 : f32
    %158 = vector.broadcast %cst_93 : f32 to vector<8x16x16xf32>
    %159 = arith.mulf %157, %158 : vector<8x16x16xf32>
    %cst_94 = arith.constant dense<0xFF800000> : vector<8x16xf32>
    %160 = vector.multi_reduction <maximumf>, %159, %cst_94 [2] : vector<8x16x16xf32> to vector<8x16xf32>
    %161 = vector.shape_cast %160 : vector<8x16xf32> to vector<8x16x1xf32>
    %162 = vector.broadcast %161 : vector<8x16x1xf32> to vector<8x16x16xf32>
    %163 = arith.subf %159, %162 : vector<8x16x16xf32>
    %164 = math.exp %163 : vector<8x16x16xf32>
    %cst_95 = arith.constant dense<0.000000e+00> : vector<8x16xf32>
    %165 = vector.multi_reduction <add>, %164, %cst_95 [2] : vector<8x16x16xf32> to vector<8x16xf32>
    %166 = vector.shape_cast %165 : vector<8x16xf32> to vector<8x16x1xf32>
    %167 = tpu.reciprocal %166 {approx = true} : vector<8x16x1xf32> -> vector<8x16x1xf32>
    %168 = vector.broadcast %167 : vector<8x16x1xf32> to vector<8x16x16xf32>
    %169 = arith.mulf %164, %168 : vector<8x16x16xf32>
    "tpu.trace_start"() <{level = 10 : i32, message = "bqk,bkd->bqd"}> : () -> ()
    %cst_96 = arith.constant dense<0.000000e+00> : vector<8x16x16xf32>
    %170 = tpu.matmul %169, %156, %cst_96 {dimension_numbers = #tpu.dot_dimension_numbers<[2], [1], [1], [2], [0, 0, 0, 1, 1, 2], [0], [0]>} : vector<8x16x16xf32>, vector<8x16x16xf32>, vector<8x16x16xf32> -> vector<8x16x16xf32>
    "tpu.trace_stop"() : () -> ()
    %171 = vector.shape_cast %170 : vector<8x16x16xf32> to vector<128x16xf32>
    %c0_97 = arith.constant 0 : index
    %c3_98 = arith.constant 3 : index
    %c0_99 = arith.constant 0 : index
    %c0_100 = arith.constant 0 : index
    %172 = vector.load %arg6[%c0_97, %c3_98, %c0_99, %c0_100] : memref<1x4x16x64xf32, #tpu.memory_space<vmem>>, vector<1x1x16x64xf32>
    %173 = vector.shape_cast %172 : vector<1x1x16x64xf32> to vector<16x64xf32>
    %cst_101 = arith.constant dense<0.000000e+00> : vector<128x64xf32>
    %174 = tpu.matmul %171, %173, %cst_101 {dimension_numbers = #tpu.dot_dimension_numbers<[1], [0], [0], [1], [0, 0, 1, 1], [], []>} : vector<128x16xf32>, vector<16x64xf32>, vector<128x64xf32> -> vector<128x64xf32>
    %175 = arith.addf %135, %174 : vector<128x64xf32>
    %176 = vector.broadcast %9 : vector<1x64xf32> to vector<128x64xf32>
    %177 = arith.addf %175, %176 : vector<128x64xf32>
    %178 = arith.addf %3, %177 : vector<128x64xf32>
    %179 = vector.broadcast %10 : vector<1x64xf32> to vector<128x64xf32>
    %180 = arith.mulf %178, %179 : vector<128x64xf32>
    %181 = vector.broadcast %11 : vector<1x64xf32> to vector<128x64xf32>
    %182 = arith.addf %180, %181 : vector<128x64xf32>
    %c0_102 = arith.constant 0 : index
    %c0_103 = arith.constant 0 : index
    %c0_104 = arith.constant 0 : index
    %183 = vector.load %arg7[%c0_102, %c0_103, %c0_104] : memref<1x64x128xf32, #tpu.memory_space<vmem>>, vector<1x64x128xf32>
    %184 = vector.shape_cast %183 : vector<1x64x128xf32> to vector<64x128xf32>
    %cst_105 = arith.constant dense<0.000000e+00> : vector<128x128xf32>
    %185 = tpu.matmul %182, %184, %cst_105 {dimension_numbers = #tpu.dot_dimension_numbers<[1], [0], [0], [1], [0, 0, 1, 1], [], []>} : vector<128x64xf32>, vector<64x128xf32>, vector<128x128xf32> -> vector<128x128xf32>
    %c0_106 = arith.constant 0 : index
    %c0_107 = arith.constant 0 : index
    %c0_108 = arith.constant 0 : index
    %186 = vector.load %arg10[%c0_106, %c0_107, %c0_108] : memref<1x1x128xf32, #tpu.memory_space<vmem>>, vector<1x1x128xf32>
    %187 = vector.shape_cast %186 : vector<1x1x128xf32> to vector<1x128xf32>
    %188 = vector.broadcast %187 : vector<1x128xf32> to vector<128x128xf32>
    %189 = arith.addf %185, %188 : vector<128x128xf32>
    %190 = arith.mulf %189, %189 : vector<128x128xf32>
    %191 = arith.mulf %189, %190 : vector<128x128xf32>
    %cst_109 = arith.constant 4.471500e-02 : f32
    %192 = vector.broadcast %cst_109 : f32 to vector<128x128xf32>
    %193 = arith.mulf %192, %191 : vector<128x128xf32>
    %194 = arith.addf %189, %193 : vector<128x128xf32>
    %cst_110 = arith.constant 0.797884583 : f32
    %195 = vector.broadcast %cst_110 : f32 to vector<128x128xf32>
    %196 = arith.mulf %195, %194 : vector<128x128xf32>
    %197 = math.tanh %196 : vector<128x128xf32>
    %cst_111 = arith.constant 1.000000e+00 : f32
    %198 = vector.broadcast %cst_111 : f32 to vector<128x128xf32>
    %199 = arith.addf %198, %197 : vector<128x128xf32>
    %cst_112 = arith.constant 5.000000e-01 : f32
    %200 = vector.broadcast %cst_112 : f32 to vector<128x128xf32>
    %201 = arith.mulf %200, %199 : vector<128x128xf32>
    %202 = arith.mulf %189, %201 : vector<128x128xf32>
    %c0_113 = arith.constant 0 : index
    %c0_114 = arith.constant 0 : index
    %c0_115 = arith.constant 0 : index
    %203 = vector.load %arg8[%c0_113, %c0_114, %c0_115] : memref<1x128x64xf32, #tpu.memory_space<vmem>>, vector<1x128x64xf32>
    %204 = vector.shape_cast %203 : vector<1x128x64xf32> to vector<128x64xf32>
    %cst_116 = arith.constant dense<0.000000e+00> : vector<128x64xf32>
    %205 = tpu.matmul %202, %204, %cst_116 {dimension_numbers = #tpu.dot_dimension_numbers<[1], [0], [0], [1], [0, 0, 1, 1], [], []>} : vector<128x128xf32>, vector<128x64xf32>, vector<128x64xf32> -> vector<128x64xf32>
    %206 = vector.broadcast %12 : vector<1x64xf32> to vector<128x64xf32>
    %207 = arith.addf %205, %206 : vector<128x64xf32>
    %208 = arith.addf %182, %207 : vector<128x64xf32>
    %209 = vector.broadcast %13 : vector<1x64xf32> to vector<128x64xf32>
    %210 = arith.mulf %208, %209 : vector<128x64xf32>
    %211 = vector.broadcast %14 : vector<1x64xf32> to vector<128x64xf32>
    %212 = arith.addf %210, %211 : vector<128x64xf32>
    %c0_117 = arith.constant 0 : index
    %c0_118 = arith.constant 0 : index
    %213 = vector.load %arg12[%c0_117, %c0_118] : memref<128x64xf32, #tpu.memory_space<vmem>>, vector<128x64xf32>
    tpu.vector_store %arg12[%c0_117, %c0_118], %212 {strides = array<i32>} : memref<128x64xf32, #tpu.memory_space<vmem>>, vector<128x64xf32>,
    %c1_i32 = arith.constant 1 : i32
    %214 = arith.cmpi eq, %arg1, %c1_i32 : i32
    %215 = arith.extui %214 : i1 to i32
    %c0_i32_119 = arith.constant 0 : i32
    %216 = arith.cmpi ne, %215, %c0_i32_119 : i32
    scf.if %216 {
      %c0_120 = arith.constant 0 : index
      %c0_121 = arith.constant 0 : index
      %217 = vector.load %arg11[%c0_120, %c0_121] : memref<128x64xf32, #tpu.memory_space<vmem>>, vector<128x64xf32>
      tpu.vector_store %arg11[%c0_120, %c0_121], %212 {strides = array<i32>} : memref<128x64xf32, #tpu.memory_space<vmem>>, vector<128x64xf32>,
    } else {
    }
    return
  }
  func.func @transform_0(%arg0: i32, %arg1: i32) -> (i32, i32) {
    %c0_i32 = arith.constant 0 : i32
    %c0_i32_0 = arith.constant 0 : i32
    return %arg0, %c0_i32 : i32, i32
  }
  func.func @transform_1(%arg0: i32, %arg1: i32) -> (i32, i32, i32, i32) {
    %c0_i32 = arith.constant 0 : i32
    %c0_i32_0 = arith.constant 0 : i32
    %c0_i32_1 = arith.constant 0 : i32
    %c0_i32_2 = arith.constant 0 : i32
    return %arg1, %c0_i32, %c0_i32_0, %c0_i32_1 : i32, i32, i32, i32
  }
  func.func @transform_2(%arg0: i32, %arg1: i32) -> (i32, i32, i32, i32) {
    %c0_i32 = arith.constant 0 : i32
    %c0_i32_0 = arith.constant 0 : i32
    %c0_i32_1 = arith.constant 0 : i32
    %c0_i32_2 = arith.constant 0 : i32
    return %arg1, %c0_i32, %c0_i32_0, %c0_i32_1 : i32, i32, i32, i32
  }
  func.func @transform_3(%arg0: i32, %arg1: i32) -> (i32, i32, i32, i32) {
    %c0_i32 = arith.constant 0 : i32
    %c0_i32_0 = arith.constant 0 : i32
    %c0_i32_1 = arith.constant 0 : i32
    %c0_i32_2 = arith.constant 0 : i32
    return %arg1, %c0_i32, %c0_i32_0, %c0_i32_1 : i32, i32, i32, i32
  }
  func.func @transform_4(%arg0: i32, %arg1: i32) -> (i32, i32, i32, i32) {
    %c0_i32 = arith.constant 0 : i32
    %c0_i32_0 = arith.constant 0 : i32
    %c0_i32_1 = arith.constant 0 : i32
    %c0_i32_2 = arith.constant 0 : i32
    return %arg1, %c0_i32, %c0_i32_0, %c0_i32_1 : i32, i32, i32, i32
  }
  func.func @transform_5(%arg0: i32, %arg1: i32) -> (i32, i32, i32) {
    %c0_i32 = arith.constant 0 : i32
    %c0_i32_0 = arith.constant 0 : i32
    %c0_i32_1 = arith.constant 0 : i32
    return %arg1, %c0_i32, %c0_i32_0 : i32, i32, i32
  }
  func.func @transform_6(%arg0: i32, %arg1: i32) -> (i32, i32, i32) {
    %c0_i32 = arith.constant 0 : i32
    %c0_i32_0 = arith.constant 0 : i32
    %c0_i32_1 = arith.constant 0 : i32
    return %arg1, %c0_i32, %c0_i32_0 : i32, i32, i32
  }
  func.func @transform_7(%arg0: i32, %arg1: i32) -> (i32, i32, i32) {
    %c0_i32 = arith.constant 0 : i32
    %c0_i32_0 = arith.constant 0 : i32
    %c0_i32_1 = arith.constant 0 : i32
    return %arg1, %c0_i32, %c0_i32_0 : i32, i32, i32
  }
  func.func @transform_8(%arg0: i32, %arg1: i32) -> (i32, i32, i32) {
    %c0_i32 = arith.constant 0 : i32
    %c0_i32_0 = arith.constant 0 : i32
    %c0_i32_1 = arith.constant 0 : i32
    return %arg1, %c0_i32, %c0_i32_0 : i32, i32, i32
  }
  func.func @transform_9(%arg0: i32, %arg1: i32) -> (i32, i32) {
    %c0_i32 = arith.constant 0 : i32
    %c0_i32_0 = arith.constant 0 : i32
    return %arg0, %c0_i32 : i32, i32
  }
}

</mosaic_0001>

<bundles_post_ra>
// kernel: tst_encoder_forward.1
= control target key start
LH: loop header
LB: loop body
LE: loop exit
PB: predicated region body
PF: predicated region fallthrough
CT: control target
= control target key end

     0   :  { %s16075_s0 = inlined_call_operand.vmem [shape: f32[256,64], index: 0, kind: input, shape index: {}]   ;;  %s16076_s1 = inlined_call_operand.vmem [shape: f32[2,4,64,16], index: 1, kind: input, shape index: {}]   ;;  %s16077_s2 = inlined_call_operand.vmem [shape: f32[2,4,64,16], index: 2, kind: input, shape index: {}]   ;;  %s16078_s3 = inlined_call_operand.vmem [shape: f32[2,4,64,16], index: 3, kind: input, shape index: {}]   ;;  %s16079_s4 = inlined_call_operand.vmem [shape: f32[2,4,16,64], index: 4, kind: input, shape index: {}]   ;;  %s16080_s5 = inlined_call_operand.vmem [shape: f32[2,64,128], index: 5, kind: input, shape index: {}]   ;;  %s16081_s6 = inlined_call_operand.vmem [shape: f32[2,128,64], index: 6, kind: input, shape index: {}]   ;;  %s16082_s7 = inlined_call_operand.vmem [shape: f32[2,9,64], index: 7, kind: input, shape index: {}]   ;;  %s16083_s8 = inlined_call_operand.vmem [shape: f32[2,1,128], index: 8, kind: input, shape index: {}]   ;;  %s16084_s9 = inlined_call_operand.hbm [shape: f32[256,64], index: 9, kind: output, shape index: {}]  }
   0x1   :  { %16097 = sst [smem:[#allocation32_spill]] %s16075_s0 }
   0x2   :  { %16098 = sst [smem:[#allocation33_spill]] %s16076_s1 }
   0x3   :  { %16099 = sst [smem:[#allocation34_spill]] %s16077_s2 }
   0x4   :  { %16100 = sst [smem:[#allocation35_spill]] %s16078_s3 }
   0x5   :  { %16101 = sst [smem:[#allocation36_spill]] %s16079_s4 }
   0x6   :  { %16102 = sst [smem:[#allocation37_spill]] %s16084_s9 }
   0x7   :  { %14 = vsyncpa [#allocation4], 0 }
   0x8   :  { %16 = vsyncpa [#allocation4 + $0x1], 0  ;;  %s13284_s30 = smov 0   ;;  %s13286_s10 = smov 0  }
   0x9   :  { %s13288_s11 = smov 0   ;;  %s13290_s12 = smov 0  }
   0xa   :  { %s13292_s13 = smov 0   ;;  %s13294_s14 = smov 0  }
   0xb   :  { %s13296_s15 = smov 0   ;;  %s13298_s16 = smov 0  }
   0xc LB: > { %16103 = sst [smem:[#allocation6_spill]] %s13198_s30  ;;  %s10316_s17 = sadd.s32 4294967295, %s13226_s16   ;;  %s13226_s16 = sphi %s13298_s16, %s22_s16   ;;  %s13222_s15 = sphi %s13296_s15, %s16163_s15   ;;  %s13218_s14 = sphi %s13294_s14, %s16162_s14   ;;  %s13214_s13 = sphi %s13292_s13, %s16161_s13   ;;  %s13210_s12 = sphi %s13290_s12, %s16160_s12   ;;  %s13206_s11 = sphi %s13288_s11, %s16159_s11   ;;  %s13202_s10 = sphi %s13286_s10, %s16165_s10   ;;  %s13198_s30 = sphi %s13284_s30, %s16164_s30  }
   0xd   : > { %16104 = sst [smem:[#allocation7_spill]] %s13206_s11  ;;  %s10317_s18 = sadd.s32 4294967294, %s13226_s16  }
   0xe   : > { %16105 = sst [smem:[#allocation8_spill]] %s13218_s14  ;;  %s31_s19 = sadd.s32 1, %s13218_s14 }
   0xf   : > { %16106 = sst [smem:[#allocation9_spill]] %s13222_s15  ;;  %p32_p0 = scmp.ge.s32.totalorder %s31_s19, 2 }
  0x10   : > { %16107 = sst [smem:[#allocation10_spill]] %s13226_s16  ;;  %s34_s20 = sadd.s32 1, %s13222_s15 }
  0x11   : > { %p285_p1 = scmp.ne.s32.totalorder %s13206_s11, %s13202_s10  ;;  %p286_p2 = scmp.eq.s32.totalorder %s10316_s17, 3 }
  0x12   : > { %s16167_s19 = smov (%p32_p0, %s31_s19), 0  ;;  %s16169_s20 = smov (!%p32_p0, %s34_s20), %s13222_s15 }
  0x13   : > { %16108 = sst [smem:[#allocation11_spill]] %s16167_s19  ;;  %p13333_p3 = por %p286_p2, %p285_p1 }
  0x14   : > { %p291_p4 = scmp.ne.s32.totalorder %s13202_s10, %s13198_s30  ;;  %p36_p5 = scmp.ge.s32.totalorder %s16169_s20, 2 }
  0x15   : > { %p292_p6 = scmp.eq.s32.totalorder %s10317_s18, 3  ;;  %p10320_p7 = scmp.ge.s32.totalorder %s13226_s16, 1 }
  0x16   : > { %p381_p8 = scmp.lt.s32.totalorder %s13226_s16, 5  ;;  %s16171_s20 = smov (%p36_p5, %s16169_s20), 0 }
  0x17   : > { %16110 = sst [smem:[#allocation12_spill]] %s16171_s20  ;;  %p13343_p9 = por %p292_p6, %p291_p4 }
  0x18   : > { %p382_p10 = pnand %p10320_p7, %p381_p8  ;;  %s272_s23 = ssub.s32 %s13222_s15, %s16171_s20 }
  0x19   : > { %s16111_s22 = scalar_select %p13343_p9, 1, 0 }
  0x1a   : > { %s275_s24 = sadd.s32 1, %s13206_s11  ;;  %p273_p11 = scmp.eq.s32.totalorder %s272_s23, 0 }
  0x1b   : > { %16112 = sst [smem:[#allocation13_spill]] %s16111_s22  ;;  %385 = sbr.rel (%p382_p10) target bundleno = 4417 (0x1141), region = 56 }
  0x1c   : > { %s13351_s25 = scalar_select %p273_p11, %s13206_s11, %s275_s24  }
  0x1e   : > { %16113 = sst [smem:[#allocation14_spill]] %s13351_s25 }
  0x20   : > { %s16087_s26 = sand.u32 1, %s13202_s10   ;;  %s10322_s27 = sshll.u32 %s13214_s13, 4 }
  0x21   : > { %s10321_s28 = sshll.u32 %s16087_s26, 7  ;;  %p456_p12 = scmp.lt.s32.totalorder %s10322_s27, 31 }
  0x22   : > { %p461_p13 = scmp.lt.s32.totalorder %s13210_s12, 1  ;;  %s16114_s0 = sld [smem:[#allocation32_spill]] }
  0x23   : > { %s16173_s27 = smov (!%p456_p12, %s10322_s27), 31  ;;  %s16115_s1 = sld [smem:[#allocation33_spill]] }
  0x24   : > { %s13359_s29 = scalar_select %p461_p13, %s13210_s12, 1 }
  0x25   : > { %s10323_s17 = sshll.u32 %s16173_s27, 3  ;;  %s16116_s2 = sld [smem:[#allocation34_spill]] }
  0x26   : > { %s10889_s20 = sshll.u32 %s13359_s29, 8  ;;  %s16117_s3 = sld [smem:[#allocation35_spill]] }
  0x27   : > { %s10892_s16 = sshll.u32 %s13359_s29, 6  ;;  %s16118_s4 = sld [smem:[#allocation36_spill]] }
  0x28   : > { %s13364_s24 = scalar_lea.vmem %s16114_s0, %s10323_s17  ;;  %s13391_s19 = scalar_lea.vmem %s16080_s5, %s10892_s16 }
  0x29   : > { %s13370_s26 = scalar_lea.vmem %s16115_s1, %s10889_s20  ;;  %s10894_s1 = sshll.u32 %s13359_s29, 7 }
  0x2a   : > { %s10895_s14 = sshll.u32 %s13359_s29, 4  ;;  %s13398_s9 = scalar_lea.vmem %s16081_s6, %s10894_s1 }
  0x2b   : > { %s13375_s11 = scalar_lea.vmem %s16116_s2, %s10889_s20  ;;  %s13403_s22 = scalar_lea.vmem %s16082_s7, %s10895_s14 }
  0x2c   : > { %s13380_s27 = scalar_lea.vmem %s16117_s3, %s10889_s20  ;;  %s498_s3 = scalar_lea.vmem %s16083_s8, %s13359_s29 }
  0x2d   : > { %s13386_s23 = scalar_lea.vmem %s16118_s4, %s10892_s16  ;;  %s13409_s4 = scalar_lea.vmem [#allocation3], %s10321_s28 }
  0x2e   : > { %p10338_p0 = scmp.ne.s32.totalorder %s13210_s12, 0 }
  0x30   : > { %503 = sbr.rel (%p10338_p0) target bundleno = 62 (0x3e), region = 60 }
  0x35   : > { %v504_v0 = vld [vmem:[%s13364_s24] sm:$0xff]  ;;  %vm520_vm0 = vcmask 523264   ;;  %v505_v1 = vld [vmem:[%s13364_s24 + $0x8] sm:$0xff]  ;;  %v506_v2 = vld [vmem:[%s13364_s24 + $0x10] sm:$0xff] }
  0x36   : > { %521 = vst.msk [vmem:[#allocation2] sm:$0xff] %vm520_vm0, %v504_v0  ;;  %522 = vst.msk [vmem:[#allocation2 + $0x8] sm:$0xff] %vm520_vm0, %v505_v1  ;;  %v507_v3 = vld [vmem:[%s13364_s24 + $0x18] sm:$0xff]  ;;  %v508_v4 = vld [vmem:[%s13364_s24 + $0x20] sm:$0xff] }
  0x37   : > { %523 = vst.msk [vmem:[#allocation2 + $0x10] sm:$0xff] %vm520_vm0, %v506_v2  ;;  %v509_v5 = vld [vmem:[%s13364_s24 + $0x28] sm:$0xff]  ;;  %524 = vst.msk [vmem:[#allocation2 + $0x18] sm:$0xff] %vm520_vm0, %v507_v3  ;;  %v510_v6 = vld [vmem:[%s13364_s24 + $0x30] sm:$0xff] }
  0x38   : > { %525 = vst.msk [vmem:[#allocation2 + $0x20] sm:$0xff] %vm520_vm0, %v508_v4  ;;  %526 = vst.msk [vmem:[#allocation2 + $0x28] sm:$0xff] %vm520_vm0, %v509_v5  ;;  %v511_v7 = vld [vmem:[%s13364_s24 + $0x38] sm:$0xff]  ;;  %v512_v8 = vld [vmem:[%s13364_s24 + $0x40] sm:$0xff] }
  0x39   : > { %527 = vst.msk [vmem:[#allocation2 + $0x30] sm:$0xff] %vm520_vm0, %v510_v6  ;;  %528 = vst.msk [vmem:[#allocation2 + $0x38] sm:$0xff] %vm520_vm0, %v511_v7  ;;  %v513_v9 = vld [vmem:[%s13364_s24 + $0x48] sm:$0xff]  ;;  %v514_v10 = vld [vmem:[%s13364_s24 + $0x50] sm:$0xff] }
  0x3a   : > { %529 = vst.msk [vmem:[#allocation2 + $0x40] sm:$0xff] %vm520_vm0, %v512_v8  ;;  %v515_v11 = vld [vmem:[%s13364_s24 + $0x58] sm:$0xff]  ;;  %530 = vst.msk [vmem:[#allocation2 + $0x48] sm:$0xff] %vm520_vm0, %v513_v9  ;;  %v516_v12 = vld [vmem:[%s13364_s24 + $0x60] sm:$0xff] }
  0x3b   : > { %531 = vst.msk [vmem:[#allocation2 + $0x50] sm:$0xff] %vm520_vm0, %v514_v10  ;;  %532 = vst.msk [vmem:[#allocation2 + $0x58] sm:$0xff] %vm520_vm0, %v515_v11  ;;  %v517_v13 = vld [vmem:[%s13364_s24 + $0x68] sm:$0xff]  ;;  %v518_v14 = vld [vmem:[%s13364_s24 + $0x70] sm:$0xff] }
  0x3c   : > { %533 = vst.msk [vmem:[#allocation2 + $0x60] sm:$0xff] %vm520_vm0, %v516_v12  ;;  %534 = vst.msk [vmem:[#allocation2 + $0x68] sm:$0xff] %vm520_vm0, %v517_v13  ;;  %v519_v15 = vld [vmem:[%s13364_s24 + $0x78] sm:$0xff] }
  0x3d   : > { %535 = vst.msk [vmem:[#allocation2 + $0x70] sm:$0xff] %vm520_vm0, %v518_v14  ;;  %536 = vst.msk [vmem:[#allocation2 + $0x78] sm:$0xff] %vm520_vm0, %v519_v15 }
  0x3e PF: > { %v768_v16 = vld [vmem:[%s13375_s11 + $0x38] sm:$0xff]  ;;  %v767_v17 = vld [vmem:[%s13375_s11 + $0x30] sm:$0xff]  ;;  %v766_v20 = vld [vmem:[%s13375_s11 + $0x28] sm:$0xff]  ;;  %vm567_vm1 = vcmask 523264   ;;  %v563_v56 = vlaneseq  ;;  %vm1075_vm2 = vcmask 130048   ;;  %s13228_s0 = smov 112  }
  0x3f   : > { %v562_v18 = vld [vmem:[%s13370_s26 + $0x38] sm:$0xff]  ;;  %11609 = vmatprep.subr.mxu1 %v768_v16  ;;  %v561_v19 = vld [vmem:[%s13370_s26 + $0x30] sm:$0xff]  ;;  %v560_v21 = vld [vmem:[%s13370_s26 + $0x28] sm:$0xff]  ;;  %s13229_s1 = smov 96   ;;  %s13230_s2 = smov 80  }
  0x40   : > { %11569 = vmatprep.subr.mxu0 %v562_v18  ;;  %11610 = vmatpush3.msra.mxu1 %v768_v16  ;;  %v765_v22 = vld [vmem:[%s13375_s11 + $0x20] sm:$0xff]  ;;  %v764_v24 = vld [vmem:[%s13375_s11 + $0x18] sm:$0xff]  ;;  %v763_v26 = vld [vmem:[%s13375_s11 + $0x10] sm:$0xff]  ;;  %v13541_v57 = vshrl.u32 %v563_v56, 7  ;;  %p10883_p1 = scmp.ne.s32.totalorder %s13210_s12, 1 }
  0x41   : > { %11570 = vmatpush3.msra.mxu0 %v562_v18  ;;  %11611 = vmatprep.subr.mxu1 %v767_v17  ;;  %v559_v23 = vld [vmem:[%s13370_s26 + $0x20] sm:$0xff]  ;;  %v558_v25 = vld [vmem:[%s13370_s26 + $0x18] sm:$0xff]  ;;  %v557_v27 = vld [vmem:[%s13370_s26 + $0x10] sm:$0xff] }
  0x42   : > { %11571 = vmatprep.subr.mxu0 %v561_v19  ;;  %11612 = vmatpush3.msra.mxu1 %v767_v17  ;;  %v762_v28 = vld [vmem:[%s13375_s11 + $0x8] sm:$0xff]  ;;  %v13457_v29 = vld [vmem:[#allocation2] sm:$0xff]  ;;  %v13466_v34 = vld [vmem:[#allocation2 + $0x10] sm:$0xff]  ;;  %16119 = vst [vmem:[#allocation15_spill] sm:$0xff] %v13541_v57  ;;  %v771_v58 = vsub.s32 1, %v13541_v57  ;;  %v565_v61 = vsub.s32 0, %v13541_v57 }
  0x43   : > { %11572 = vmatpush3.msra.mxu0 %v561_v19  ;;  %11613 = vmatprep.subr.mxu1 %v766_v20  ;;  %v556_v30 = vld [vmem:[%s13370_s26 + $0x8] sm:$0xff]  ;;  %v761_v31 = vld [vmem:[%s13375_s11] sm:$0xff]  ;;  %v925_v35 = vld [vmem:[%s13380_s27 + $0x38] sm:$0xff] }
  0x44   : > { %11573 = vmatprep.subr.mxu0 %v560_v21  ;;  %11614 = vmatpush3.msra.mxu1 %v766_v20  ;;  %v555_v32 = vld [vmem:[%s13370_s26] sm:$0xff]  ;;  %v13464_v33 = vld [vmem:[#allocation2 + $0x8] sm:$0xff]  ;;  %v13475_v36 = vld [vmem:[#allocation2 + $0x18] sm:$0xff] }
  0x45   : > { %11574 = vmatpush3.msra.mxu0 %v560_v21  ;;  %11615 = vmatprep.subr.mxu1 %v765_v22  ;;  %v924_v37 = vld [vmem:[%s13380_s27 + $0x30] sm:$0xff]  ;;  %v13480_v38 = vld [vmem:[#allocation2 + $0x20] sm:$0xff]  ;;  %v923_v39 = vld [vmem:[%s13380_s27 + $0x28] sm:$0xff] }
  0x46   : > { %11575 = vmatprep.subr.mxu0 %v559_v23  ;;  %11616 = vmatpush3.msra.mxu1 %v765_v22  ;;  %v542_v40 = vld [vmem:[#allocation2 + $0x28] sm:$0xff]  ;;  %v922_v41 = vld [vmem:[%s13380_s27 + $0x20] sm:$0xff]  ;;  %v543_v42 = vld [vmem:[#allocation2 + $0x30] sm:$0xff] }
  0x47   : > { %11576 = vmatpush3.msra.mxu0 %v559_v23  ;;  %11617 = vmatprep.subr.mxu1 %v764_v24  ;;  %v921_v43 = vld [vmem:[%s13380_s27 + $0x18] sm:$0xff]  ;;  %v920_v45 = vld [vmem:[%s13380_s27 + $0x10] sm:$0xff]  ;;  %v545_v46 = vld [vmem:[#allocation2 + $0x40] sm:$0xff] }
  0x48   : > { %11577 = vmatprep.subr.mxu0 %v558_v25  ;;  %11618 = vmatpush3.msra.mxu1 %v764_v24  ;;  %v544_v44 = vld [vmem:[#allocation2 + $0x38] sm:$0xff]  ;;  %v919_v47 = vld [vmem:[%s13380_s27 + $0x8] sm:$0xff]  ;;  %v918_v49 = vld [vmem:[%s13380_s27] sm:$0xff] }
  0x49   : > { %11578 = vmatpush3.msra.mxu0 %v558_v25  ;;  %11619 = vmatprep.subr.mxu1 %v763_v26  ;;  %v546_v48 = vld [vmem:[#allocation2 + $0x48] sm:$0xff]  ;;  %v547_v50 = vld [vmem:[#allocation2 + $0x50] sm:$0xff]  ;;  %v548_v51 = vld [vmem:[#allocation2 + $0x58] sm:$0xff] }
  0x4a   : > { %11579 = vmatprep.subr.mxu0 %v557_v27  ;;  %11620 = vmatpush3.msra.mxu1 %v763_v26  ;;  %v549_v52 = vld [vmem:[#allocation2 + $0x60] sm:$0xff]  ;;  %v550_v53 = vld [vmem:[#allocation2 + $0x68] sm:$0xff]  ;;  %v551_v54 = vld [vmem:[#allocation2 + $0x70] sm:$0xff] }
  0x4b   : > { %11580 = vmatpush3.msra.mxu0 %v557_v27  ;;  %11621 = vmatprep.subr.mxu1 %v762_v28  ;;  %v552_v55 = vld [vmem:[#allocation2 + $0x78] sm:$0xff]  ;;  %v13545_v59 = vld [vmem:[%s13403_s22] sm:$0xff] }
  0x4c   : > { %11625 = vmatprep.mubr.msk.f32.mxu1 %vm567_vm1, %v13457_v29  ;;  %11622 = vmatpush3.msra.mxu1 %v762_v28  ;;  %v13548_v60 = vrot.slane %v13545_v59, %v771_v58  ;;  %v13553_v0 = vrot.slane %v13545_v59, %v565_v61 }
  0x4d   : > { %11581 = vmatprep.subr.mxu0 %v556_v30  ;;  %11623 = vmatprep.subr.mxu1 %v761_v31 }
  0x4e   : > { %11582 = vmatpush3.msra.mxu0 %v556_v30  ;;  %11624 = vmatpush3.msra.mxu1 %v761_v31 }
  0x4f   : > { %11583 = vmatprep.subr.mxu0 %v555_v32  ;;  %11626 = vmatmul.mubr.msk.f32.vlgmr.msra.gmra.mxu1 %vm567_vm1, %v13464_v33 }
  0x50   : > { %11584 = vmatpush3.msra.mxu0 %v555_v32  ;;  %11585 = vmatprep.mubr.msk.f32.mxu0 %vm567_vm1, %v13457_v29 }
  0x51   : > { %11628 = vmatprep.mubr.msk.f32.mxu1 %vm567_vm1, %v13466_v34  ;;  %11586 = vmatmul.mubr.msk.f32.vlgmr.msra.gmra.mxu0 %vm567_vm1, %v13464_v33 }
  0x52   : > { %11649 = vmatprep.subr.mxu0 %v925_v35  ;;  %11588 = vmatprep.mubr.msk.f32.mxu0 %vm567_vm1, %v13466_v34 }
  0x53   : > { %11650 = vmatpush3.msra.mxu0 %v925_v35  ;;  %11629 = vmatmul.mubr.msk.f32.gmra.mxu1 %vm567_vm1, %v13475_v36 }
  0x54   : > { %11651 = vmatprep.subr.mxu0 %v924_v37  ;;  %11631 = vmatprep.mubr.msk.f32.mxu1 %vm567_vm1, %v13480_v38 }
  0x55   : > { %11652 = vmatpush3.msra.mxu0 %v924_v37 }
  0x56   : > { %11589 = vmatmul.mubr.msk.f32.gmra.mxu0 %vm567_vm1, %v13475_v36  ;;  %11653 = vmatprep.subr.mxu0 %v923_v39 }
  0x57   : > { %11591 = vmatprep.mubr.msk.f32.mxu0 %vm567_vm1, %v13480_v38  ;;  %11654 = vmatpush3.msra.mxu0 %v923_v39 }
  0x58   : > { %11632 = vmatmul.mubr.msk.f32.gmra.mxu1 %vm567_vm1, %v542_v40  ;;  %11655 = vmatprep.subr.mxu0 %v922_v41 }
  0x59   : > { %11634 = vmatprep.mubr.msk.f32.mxu1 %vm567_vm1, %v543_v42  ;;  %11656 = vmatpush3.msra.mxu0 %v922_v41 }
  0x5a   : > { %11592 = vmatmul.mubr.msk.f32.gmra.mxu0 %vm567_vm1, %v542_v40  ;;  %11657 = vmatprep.subr.mxu0 %v921_v43 }
  0x5b   : > { %11594 = vmatprep.mubr.msk.f32.mxu0 %vm567_vm1, %v543_v42  ;;  %11658 = vmatpush3.msra.mxu0 %v921_v43 }
  0x5c   : > { %11635 = vmatmul.mubr.msk.f32.gmra.mxu1 %vm567_vm1, %v544_v44  ;;  %11659 = vmatprep.subr.mxu0 %v920_v45 }
  0x5d   : > { %11637 = vmatprep.mubr.msk.f32.mxu1 %vm567_vm1, %v545_v46  ;;  %11660 = vmatpush3.msra.mxu0 %v920_v45 }
  0x5e   : > { %11595 = vmatmul.mubr.msk.f32.gmra.mxu0 %vm567_vm1, %v544_v44  ;;  %11661 = vmatprep.subr.mxu0 %v919_v47 }
  0x5f   : > { %11597 = vmatprep.mubr.msk.f32.mxu0 %vm567_vm1, %v545_v46  ;;  %11662 = vmatpush3.msra.mxu0 %v919_v47 }
  0x60   : > { %11638 = vmatmul.mubr.msk.f32.gmra.mxu1 %vm567_vm1, %v546_v48  ;;  %11663 = vmatprep.subr.mxu0 %v918_v49 }
  0x61   : > { %11640 = vmatprep.mubr.msk.f32.mxu1 %vm567_vm1, %v547_v50  ;;  %11664 = vmatpush3.msra.mxu0 %v918_v49 }
  0x62   : > { %11598 = vmatmul.mubr.msk.f32.gmra.mxu0 %vm567_vm1, %v546_v48 }
  0x63   : > { %11600 = vmatprep.mubr.msk.f32.mxu0 %vm567_vm1, %v547_v50 }
  0x64   : > { %11641 = vmatmul.mubr.msk.f32.gmra.mxu1 %vm567_vm1, %v548_v51 }
  0x65   : > { %11643 = vmatprep.mubr.msk.f32.mxu1 %vm567_vm1, %v549_v52 }
  0x66   : > { %11601 = vmatmul.mubr.msk.f32.gmra.mxu0 %vm567_vm1, %v548_v51 }
  0x67   : > { %11603 = vmatprep.mubr.msk.f32.mxu0 %vm567_vm1, %v549_v52 }
  0x68   : > { %11644 = vmatmul.mubr.msk.f32.gmra.mxu1 %vm567_vm1, %v550_v53 }
  0x69   : > { %11646 = vmatprep.mubr.msk.f32.mxu1 %vm567_vm1, %v551_v54 }
  0x6a   : > { %11604 = vmatmul.mubr.msk.f32.gmra.mxu0 %vm567_vm1, %v550_v53 }
  0x6b   : > { %11606 = vmatprep.mubr.msk.f32.mxu0 %vm567_vm1, %v551_v54 }
  0x6c   : > { %11647 = vmatmul.mubr.msk.f32.gmra.mxu1 %vm567_vm1, %v552_v55 }
  0x6e   : > { %11607 = vmatmul.mubr.msk.f32.gmra.mxu0 %vm567_vm1, %v552_v55 }
  0x6f   : > { %11665 = vmatprep.mubr.msk.f32.mxu0 %vm567_vm1, %v13457_v29 }
  0x72   : > { %11666 = vmatmul.mubr.msk.f32.vlgmr.msra.gmra.mxu0 %vm567_vm1, %v13464_v33 }
  0x73   : > { %11668 = vmatprep.mubr.msk.f32.mxu0 %vm567_vm1, %v13466_v34 }
  0x76   : > { %11669 = vmatmul.mubr.msk.f32.gmra.mxu0 %vm567_vm1, %v13475_v36 }
  0x77   : > { %11671 = vmatprep.mubr.msk.f32.mxu0 %vm567_vm1, %v13480_v38 }
  0x7a   : > { %11672 = vmatmul.mubr.msk.f32.gmra.mxu0 %vm567_vm1, %v542_v40 }
  0x7b   : > { %11674 = vmatprep.mubr.msk.f32.mxu0 %vm567_vm1, %v543_v42 }
  0x7e   : > { %11675 = vmatmul.mubr.msk.f32.gmra.mxu0 %vm567_vm1, %v544_v44 }
  0x7f   : > { %11677 = vmatprep.mubr.msk.f32.mxu0 %vm567_vm1, %v545_v46 }
  0x82   : > { %11678 = vmatmul.mubr.msk.f32.gmra.mxu0 %vm567_vm1, %v546_v48  ;;  %v928_v48 = vsub.s32 2, %v13541_v57 }
  0x83   : > { %11680 = vmatprep.mubr.msk.f32.mxu0 %vm567_vm1, %v547_v50 }
  0x84   : > { %v13618_v56 = vrot.slane %v13545_v59, %v928_v48 }
  0x86   : > { %11681 = vmatmul.mubr.msk.f32.gmra.mxu0 %vm567_vm1, %v548_v51 }
  0x87   : > { %11683 = vmatprep.mubr.msk.f32.mxu0 %vm567_vm1, %v549_v52 }
  0x8a   : > { %11684 = vmatmul.mubr.msk.f32.gmra.mxu0 %vm567_vm1, %v550_v53 }
  0x8b   : > { %11686 = vmatprep.mubr.msk.f32.mxu0 %vm567_vm1, %v551_v54 }
  0x8e   : > { %11687 = vmatmul.mubr.msk.f32.gmra.mxu0 %vm567_vm1, %v552_v55 }
 0x10f   : > { %v11627_v62 = vpop.f32.mrf.mxu1 }
 0x110   : > { %v845_v63 = vadd.f32 %v11627_v62, %v13548_v60 }
 0x111   : > { %v839_v1 = vpop.f32.mrf.mxu1  ;;  %v11587_v2 = vpop.f32.mrf.mxu0 }
 0x112   : > { %v840_v3 = vadd.f32 %v839_v1, %v13548_v60  ;;  %11689 = vmatprep.subr.msk.mxu0 %vm1075_vm2, %v845_v63  ;;  %v688_v13 = vadd.f32 %v11587_v2, %v13553_v0 }
 0x113   : > { %v11630_v4 = vpop.f32.mrf.mxu1  ;;  %11690 = vmatpush3.xpose.msk.msra.mxu0 %vm1075_vm2, %v845_v63  ;;  %v682_v5 = vpop.f32.mrf.mxu0 }
 0x114   : > { %v855_v6 = vadd.f32 %v11630_v4, %v13548_v60  ;;  %11691 = vmatprep.subr.msk.mxu0 %vm1075_vm2, %v840_v3  ;;  %v683_v7 = vadd.f32 %v682_v5, %v13553_v0 }
 0x115   : > { %v849_v8 = vpop.f32.mrf.mxu1 }
 0x116   : > { %v11590_v9 = vpop.f32.mrf.mxu0  ;;  %v850_v10 = vadd.f32 %v849_v8, %v13548_v60  ;;  %11696 = vmatprep.subr.msk.mxu1 %vm1075_vm2, %v855_v6  ;;  %11693 = vmatprep.mubr.msk.f32.mxu0 %vm1075_vm2, %v683_v7 }
 0x117   : > { %11692 = vmatpush3.xpose.msk.msra.mxu0 %vm1075_vm2, %v840_v3  ;;  %11697 = vmatpush3.xpose.msk.msra.mxu1 %vm1075_vm2, %v855_v6  ;;  %v698_v20 = vadd.f32 %v11590_v9, %v13553_v0 }
 0x118   : > { %v692_v11 = vpop.f32.mrf.mxu0  ;;  %v11633_v12 = vpop.f32.mrf.mxu1  ;;  %11698 = vmatprep.subr.msk.mxu1 %vm1075_vm2, %v850_v10 }
 0x119   : > { %v693_v14 = vadd.f32 %v692_v11, %v13553_v0  ;;  %v865_v15 = vadd.f32 %v11633_v12, %v13548_v60 }
 0x11a   : > { %v859_v16 = vpop.f32.mrf.mxu1  ;;  %v11593_v17 = vpop.f32.mrf.mxu0  ;;  %11694 = vmatmul.mubr.msk.f32.vlgmr.msra.gmra.mxu0 %vm1075_vm2, %v688_v13 }
 0x11b   : > { %11700 = vmatprep.mubr.msk.f32.mxu1 %vm1075_vm2, %v693_v14  ;;  %11699 = vmatpush3.xpose.msk.msra.mxu1 %vm1075_vm2, %v850_v10  ;;  %v860_v24 = vadd.f32 %v859_v16, %v13548_v60  ;;  %v708_v34 = vadd.f32 %v11593_v17, %v13553_v0 }
 0x11c   : > { %v11636_v18 = vpop.f32.mrf.mxu1  ;;  %v702_v19 = vpop.f32.mrf.mxu0  ;;  %11703 = vmatprep.subr.msk.mxu1 %vm1075_vm2, %v865_v15 }
 0x11d   : > { %v703_v21 = vadd.f32 %v702_v19, %v13553_v0  ;;  %v875_v27 = vadd.f32 %v11636_v18, %v13548_v60 }
 0x11e   : > { %v869_v22 = vpop.f32.mrf.mxu1  ;;  %v11596_v23 = vpop.f32.mrf.mxu0  ;;  %11701 = vmatmul.mubr.msk.f32.vlgmr.msra.gmra.mxu1 %vm1075_vm2, %v698_v20 }
 0x11f   : > { %11704 = vmatpush3.xpose.msk.msra.mxu1 %vm1075_vm2, %v865_v15  ;;  %11707 = vmatprep.mubr.msk.f32.mxu1 %vm1075_vm2, %v703_v21  ;;  %v870_v39 = vadd.f32 %v869_v22, %v13548_v60  ;;  %v718_v50 = vadd.f32 %v11596_v23, %v13553_v0 }
 0x120   : > { %v11639_v25 = vpop.f32.mrf.mxu1  ;;  %v712_v26 = vpop.f32.mrf.mxu0  ;;  %11705 = vmatprep.subr.msk.mxu1 %vm1075_vm2, %v860_v24 }
 0x121   : > { %v885_v28 = vadd.f32 %v11639_v25, %v13548_v60  ;;  %v713_v35 = vadd.f32 %v712_v26, %v13553_v0 }
 0x122   : > { %v879_v29 = vpop.f32.mrf.mxu1  ;;  %v11599_v30 = vpop.f32.mrf.mxu0 }
 0x123   : > { %v880_v31 = vadd.f32 %v879_v29, %v13548_v60  ;;  %11717 = vmatprep.subr.msk.mxu0 %vm1075_vm2, %v885_v28  ;;  %11706 = vmatpush3.xpose.msk.msra.mxu1 %vm1075_vm2, %v860_v24  ;;  %v728_v40 = vadd.f32 %v11599_v30, %v13553_v0 }
 0x124   : > { %v11642_v32 = vpop.f32.mrf.mxu1  ;;  %11718 = vmatpush3.xpose.msk.msra.mxu0 %vm1075_vm2, %v885_v28  ;;  %v722_v33 = vpop.f32.mrf.mxu0  ;;  %11710 = vmatprep.subr.msk.mxu1 %vm1075_vm2, %v875_v27 }
 0x125   : > { %v723_v36 = vadd.f32 %v722_v33, %v13553_v0  ;;  %11719 = vmatprep.subr.msk.mxu0 %vm1075_vm2, %v880_v31  ;;  %v895_v43 = vadd.f32 %v11642_v32, %v13548_v60 }
 0x126   : > { %v889_v37 = vpop.f32.mrf.mxu1  ;;  %v11602_v38 = vpop.f32.mrf.mxu0  ;;  %11708 = vmatmul.mubr.msk.f32.vlgmr.msra.gmra.mxu1 %vm1075_vm2, %v708_v34 }
 0x127   : > { %11721 = vmatprep.mubr.msk.f32.mxu0 %vm1075_vm2, %v723_v36  ;;  %11711 = vmatpush3.xpose.msk.msra.mxu1 %vm1075_vm2, %v875_v27  ;;  %v890_v54 = vadd.f32 %v889_v37, %v13548_v60  ;;  %v738_v4 = vadd.f32 %v11602_v38, %v13553_v0 }
 0x128   : > { %v11645_v41 = vpop.f32.mrf.mxu1  ;;  %11720 = vmatpush3.xpose.msk.msra.mxu0 %vm1075_vm2, %v880_v31  ;;  %v732_v42 = vpop.f32.mrf.mxu0  ;;  %11712 = vmatprep.subr.msk.mxu1 %vm1075_vm2, %v870_v39 }
 0x129   : > { %v905_v44 = vadd.f32 %v11645_v41, %v13548_v60  ;;  %11714 = vmatprep.mubr.msk.f32.mxu1 %vm1075_vm2, %v713_v35  ;;  %v733_v51 = vadd.f32 %v732_v42, %v13553_v0 }
 0x12a   : > { %v899_v45 = vpop.f32.mrf.mxu1  ;;  %v11605_v46 = vpop.f32.mrf.mxu0 }
 0x12b   : > { %11722 = vmatmul.mubr.msk.f32.vlgmr.msra.gmra.mxu0 %vm1075_vm2, %v728_v40  ;;  %11731 = vmatprep.subr.msk.mxu0 %vm1075_vm2, %v905_v44  ;;  %v900_v47 = vadd.f32 %v899_v45, %v13548_v60  ;;  %v748_v55 = vadd.f32 %v11605_v46, %v13553_v0 }
 0x12c   : > { %11713 = vmatpush3.xpose.msk.msra.mxu1 %vm1075_vm2, %v870_v39  ;;  %11732 = vmatpush3.xpose.msk.msra.mxu0 %vm1075_vm2, %v905_v44  ;;  %v742_v49 = vpop.f32.mrf.mxu0  ;;  %v11648_v58 = vpop.f32.mrf.mxu1 }
 0x12d   : > { %11724 = vmatprep.subr.msk.mxu1 %vm1075_vm2, %v895_v43  ;;  %v743_v52 = vadd.f32 %v742_v49, %v13553_v0  ;;  %11733 = vmatprep.subr.msk.mxu0 %vm1075_vm2, %v900_v47  ;;  %v915_v62 = vadd.f32 %v11648_v58, %v13548_v60 }
 0x12e   : > { %v11608_v53 = vpop.f32.mrf.mxu0  ;;  %v909_v2 = vpop.f32.mrf.mxu1 }
 0x12f   : > { %11715 = vmatmul.mubr.msk.f32.vlgmr.msra.gmra.mxu1 %vm1075_vm2, %v718_v50  ;;  %11735 = vmatprep.mubr.msk.f32.mxu0 %vm1075_vm2, %v743_v52  ;;  %v910_v7 = vadd.f32 %v909_v2, %v13548_v60  ;;  %v758_v13 = vadd.f32 %v11608_v53, %v13553_v0 }
 0x130   : > { %11725 = vmatpush3.xpose.msk.msra.mxu1 %vm1075_vm2, %v895_v43  ;;  %11734 = vmatpush3.xpose.msk.msra.mxu0 %vm1075_vm2, %v900_v47  ;;  %v752_v61 = vpop.f32.mrf.mxu0 }
 0x131   : > { %11726 = vmatprep.subr.msk.mxu1 %vm1075_vm2, %v890_v54  ;;  %11728 = vmatprep.mubr.msk.f32.mxu1 %vm1075_vm2, %v733_v51  ;;  %v753_v59 = vadd.f32 %v752_v61, %v13553_v0 }
 0x132   : > { %v11667_v63 = vpop.f32.mrf.mxu0 }
 0x133   : > { %11736 = vmatmul.mubr.msk.f32.vlgmr.msra.gmra.mxu0 %vm1075_vm2, %v748_v55  ;;  %v1002_v1 = vadd.f32 %v11667_v63, %v13618_v56 }
 0x134   : > { %11727 = vmatpush3.xpose.msk.msra.mxu1 %vm1075_vm2, %v890_v54  ;;  %v996_v3 = vpop.f32.mrf.mxu0 }
 0x135   : > { %11738 = vmatprep.subr.msk.mxu1 %vm1075_vm2, %v915_v62  ;;  %v997_v5 = vadd.f32 %v996_v3, %v13618_v56  ;;  %11745 = vmatprep.subr.mxu0 %v1002_v1 }
 0x136   : > { %v11670_v6 = vpop.f32.mrf.mxu0  ;;  %11746 = vmatpush3.msra.mxu0 %v1002_v1 }
 0x137   : > { %11729 = vmatmul.mubr.msk.f32.vlgmr.msra.gmra.mxu1 %vm1075_vm2, %v738_v4  ;;  %11747 = vmatprep.subr.mxu0 %v997_v5  ;;  %v1012_v9 = vadd.f32 %v11670_v6, %v13618_v56 }
 0x138   : > { %11739 = vmatpush3.xpose.msk.msra.mxu1 %vm1075_vm2, %v915_v62  ;;  %11742 = vmatprep.mubr.msk.f32.mxu1 %vm1075_vm2, %v753_v59  ;;  %v1006_v8 = vpop.f32.mrf.mxu0 }
 0x139   : > { %11740 = vmatprep.subr.msk.mxu1 %vm1075_vm2, %v910_v7  ;;  %11748 = vmatpush3.msra.mxu0 %v997_v5  ;;  %v1007_v14 = vadd.f32 %v1006_v8, %v13618_v56 }
 0x13a   : > { %v11673_v10 = vpop.f32.mrf.mxu0 }
 0x13b   : > { %v13639_v11 = vadd.f32 %v11673_v10, %v13618_v56 }
 0x13c   : > { %11741 = vmatpush3.xpose.msk.msra.mxu1 %vm1075_vm2, %v910_v7  ;;  %v13642_v12 = vpop.f32.mrf.mxu0 }
 0x13d   : > { %11752 = vmatprep.subr.mxu1 %v1012_v9  ;;  %11759 = vmatprep.subr.mxu0 %v13639_v11 }
 0x13e   : > { %v11676_v15 = vpop.f32.mrf.mxu0 }
 0x13f   : > { %11743 = vmatmul.mubr.msk.f32.vlgmr.msra.gmra.mxu1 %vm1075_vm2, %v758_v13  ;;  %v13649_v16 = vadd.f32 %v11676_v15, %v13618_v56 }
 0x140   : > { %11753 = vmatpush3.msra.mxu1 %v1012_v9  ;;  %v13652_v17 = vpop.f32.mrf.mxu0 }
 0x141   : > { %11754 = vmatprep.subr.mxu1 %v1007_v14 }
 0x142   : > { %11755 = vmatpush3.msra.mxu1 %v1007_v14  ;;  %v13654_v18 = vpop.f32.mrf.mxu0 }
 0x143   : > { %11766 = vmatprep.subr.mxu1 %v13649_v16 }
 0x144   : > { %v13656_v19 = vpop.f32.mrf.mxu0 }
 0x146   : > { %v13658_v20 = vpop.f32.mrf.mxu0 }
 0x148   : > { %v13660_v21 = vpop.f32.mrf.mxu0 }
 0x14a   : > { %v13662_v22 = vpop.f32.mrf.mxu0 }
 0x14c   : > { %v13664_v23 = vpop.f32.mrf.mxu0 }
 0x14e   : > { %v13666_v24 = vpop.f32.mrf.mxu0 }
 0x150   : > { %v13668_v25 = vpop.f32.mrf.mxu0 }
 0x1da   : > { %v11695_v26 = vpop.f32.mrf.mxu0 }
 0x1db   : > { %v13670_v27 = vmul.f32 0.25, %v11695_v26 }
 0x1dc   : > { %v1154_v28 = vpop.f32.mrf.mxu0 }
 0x1dd   : > { %v1791_v29 = vsel %vm1075_vm2, %v13670_v27, -inf  ;;  %v13674_v30 = vmul.f32 0.25, %v1154_v28 }
 0x1de   : > { %v11702_v31 = vpop.f32.mrf.mxu1  ;;  %1792 = vmax.xlane.f32.xlu1 %v1791_v29 }
 0x1df   : > { %v13676_v32 = vmul.f32 0.25, %v11702_v31  ;;  %v1788_v33 = vsel %vm1075_vm2, %v13674_v30, -inf }
 0x1e0   : > { %v1241_v34 = vpop.f32.mrf.mxu1  ;;  %1789 = vmax.xlane.f32.xlu0 %v1788_v33 }
 0x1e1   : > { %v13680_v35 = vmul.f32 0.25, %v1241_v34  ;;  %v1797_v36 = vsel %vm1075_vm2, %v13676_v32, -inf }
 0x1e3   : > { %v1794_v39 = vsel %vm1075_vm2, %v13680_v35, -inf }
 0x1e4   : > { %1798 = vmax.xlane.f32.xlu0 %v1797_v36 }
 0x1e6   : > { %v11709_v37 = vpop.f32.mrf.mxu1 }
 0x1e7   : > { %v13684_v38 = vmul.f32 0.25, %v11709_v37 }
 0x1e8   : > { %v1328_v40 = vpop.f32.mrf.mxu1  ;;  %1795 = vmax.xlane.f32.xlu0 %v1794_v39 }
 0x1e9   : > { %v13688_v41 = vmul.f32 0.25, %v1328_v40  ;;  %v1803_v42 = vsel %vm1075_vm2, %v13684_v38, -inf }
 0x1ea   : > { %1804 = vmax.xlane.f32.xlu1 %v1803_v42 }
 0x1eb   : > { %v1800_v43 = vsel %vm1075_vm2, %v13688_v41, -inf  ;;  %v11723_v55 = vpop.f32.mrf.mxu0 }
 0x1ec   : > { %1801 = vmax.xlane.f32.xlu0 %v1800_v43  ;;  %v13712_v59 = vmul.f32 0.25, %v11723_v55 }
 0x1ed   : > { %v1502_v61 = vpop.f32.mrf.mxu0 }
 0x1ee   : > { %v13718_v5 = vmul.f32 0.25, %v1502_v61  ;;  %v1815_v9 = vsel %vm1075_vm2, %v13712_v59, -inf }
 0x1ef   : > { %v11716_v44 = vpop.f32.mrf.mxu1 }
 0x1f0   : > { %v13694_v45 = vmul.f32 0.25, %v11716_v44  ;;  %v1812_v13 = vsel %vm1075_vm2, %v13718_v5, -inf }
 0x1f1   : > { %v1415_v46 = vpop.f32.mrf.mxu1 }
 0x1f2   : > { %v13696_v47 = vmul.f32 0.25, %v1415_v46  ;;  %v1809_v48 = vsel %vm1075_vm2, %v13694_v45, -inf }
 0x1f3   : > { %1810 = vmax.xlane.f32.xlu1 %v1809_v48  ;;  %v11737_v1 = vpop.f32.mrf.mxu0 }
 0x1f4   : > { %v1806_v49 = vsel %vm1075_vm2, %v13696_v47, -inf  ;;  %v13722_v8 = vmul.f32 0.25, %v11737_v1 }
 0x1f5   : > { %v1676_v7 = vpop.f32.mrf.mxu0 }
 0x1f6   : > { %v13726_v10 = vmul.f32 0.25, %v1676_v7  ;;  %v1827_v14 = vsel %vm1075_vm2, %v13722_v8, -inf }
 0x1f7   : > { %v11730_v50 = vpop.f32.mrf.mxu1  ;;  %1807 = vmax.xlane.f32.xlu1 %v1806_v49 }
 0x1f8   : > { %v13702_v51 = vmul.f32 0.25, %v11730_v50  ;;  %v1824_v15 = vsel %vm1075_vm2, %v13726_v10, -inf }
 0x1f9   : > { %v1589_v52 = vpop.f32.mrf.mxu1 }
 0x1fa   : > { %v13704_v53 = vmul.f32 0.25, %v1589_v52  ;;  %v1821_v54 = vsel %vm1075_vm2, %v13702_v51, -inf }
 0x1fb   : > { %1822 = vmax.xlane.f32.xlu1 %v1821_v54 }
 0x1fc   : > { %v1818_v58 = vsel %vm1075_vm2, %v13704_v53, -inf }
 0x1fd   : > { %1819 = vmax.xlane.f32.xlu0 %v1818_v58 }
 0x1ff   : > { %v11744_v62 = vpop.f32.mrf.mxu1 }
 0x200   : > { %v13710_v63 = vmul.f32 0.25, %v11744_v62 }
 0x201   : > { %v1763_v2 = vpop.f32.mrf.mxu1 }
 0x202   : > { %v13714_v3 = vmul.f32 0.25, %v1763_v2  ;;  %v1833_v4 = vsel %vm1075_vm2, %v13710_v63, -inf }
 0x203   : > { %1834 = vmax.xlane.f32.xlu1 %v1833_v4 }
 0x204   : > { %v1830_v6 = vsel %vm1075_vm2, %v13714_v3, -inf }
 0x205   : > { %1831 = vmax.xlane.f32.xlu0 %v1830_v6 }
 0x207   : > { %1816 = vmax.xlane.f32.xlu1 %v1815_v9 }
 0x209   : > { %1813 = vmax.xlane.f32.xlu0 %v1812_v13 }
 0x20b   : > { %1828 = vmax.xlane.f32.xlu1 %v1827_v14 }
 0x20d   : > { %1825 = vmax.xlane.f32.xlu0 %v1824_v15 }
 0x267   : > { %v1793_v26 = vpop.xlane.xlu1 %1792 }
 0x268   : > { %v1837_v28 = vsub.f32 %v13670_v27, %v1793_v26 }
 0x269   : > { %v1790_v29 = vpop.xlane.xlu0 %1789 }
 0x26a   : > { %v1854_v31 = vmul.f32 1.442695, %v1837_v28  ;;  %v1836_v33 = vsub.f32 %v13674_v30, %v1790_v29 }
 0x26c   : > { %12781 = vpow2.f32 %v1854_v31  ;;  %v1852_v34 = vmul.f32 1.442695, %v1836_v33 }
 0x26d   : > { %v1799_v36 = vpop.xlane.xlu0 %1798 }
 0x26e   : > { %12783 = vpow2.f32 %v1852_v34  ;;  %v1839_v37 = vsub.f32 %v13676_v32, %v1799_v36 }
 0x270   : > { %v1858_v39 = vmul.f32 1.442695, %v1839_v37 }
 0x271   : > { %v1796_v40 = vpop.xlane.xlu0 %1795 }
 0x272   : > { %12785 = vpow2.f32 %v1858_v39  ;;  %v1838_v42 = vsub.f32 %v13680_v35, %v1796_v40 }
 0x273   : > { %v1805_v43 = vpop.xlane.xlu1 %1804 }
 0x274   : > { %v1856_v44 = vmul.f32 1.442695, %v1838_v42  ;;  %v1841_v46 = vsub.f32 %v13684_v38, %v1805_v43 }
 0x275   : > { %v1802_v27 = vpop.xlane.xlu0 %1801 }
 0x276   : > { %12787 = vpow2.f32 %v1856_v44  ;;  %v1862_v48 = vmul.f32 1.442695, %v1841_v46  ;;  %v1840_v30 = vsub.f32 %v13688_v41, %v1802_v27 }
 0x278   : > { %12789 = vpow2.f32 %v1862_v48  ;;  %v1860_v49 = vmul.f32 1.442695, %v1840_v30 }
 0x279   : > { %v13740_v50 = vpop.eup %12781 }
 0x27a   : > { %12791 = vpow2.f32 %v1860_v49  ;;  %v1887_v32 = vsel %vm1075_vm2, %v13740_v50, 0.0 }
 0x27b   : > { %v13744_v52 = vpop.eup %12783  ;;  %1888 = vadd.xlane.f32.xlu1 %v1887_v32 }
 0x27c   : > { %v1811_v35 = vpop.xlane.xlu1 %1810  ;;  %v1884_v38 = vsel %vm1075_vm2, %v13744_v52, 0.0 }
 0x27d   : > { %v1843_v54 = vsub.f32 %v13694_v45, %v1811_v35  ;;  %1885 = vadd.xlane.f32.xlu0 %v1884_v38 }
 0x27f   : > { %v1866_v55 = vmul.f32 1.442695, %v1843_v54  ;;  %v13749_v41 = vpop.eup %12785 }
 0x280   : > { %v1808_v58 = vpop.xlane.xlu1 %1807  ;;  %v1893_v62 = vsel %vm1075_vm2, %v13749_v41, 0.0 }
 0x281   : > { %12793 = vpow2.f32 %v1866_v55  ;;  %v1842_v61 = vsub.f32 %v13696_v47, %v1808_v58  ;;  %1894 = vadd.xlane.f32.xlu1 %v1893_v62 }
 0x283   : > { %v1864_v1 = vmul.f32 1.442695, %v1842_v61  ;;  %v13754_v2 = vpop.eup %12787 }
 0x284   : > { %v1823_v4 = vpop.xlane.xlu1 %1822  ;;  %v1890_v6 = vsel %vm1075_vm2, %v13754_v2, 0.0 }
 0x285   : > { %12795 = vpow2.f32 %v1864_v1  ;;  %v1847_v45 = vsub.f32 %v13702_v51, %v1823_v4  ;;  %v13759_v7 = vpop.eup %12789  ;;  %1891 = vadd.xlane.f32.xlu0 %v1890_v6 }
 0x286   : > { %v1820_v9 = vpop.xlane.xlu0 %1819  ;;  %v1899_v14 = vsel %vm1075_vm2, %v13759_v7, 0.0 }
 0x287   : > { %v1874_v13 = vmul.f32 1.442695, %v1847_v45  ;;  %v1846_v47 = vsub.f32 %v13704_v53, %v1820_v9  ;;  %v13764_v15 = vpop.eup %12791  ;;  %1900 = vadd.xlane.f32.xlu1 %v1899_v14 }
 0x288   : > { %v1896_v51 = vsel %vm1075_vm2, %v13764_v15, 0.0 }
 0x289   : > { %12797 = vpow2.f32 %v1874_v13  ;;  %v1872_v26 = vmul.f32 1.442695, %v1846_v47  ;;  %1897 = vadd.xlane.f32.xlu0 %v1896_v51 }
 0x28b   : > { %12799 = vpow2.f32 %v1872_v26 }
 0x28c   : > { %v1835_v28 = vpop.xlane.xlu1 %1834 }
 0x28d   : > { %v1851_v29 = vsub.f32 %v13710_v63, %v1835_v28 }
 0x28e   : > { %v13769_v31 = vpop.eup %12793  ;;  %v1832_v33 = vpop.xlane.xlu0 %1831 }
 0x28f   : > { %v1882_v53 = vmul.f32 1.442695, %v1851_v29  ;;  %v1850_v34 = vsub.f32 %v13714_v3, %v1832_v33  ;;  %v1905_v36 = vsel %vm1075_vm2, %v13769_v31, 0.0 }
 0x290   : > { %v1817_v37 = vpop.xlane.xlu1 %1816  ;;  %1906 = vadd.xlane.f32.xlu1 %v1905_v36 }
 0x291   : > { %12801 = vpow2.f32 %v1882_v53  ;;  %v1880_v39 = vmul.f32 1.442695, %v1850_v34  ;;  %v1845_v40 = vsub.f32 %v13712_v59, %v1817_v37  ;;  %v1017_v37 = vadd.f32 %v13642_v12, %v13618_v56 }
 0x292   : > { %v13775_v42 = vpop.eup %12795  ;;  %v1814_v43 = vpop.xlane.xlu0 %1813 }
 0x293   : > { %12803 = vpow2.f32 %v1880_v39  ;;  %v1870_v63 = vmul.f32 1.442695, %v1845_v40  ;;  %v1844_v44 = vsub.f32 %v13718_v5, %v1814_v43  ;;  %v1902_v46 = vsel %vm1075_vm2, %v13775_v42, 0.0 }
 0x294   : > { %v1829_v3 = vpop.xlane.xlu1 %1828  ;;  %1903 = vadd.xlane.f32.xlu0 %v1902_v46  ;;  %v1042_v40 = vadd.f32 %v13654_v18, %v13618_v56 }
 0x295   : > { %12805 = vpow2.f32 %v1870_v63  ;;  %v1868_v27 = vmul.f32 1.442695, %v1844_v44  ;;  %v1849_v48 = vsub.f32 %v13722_v8, %v1829_v3 }
 0x296   : > { %v13781_v30 = vpop.eup %12797  ;;  %v1826_v49 = vpop.xlane.xlu0 %1825 }
 0x297   : > { %12807 = vpow2.f32 %v1868_v27  ;;  %v1878_v59 = vmul.f32 1.442695, %v1849_v48  ;;  %v1848_v32 = vsub.f32 %v13726_v10, %v1826_v49  ;;  %v1917_v35 = vsel %vm1075_vm2, %v13781_v30, 0.0 }
 0x298   : > { %v13786_v5 = vpop.eup %12799  ;;  %1918 = vadd.xlane.f32.xlu1 %v1917_v35  ;;  %v1052_v27 = vadd.f32 %v13658_v20, %v13618_v56 }
 0x299   : > { %12809 = vpow2.f32 %v1878_v59  ;;  %v1876_v54 = vmul.f32 1.442695, %v1848_v32  ;;  %v1914_v38 = vsel %vm1075_vm2, %v13786_v5, 0.0 }
 0x29a   : > { %1915 = vadd.xlane.f32.xlu0 %v1914_v38 }
 0x29b   : > { %12811 = vpow2.f32 %v1876_v54 }
 0x29e   : > { %v13790_v8 = vpop.eup %12801 }
 0x29f   : > { %v1929_v55 = vsel %vm1075_vm2, %v13790_v8, 0.0 }
 0x2a0   : > { %v13794_v58 = vpop.eup %12803  ;;  %1930 = vadd.xlane.f32.xlu1 %v1929_v55 }
 0x2a1   : > { %v1926_v10 = vsel %vm1075_vm2, %v13794_v58, 0.0 }
 0x2a2   : > { %v13798_v61 = vpop.eup %12805  ;;  %1927 = vadd.xlane.f32.xlu0 %v1926_v10  ;;  %v1067_v10 = vadd.f32 %v13668_v25, %v13618_v56 }
 0x2a3   : > { %v1911_v62 = vsel %vm1075_vm2, %v13798_v61, 0.0 }
 0x2a4   : > { %v13802_v1 = vpop.eup %12807  ;;  %1912 = vadd.xlane.f32.xlu1 %v1911_v62 }
 0x2a5   : > { %v1908_v4 = vsel %vm1075_vm2, %v13802_v1, 0.0 }
 0x2a6   : > { %v13806_v45 = vpop.eup %12809  ;;  %1909 = vadd.xlane.f32.xlu0 %v1908_v4 }
 0x2a7   : > { %v1923_v6 = vsel %vm1075_vm2, %v13806_v45, 0.0 }
 0x2a8   : > { %v13810_v9 = vpop.eup %12811  ;;  %1924 = vadd.xlane.f32.xlu1 %v1923_v6 }
 0x2a9   : > { %v1920_v13 = vsel %vm1075_vm2, %v13810_v9, 0.0 }
 0x2aa   : > { %1921 = vadd.xlane.f32.xlu0 %v1920_v13  ;;  %v10465_v13 = vld [vmem:[%s13375_s11 + $0x70] sm:$0xff] }
 0x2b9   : > { %2624 = vrot.lane.b32.xlu1 %v13553_v0, %s13228_s0 }
 0x2c0   : > { %2782 = vrot.lane.b32.xlu0 %v13548_v60, %s13228_s0 }
 0x304   : > { %v1889_v47 = vpop.xlane.xlu1 %1888 }
 0x305   : > { %12813 = vrcp.f32 %v1889_v47 }
 0x306   : > { %v1886_v14 = vpop.xlane.xlu0 %1885 }
 0x307   : > { %12815 = vrcp.f32 %v1886_v14  ;;  %v10464_v14 = vld [vmem:[%s13375_s11 + $0x68] sm:$0xff] }
 0x30a   : > { %v1895_v26 = vpop.xlane.xlu1 %1894 }
 0x30b   : > { %12817 = vrcp.f32 %v1895_v26  ;;  %v13869_v26 = vld [vmem:[#allocation2] sm:$0xff] }
 0x30e   : > { %v1892_v51 = vpop.xlane.xlu0 %1891 }
 0x30f   : > { %12819 = vrcp.f32 %v1892_v51  ;;  %v10463_v51 = vld [vmem:[%s13375_s11 + $0x60] sm:$0xff] }
 0x310   : > { %v1901_v28 = vpop.xlane.xlu1 %1900 }
 0x311   : > { %12821 = vrcp.f32 %v1901_v28 }
 0x312   : > { %v1898_v29 = vpop.xlane.xlu0 %1897  ;;  %v12814_v33 = vpop.eup %12813 }
 0x313   : > { %12823 = vrcp.f32 %v1898_v29  ;;  %v1949_v36 = vmul.f32 %v12814_v33, %v13740_v50  ;;  %v10462_v33 = vld [vmem:[%s13375_s11 + $0x58] sm:$0xff] }
 0x314   : > { %v12816_v53 = vpop.eup %12815 }
 0x315   : > { %v1948_v34 = vmul.f32 %v12816_v53, %v13744_v52  ;;  %v10441_v53 = vld [vmem:[%s13370_s26 + $0x70] sm:$0xff] }
 0x317   : > { %11749 = vmatprep.mubr.msk.f32.mxu0 %vm1075_vm2, %v1948_v34  ;;  %v10461_v34 = vld [vmem:[%s13375_s11 + $0x50] sm:$0xff] }
 0x318   : > { %11750 = vmatmul.mubr.msk.f32.vlgmr.msra.gmra.mxu0 %vm1075_vm2, %v1949_v36  ;;  %v12818_v43 = vpop.eup %12817  ;;  %v10460_v36 = vld [vmem:[%s13375_s11 + $0x48] sm:$0xff] }
 0x319   : > { %v1907_v39 = vpop.xlane.xlu1 %1906  ;;  %11760 = vmatpush3.msra.mxu0 %v13639_v11  ;;  %v1951_v12 = vmul.f32 %v12818_v43, %v13749_v41  ;;  %v1027_v11 = vadd.f32 %v13652_v17, %v13618_v56  ;;  %v1037_v17 = vadd.f32 %v13656_v19, %v13618_v56  ;;  %v13894_v43 = vld [vmem:[#allocation2 + $0x8] sm:$0xff] }
 0x31a   : > { %11761 = vmatprep.subr.mxu0 %v1017_v37  ;;  %12825 = vrcp.f32 %v1907_v39  ;;  %v10438_v39 = vld [vmem:[%s13370_s26 + $0x58] sm:$0xff] }
 0x31b   : > { %11762 = vmatpush3.msra.mxu0 %v1017_v37  ;;  %v10459_v37 = vld [vmem:[%s13375_s11 + $0x40] sm:$0xff] }
 0x31c   : > { %v12820_v63 = vpop.eup %12819  ;;  %11773 = vmatprep.subr.mxu0 %v1042_v40 }
 0x31d   : > { %v1904_v50 = vpop.xlane.xlu0 %1903  ;;  %v1950_v52 = vmul.f32 %v12820_v63, %v13754_v2  ;;  %v13898_v63 = vld [vmem:[#allocation2 + $0x10] sm:$0xff] }
 0x31e   : > { %12827 = vrcp.f32 %v1904_v50  ;;  %v12822_v44 = vpop.eup %12821  ;;  %v10436_v50 = vld [vmem:[%s13370_s26 + $0x48] sm:$0xff] }
 0x31f   : > { %11756 = vmatprep.mubr.msk.f32.mxu1 %vm1075_vm2, %v1950_v52  ;;  %v1953_v2 = vmul.f32 %v12822_v44, %v13759_v7  ;;  %v10435_v52 = vld [vmem:[%s13370_s26 + $0x40] sm:$0xff] }
 0x320   : > { %v12824_v46 = vpop.eup %12823  ;;  %11757 = vmatmul.mubr.msk.f32.vlgmr.msra.gmra.mxu1 %vm1075_vm2, %v1951_v12  ;;  %v13906_v12 = vld [vmem:[#allocation2 + $0x18] sm:$0xff]  ;;  %v13910_v44 = vld [vmem:[#allocation2 + $0x20] sm:$0xff] }
 0x321   : > { %v1919_v18 = vpop.xlane.xlu1 %1918  ;;  %11767 = vmatpush3.msra.mxu1 %v13649_v16  ;;  %v1952_v3 = vmul.f32 %v12824_v46, %v13764_v15  ;;  %v13844_v16 = vadd.f32 %v13662_v22, %v13618_v56  ;;  %v1047_v22 = vadd.f32 %v13660_v21, %v13618_v56  ;;  %v13916_v46 = vld [vmem:[#allocation2 + $0x28] sm:$0xff] }
 0x322   : > { %12829 = vrcp.f32 %v1919_v18  ;;  %11768 = vmatprep.subr.mxu1 %v1027_v11  ;;  %v13076_v18 = vld [vmem:[#allocation2 + $0x38] sm:$0xff] }
 0x323   : > { %v1916_v41 = vpop.xlane.xlu0 %1915  ;;  %11769 = vmatpush3.msra.mxu1 %v1027_v11  ;;  %11763 = vmatprep.mubr.msk.f32.mxu0 %vm1075_vm2, %v1952_v3  ;;  %v13922_v11 = vld [vmem:[#allocation2 + $0x30] sm:$0xff]  ;;  %v13077_v3 = vld [vmem:[#allocation2 + $0x40] sm:$0xff] }
 0x324   : > { %12831 = vrcp.f32 %v1916_v41  ;;  %11780 = vmatprep.subr.mxu1 %v1052_v27  ;;  %11764 = vmatmul.mubr.msk.f32.vlgmr.msra.gmra.mxu0 %vm1075_vm2, %v1953_v2  ;;  %v13079_v41 = vld [vmem:[#allocation2 + $0x50] sm:$0xff]  ;;  %v13080_v2 = vld [vmem:[#allocation2 + $0x58] sm:$0xff] }
 0x325   : > { %11774 = vmatpush3.msra.mxu0 %v1042_v40  ;;  %v10437_v40 = vld [vmem:[%s13370_s26 + $0x50] sm:$0xff] }
 0x326   : > { %11775 = vmatprep.subr.mxu0 %v1037_v17 }
 0x327   : > { %11776 = vmatpush3.msra.mxu0 %v1037_v17  ;;  %v12826_v7 = vpop.eup %12825  ;;  %v13081_v17 = vld [vmem:[#allocation2 + $0x60] sm:$0xff] }
 0x328   : > { %11787 = vmatprep.subr.mxu0 %v13844_v16  ;;  %v1955_v59 = vmul.f32 %v12826_v7, %v13769_v31  ;;  %v13084_v7 = vld [vmem:[#allocation2 + $0x78] sm:$0xff] }
 0x329   : > { %v1931_v20 = vpop.xlane.xlu1 %1930 }
 0x32a   : > { %12833 = vrcp.f32 %v1931_v20  ;;  %v13083_v20 = vld [vmem:[#allocation2 + $0x70] sm:$0xff] }
 0x32b   : > { %v12828_v15 = vpop.eup %12827  ;;  %v1928_v48 = vpop.xlane.xlu0 %1927 }
 0x32c   : > { %12835 = vrcp.f32 %v1928_v48  ;;  %v1954_v19 = vmul.f32 %v12828_v15, %v13775_v42  ;;  %v1072_v42 = vadd.f32 %v13666_v24, %v13618_v56  ;;  %v10466_v24 = vld [vmem:[%s13375_s11 + $0x78] sm:$0xff]  ;;  %v10489_v48 = vld [vmem:[%s13380_s27 + $0x70] sm:$0xff] }
 0x32d   : > { %v1913_v49 = vpop.xlane.xlu1 %1912  ;;  %v10490_v15 = vld [vmem:[%s13380_s27 + $0x78] sm:$0xff] }
 0x32e   : > { %11770 = vmatprep.mubr.msk.f32.mxu1 %vm1075_vm2, %v1954_v19  ;;  %12837 = vrcp.f32 %v1913_v49  ;;  %v10488_v19 = vld [vmem:[%s13380_s27 + $0x68] sm:$0xff]  ;;  %v10487_v49 = vld [vmem:[%s13380_s27 + $0x60] sm:$0xff] }
 0x32f   : > { %11771 = vmatmul.mubr.msk.f32.vlgmr.msra.gmra.mxu1 %vm1075_vm2, %v1955_v59  ;;  %v1910_v32 = vpop.xlane.xlu0 %1909  ;;  %v12830_v35 = vpop.eup %12829  ;;  %v10486_v59 = vld [vmem:[%s13380_s27 + $0x58] sm:$0xff] }
 0x330   : > { %11781 = vmatpush3.msra.mxu1 %v1052_v27  ;;  %12839 = vrcp.f32 %v1910_v32  ;;  %v1959_v55 = vmul.f32 %v12830_v35, %v13781_v30  ;;  %v13078_v27 = vld [vmem:[#allocation2 + $0x48] sm:$0xff]  ;;  %v10483_v35 = vld [vmem:[%s13380_s27 + $0x40] sm:$0xff] }
 0x331   : > { %v12832_v54 = vpop.eup %12831  ;;  %11782 = vmatprep.subr.mxu1 %v1047_v22  ;;  %v1925_v38 = vpop.xlane.xlu1 %1924  ;;  %v10484_v32 = vld [vmem:[%s13380_s27 + $0x48] sm:$0xff] }
 0x332   : > { %11783 = vmatpush3.msra.mxu1 %v1047_v22  ;;  %v1958_v31 = vmul.f32 %v12832_v54, %v13786_v5  ;;  %12841 = vrcp.f32 %v1925_v38  ;;  %v10485_v22 = vld [vmem:[%s13380_s27 + $0x50] sm:$0xff] }
 0x333   : > { %11794 = vmatprep.subr.mxu1 %v1072_v42  ;;  %v1922_v21 = vpop.xlane.xlu0 %1921 }
 0x334   : > { %12843 = vrcp.f32 %v1922_v21  ;;  %11784 = vmatprep.mubr.msk.f32.mxu1 %vm1075_vm2, %v1958_v31 }
 0x335   : > { %11785 = vmatmul.mubr.msk.f32.vlgmr.msra.gmra.mxu1 %vm1075_vm2, %v1959_v55 }
 0x336   : > { %11795 = vmatpush3.msra.mxu1 %v1072_v42 }
 0x337   : > { %11796 = vmatprep.subr.mxu1 %v1067_v10  ;;  %v12834_v62 = vpop.eup %12833 }
 0x338   : > { %11797 = vmatpush3.msra.mxu1 %v1067_v10  ;;  %v1963_v30 = vmul.f32 %v12834_v62, %v13790_v8 }
 0x339   : > { %v12836_v5 = vpop.eup %12835  ;;  %11841 = vmatprep.subr.mxu1 %v10466_v24 }
 0x33a   : > { %v1962_v4 = vmul.f32 %v12836_v5, %v13794_v58 }
 0x33b   : > { %v12838_v6 = vpop.eup %12837 }
 0x33c   : > { %11798 = vmatprep.mubr.msk.f32.mxu1 %vm1075_vm2, %v1962_v4  ;;  %v1957_v8 = vmul.f32 %v12838_v6, %v13798_v61  ;;  %v10442_v61 = vld [vmem:[%s13370_s26 + $0x78] sm:$0xff]  ;;  %v14007_v6 = vpop.permute.xlu0 %2782 }
 0x33d   : > { %v12840_v25 = vpop.eup %12839  ;;  %11799 = vmatmul.mubr.msk.f32.vlgmr.msra.gmra.mxu1 %vm1075_vm2, %v1963_v30 }
 0x33e   : > { %11842 = vmatpush3.msra.mxu1 %v10466_v24  ;;  %v1956_v47 = vmul.f32 %v12840_v25, %v13802_v1  ;;  %11857 = vmatprep.mubr.msk.f32.mxu1 %vm567_vm1, %v13869_v26  ;;  %v1057_v1 = vadd.f32 %v13664_v23, %v13618_v56 }
 0x33f   : > { %11843 = vmatprep.subr.mxu1 %v10465_v13  ;;  %v12842_v58 = vpop.eup %12841 }
 0x340   : > { %11844 = vmatpush3.msra.mxu1 %v10465_v13  ;;  %11777 = vmatprep.mubr.msk.f32.mxu0 %vm1075_vm2, %v1956_v47  ;;  %v1961_v23 = vmul.f32 %v12842_v58, %v13806_v45  ;;  %v10439_v45 = vld [vmem:[%s13370_s26 + $0x60] sm:$0xff] }
 0x341   : > { %v12844_v28 = vpop.eup %12843  ;;  %11845 = vmatprep.subr.mxu1 %v10464_v14  ;;  %11778 = vmatmul.mubr.msk.f32.vlgmr.msra.gmra.mxu0 %vm1075_vm2, %v1957_v8 }
 0x342   : > { %11788 = vmatpush3.msra.mxu0 %v13844_v16  ;;  %11846 = vmatpush3.msra.mxu1 %v10464_v14  ;;  %v1960_v29 = vmul.f32 %v12844_v28, %v13810_v9  ;;  %v10440_v9 = vld [vmem:[%s13370_s26 + $0x68] sm:$0xff] }
 0x343   : > { %11789 = vmatprep.subr.mxu0 %v1057_v1  ;;  %11847 = vmatprep.subr.mxu1 %v10463_v51  ;;  %v13082_v16 = vld [vmem:[#allocation2 + $0x68] sm:$0xff] }
 0x344   : > { %11790 = vmatpush3.msra.mxu0 %v1057_v1  ;;  %11848 = vmatpush3.msra.mxu1 %v10463_v51 }
 0x345   : > { %11791 = vmatprep.mubr.msk.f32.mxu0 %vm1075_vm2, %v1960_v29  ;;  %11801 = vmatprep.subr.mxu0 %v10442_v61 }
 0x346   : > { %11849 = vmatprep.subr.mxu1 %v10462_v33  ;;  %11792 = vmatmul.mubr.msk.f32.vlgmr.msra.gmra.mxu0 %vm1075_vm2, %v1961_v23  ;;  %v14024_v23 = vpop.permute.xlu1 %2624 }
 0x347   : > { %11802 = vmatpush3.msra.mxu0 %v10442_v61  ;;  %11850 = vmatpush3.msra.mxu1 %v10462_v33 }
 0x348   : > { %11803 = vmatprep.subr.mxu0 %v10441_v53  ;;  %11851 = vmatprep.subr.mxu1 %v10461_v34 }
 0x349   : > { %11804 = vmatpush3.msra.mxu0 %v10441_v53  ;;  %11852 = vmatpush3.msra.mxu1 %v10461_v34 }
 0x34a   : > { %11805 = vmatprep.subr.mxu0 %v10440_v9  ;;  %11853 = vmatprep.subr.mxu1 %v10460_v36 }
 0x34b   : > { %11806 = vmatpush3.msra.mxu0 %v10440_v9  ;;  %11854 = vmatpush3.msra.mxu1 %v10460_v36 }
 0x34c   : > { %11807 = vmatprep.subr.mxu0 %v10439_v45  ;;  %11855 = vmatprep.subr.mxu1 %v10459_v37 }
 0x34d   : > { %11808 = vmatpush3.msra.mxu0 %v10439_v45  ;;  %11856 = vmatpush3.msra.mxu1 %v10459_v37 }
 0x34e   : > { %11809 = vmatprep.subr.mxu0 %v10438_v39  ;;  %11858 = vmatmul.mubr.msk.f32.vlgmr.msra.gmra.mxu1 %vm567_vm1, %v13894_v43 }
 0x34f   : > { %11810 = vmatpush3.msra.mxu0 %v10438_v39  ;;  %11860 = vmatprep.mubr.msk.f32.mxu1 %vm567_vm1, %v13898_v63 }
 0x350   : > { %11811 = vmatprep.subr.mxu0 %v10437_v40  ;;  %11817 = vmatprep.mubr.msk.f32.mxu0 %vm567_vm1, %v13869_v26 }
 0x351   : > { %11812 = vmatpush3.msra.mxu0 %v10437_v40 }
 0x352   : > { %11813 = vmatprep.subr.mxu0 %v10436_v50  ;;  %11861 = vmatmul.mubr.msk.f32.gmra.mxu1 %vm567_vm1, %v13906_v12 }
 0x353   : > { %11814 = vmatpush3.msra.mxu0 %v10436_v50  ;;  %11863 = vmatprep.mubr.msk.f32.mxu1 %vm567_vm1, %v13910_v44 }
 0x354   : > { %11815 = vmatprep.subr.mxu0 %v10435_v52 }
 0x355   : > { %11816 = vmatpush3.msra.mxu0 %v10435_v52 }
 0x356   : > { %11818 = vmatmul.mubr.msk.f32.vlgmr.msra.gmra.mxu0 %vm567_vm1, %v13894_v43  ;;  %11864 = vmatmul.mubr.msk.f32.gmra.mxu1 %vm567_vm1, %v13916_v46 }
 0x357   : > { %11820 = vmatprep.mubr.msk.f32.mxu0 %vm567_vm1, %v13898_v63  ;;  %11866 = vmatprep.mubr.msk.f32.mxu1 %vm567_vm1, %v13922_v11 }
 0x358   : > { %11881 = vmatprep.subr.mxu0 %v10490_v15 }
 0x359   : > { %11882 = vmatpush3.msra.mxu0 %v10490_v15 }
 0x35a   : > { %11821 = vmatmul.mubr.msk.f32.gmra.mxu0 %vm567_vm1, %v13906_v12  ;;  %11867 = vmatmul.mubr.msk.f32.gmra.mxu1 %vm567_vm1, %v13076_v18 }
 0x35b   : > { %11823 = vmatprep.mubr.msk.f32.mxu0 %vm567_vm1, %v13910_v44  ;;  %11869 = vmatprep.mubr.msk.f32.mxu1 %vm567_vm1, %v13077_v3 }
 0x35c   : > { %11883 = vmatprep.subr.mxu0 %v10489_v48 }
 0x35d   : > { %11884 = vmatpush3.msra.mxu0 %v10489_v48 }
 0x35e   : > { %11824 = vmatmul.mubr.msk.f32.gmra.mxu0 %vm567_vm1, %v13916_v46  ;;  %11870 = vmatmul.mubr.msk.f32.gmra.mxu1 %vm567_vm1, %v13078_v27 }
 0x35f   : > { %11826 = vmatprep.mubr.msk.f32.mxu0 %vm567_vm1, %v13922_v11  ;;  %11872 = vmatprep.mubr.msk.f32.mxu1 %vm567_vm1, %v13079_v41 }
 0x360   : > { %11885 = vmatprep.subr.mxu0 %v10488_v19 }
 0x361   : > { %11886 = vmatpush3.msra.mxu0 %v10488_v19 }
 0x362   : > { %11827 = vmatmul.mubr.msk.f32.gmra.mxu0 %vm567_vm1, %v13076_v18  ;;  %11873 = vmatmul.mubr.msk.f32.gmra.mxu1 %vm567_vm1, %v13080_v2 }
 0x363   : > { %11829 = vmatprep.mubr.msk.f32.mxu0 %vm567_vm1, %v13077_v3  ;;  %11875 = vmatprep.mubr.msk.f32.mxu1 %vm567_vm1, %v13081_v17 }
 0x364   : > { %11887 = vmatprep.subr.mxu0 %v10487_v49 }
 0x365   : > { %11888 = vmatpush3.msra.mxu0 %v10487_v49 }
 0x366   : > { %11830 = vmatmul.mubr.msk.f32.gmra.mxu0 %vm567_vm1, %v13078_v27  ;;  %11876 = vmatmul.mubr.msk.f32.gmra.mxu1 %vm567_vm1, %v13082_v16 }
 0x367   : > { %11832 = vmatprep.mubr.msk.f32.mxu0 %vm567_vm1, %v13079_v41  ;;  %11878 = vmatprep.mubr.msk.f32.mxu1 %vm567_vm1, %v13083_v20 }
 0x368   : > { %11889 = vmatprep.subr.mxu0 %v10486_v59 }
 0x369   : > { %11890 = vmatpush3.msra.mxu0 %v10486_v59 }
 0x36a   : > { %11833 = vmatmul.mubr.msk.f32.gmra.mxu0 %vm567_vm1, %v13080_v2  ;;  %11879 = vmatmul.mubr.msk.f32.gmra.mxu1 %vm567_vm1, %v13084_v7 }
 0x36b   : > { %11835 = vmatprep.mubr.msk.f32.mxu0 %vm567_vm1, %v13081_v17  ;;  %11891 = vmatprep.subr.mxu0 %v10485_v22 }
 0x36c   : > { %11892 = vmatpush3.msra.mxu0 %v10485_v22 }
 0x36d   : > { %11893 = vmatprep.subr.mxu0 %v10484_v32 }
 0x36e   : > { %11836 = vmatmul.mubr.msk.f32.gmra.mxu0 %vm567_vm1, %v13082_v16 }
 0x36f   : > { %11838 = vmatprep.mubr.msk.f32.mxu0 %vm567_vm1, %v13083_v20  ;;  %11894 = vmatpush3.msra.mxu0 %v10484_v32 }
 0x370   : > { %11895 = vmatprep.subr.mxu0 %v10483_v35 }
 0x371   : > { %11896 = vmatpush3.msra.mxu0 %v10483_v35 }
 0x372   : > { %11839 = vmatmul.mubr.msk.f32.gmra.mxu0 %vm567_vm1, %v13084_v7 }
 0x373   : > { %11897 = vmatprep.mubr.msk.f32.mxu0 %vm567_vm1, %v13869_v26 }
 0x376   : > { %11898 = vmatmul.mubr.msk.f32.vlgmr.msra.gmra.mxu0 %vm567_vm1, %v13894_v43 }
 0x377   : > { %11900 = vmatprep.mubr.msk.f32.mxu0 %vm567_vm1, %v13898_v63 }
 0x37a   : > { %11901 = vmatmul.mubr.msk.f32.gmra.mxu0 %vm567_vm1, %v13906_v12 }
 0x37b   : > { %11903 = vmatprep.mubr.msk.f32.mxu0 %vm567_vm1, %v13910_v44 }
 0x37e   : > { %11904 = vmatmul.mubr.msk.f32.gmra.mxu0 %vm567_vm1, %v13916_v46 }
 0x37f   : > { %11906 = vmatprep.mubr.msk.f32.mxu0 %vm567_vm1, %v13922_v11 }
 0x382   : > { %11907 = vmatmul.mubr.msk.f32.gmra.mxu0 %vm567_vm1, %v13076_v18 }
 0x383   : > { %11909 = vmatprep.mubr.msk.f32.mxu0 %vm567_vm1, %v13077_v3 }
 0x386   : > { %11910 = vmatmul.mubr.msk.f32.gmra.mxu0 %vm567_vm1, %v13078_v27 }
 0x387   : > { %11912 = vmatprep.mubr.msk.f32.mxu0 %vm567_vm1, %v13079_v41 }
 0x38a   : > { %11913 = vmatmul.mubr.msk.f32.gmra.mxu0 %vm567_vm1, %v13080_v2 }
 0x38b   : > { %11915 = vmatprep.mubr.msk.f32.mxu0 %vm567_vm1, %v13081_v17 }
 0x38e   : > { %11916 = vmatmul.mubr.msk.f32.gmra.mxu0 %vm567_vm1, %v13082_v16 }
 0x38f   : > { %11918 = vmatprep.mubr.msk.f32.mxu0 %vm567_vm1, %v13083_v20 }
 0x392   : > { %11919 = vmatmul.mubr.msk.f32.gmra.mxu0 %vm567_vm1, %v13084_v7 }
 0x3d8   : > { %v13987_v38 = vpop.f32.mrf.mxu0 }
 0x3da   : > { %v13991_v21 = vpop.f32.mrf.mxu0 }
 0x3e0   : > { %v13983_v54 = vpop.f32.mrf.mxu1 }
 0x3e2   : > { %v13985_v42 = vpop.f32.mrf.mxu1 }
 0x3e4   : > { %v13995_v10 = vpop.f32.mrf.mxu0 }
 0x3e6   : > { %v13999_v62 = vpop.f32.mrf.mxu0 }
 0x3ef   : > { %v13989_v31 = vpop.f32.mrf.mxu1 }
 0x3f1   : > { %v13993_v55 = vpop.f32.mrf.mxu1 }
 0x3f5   : > { %v13997_v24 = vpop.f32.mrf.mxu1 }
 0x3f7   : > { %v14001_v5 = vpop.f32.mrf.mxu1 }
 0x3fd   : > { %v14003_v4 = vpop.f32.mrf.mxu1 }
 0x3ff   : > { %v14009_v13 = vpop.f32.mrf.mxu1 }
 0x401   : > { %v14005_v30 = vpop.f32.mrf.mxu0 }
 0x403   : > { %v14011_v25 = vpop.f32.mrf.mxu0 }
 0x406   : > { %v14014_v26 = vpop.f32.mrf.mxu0 }
 0x408   : > { %v14020_v28 = vpop.f32.mrf.mxu0 }
 0x40e   : > { %v11859_v47 = vpop.f32.mrf.mxu1 }
 0x40f   : > { %v2857_v14 = vadd.f32 %v11859_v47, %v14007_v6 }
 0x410   : > { %v2851_v8 = vpop.f32.mrf.mxu1 }
 0x411   : > { %v2852_v58 = vadd.f32 %v2851_v8, %v14007_v6  ;;  %11921 = vmatprep.subr.msk.mxu1 %vm1075_vm2, %v2857_v14 }
 0x412   : > { %v11862_v51 = vpop.f32.mrf.mxu1  ;;  %11922 = vmatpush3.xpose.msk.msra.mxu1 %vm1075_vm2, %v2857_v14 }
 0x413   : > { %11923 = vmatprep.subr.msk.mxu1 %vm1075_vm2, %v2852_v58  ;;  %v2867_v29 = vadd.f32 %v11862_v51, %v14007_v6 }
 0x414   : > { %v2861_v1 = vpop.f32.mrf.mxu1 }
 0x415   : > { %v2862_v39 = vadd.f32 %v2861_v1, %v14007_v6 }
 0x416   : > { %v11819_v61 = vpop.f32.mrf.mxu0  ;;  %v11865_v33 = vpop.f32.mrf.mxu1  ;;  %11924 = vmatpush3.xpose.msk.msra.mxu1 %vm1075_vm2, %v2852_v58 }
 0x417   : > { %11928 = vmatprep.subr.msk.mxu1 %vm1075_vm2, %v2867_v29  ;;  %v2699_v36 = vadd.f32 %v11819_v61, %v14024_v23  ;;  %v2877_v44 = vadd.f32 %v11865_v33, %v14007_v6 }
 0x418   : > { %v2693_v53 = vpop.f32.mrf.mxu0  ;;  %v2871_v34 = vpop.f32.mrf.mxu1 }
 0x419   : > { %v2694_v9 = vadd.f32 %v2693_v53, %v14024_v23  ;;  %v2872_v17 = vadd.f32 %v2871_v34, %v14007_v6 }
 0x41a   : > { %v11822_v45 = vpop.f32.mrf.mxu0  ;;  %v11868_v37 = vpop.f32.mrf.mxu1 }
 0x41b   : > { %11925 = vmatprep.mubr.msk.f32.mxu1 %vm1075_vm2, %v2694_v9  ;;  %v2709_v27 = vadd.f32 %v11822_v45, %v14024_v23  ;;  %v2887_v19 = vadd.f32 %v11868_v37, %v14007_v6 }
 0x41c   : > { %v2703_v40 = vpop.f32.mrf.mxu0  ;;  %v2881_v43 = vpop.f32.mrf.mxu1  ;;  %11926 = vmatmul.mubr.msk.f32.vlgmr.msra.gmra.mxu1 %vm1075_vm2, %v2699_v36 }
 0x41d   : > { %v2704_v63 = vadd.f32 %v2703_v40, %v14024_v23  ;;  %11929 = vmatpush3.xpose.msk.msra.mxu1 %vm1075_vm2, %v2867_v29  ;;  %v2882_v8 = vadd.f32 %v2881_v43, %v14007_v6 }
 0x41e   : > { %11930 = vmatprep.subr.msk.mxu1 %vm1075_vm2, %v2862_v39  ;;  %v11825_v50 = vpop.f32.mrf.mxu0  ;;  %v11871_v52 = vpop.f32.mrf.mxu1 }
 0x41f   : > { %v2897_v12 = vadd.f32 %v11871_v52, %v14007_v6  ;;  %11932 = vmatprep.mubr.msk.f32.mxu1 %vm1075_vm2, %v2704_v63  ;;  %v2719_v22 = vadd.f32 %v11825_v50, %v14024_v23 }
 0x420   : > { %v2713_v46 = vpop.f32.mrf.mxu0  ;;  %v2891_v11 = vpop.f32.mrf.mxu1 }
 0x421   : > { %v2714_v18 = vadd.f32 %v2713_v46, %v14024_v23  ;;  %v2892_v3 = vadd.f32 %v2891_v11, %v14007_v6  ;;  %11931 = vmatpush3.xpose.msk.msra.mxu1 %vm1075_vm2, %v2862_v39  ;;  %11949 = vmatprep.subr.msk.mxu0 %vm1075_vm2, %v2897_v12 }
 0x422   : > { %11935 = vmatprep.subr.msk.mxu1 %vm1075_vm2, %v2877_v44  ;;  %v11828_v41 = vpop.f32.mrf.mxu0  ;;  %v11874_v2 = vpop.f32.mrf.mxu1  ;;  %11950 = vmatpush3.xpose.msk.msra.mxu0 %vm1075_vm2, %v2897_v12 }
 0x423   : > { %11951 = vmatprep.subr.msk.mxu0 %vm1075_vm2, %v2892_v3  ;;  %v2907_v29 = vadd.f32 %v11874_v2, %v14007_v6  ;;  %v2729_v53 = vadd.f32 %v11828_v41, %v14024_v23 }
 0x424   : > { %11933 = vmatmul.mubr.msk.f32.vlgmr.msra.gmra.mxu1 %vm1075_vm2, %v2709_v27  ;;  %v2723_v16 = vpop.f32.mrf.mxu0  ;;  %v2901_v20 = vpop.f32.mrf.mxu1 }
 0x425   : > { %11936 = vmatpush3.xpose.msk.msra.mxu1 %vm1075_vm2, %v2877_v44  ;;  %11939 = vmatprep.mubr.msk.f32.mxu1 %vm1075_vm2, %v2714_v18  ;;  %v2724_v14 = vadd.f32 %v2723_v16, %v14024_v23  ;;  %v2902_v9 = vadd.f32 %v2901_v20, %v14007_v6 }
 0x426   : > { %11937 = vmatprep.subr.msk.mxu1 %vm1075_vm2, %v2872_v17  ;;  %v11831_v7 = vpop.f32.mrf.mxu0  ;;  %v11877_v15 = vpop.f32.mrf.mxu1  ;;  %11952 = vmatpush3.xpose.msk.msra.mxu0 %vm1075_vm2, %v2892_v3 }
 0x427   : > { %v2917_v48 = vadd.f32 %v11877_v15, %v14007_v6  ;;  %v2739_v32 = vadd.f32 %v11831_v7, %v14024_v23 }
 0x428   : > { %v2733_v49 = vpop.f32.mrf.mxu0  ;;  %v2911_v35 = vpop.f32.mrf.mxu1 }
 0x429   : > { %v2734_v59 = vadd.f32 %v2733_v49, %v14024_v23  ;;  %11938 = vmatpush3.xpose.msk.msra.mxu1 %vm1075_vm2, %v2872_v17  ;;  %11963 = vmatprep.subr.msk.mxu0 %vm1075_vm2, %v2917_v48  ;;  %v2912_v51 = vadd.f32 %v2911_v35, %v14007_v6 }
 0x42a   : > { %11942 = vmatprep.subr.msk.mxu1 %vm1075_vm2, %v2887_v19  ;;  %v11834_v47 = vpop.f32.mrf.mxu0  ;;  %v11880_v37 = vpop.f32.mrf.mxu1 }
 0x42b   : > { %11953 = vmatprep.mubr.msk.f32.mxu0 %vm1075_vm2, %v2734_v59  ;;  %v2927_v39 = vadd.f32 %v11880_v37, %v14007_v6  ;;  %v2749_v63 = vadd.f32 %v11834_v47, %v14024_v23 }
 0x42c   : > { %11940 = vmatmul.mubr.msk.f32.vlgmr.msra.gmra.mxu1 %vm1075_vm2, %v2719_v22  ;;  %v2743_v58 = vpop.f32.mrf.mxu0  ;;  %11954 = vmatmul.mubr.msk.f32.vlgmr.msra.gmra.mxu0 %vm1075_vm2, %v2739_v32  ;;  %v2921_v43 = vpop.f32.mrf.mxu1 }
 0x42d   : > { %11943 = vmatpush3.xpose.msk.msra.mxu1 %vm1075_vm2, %v2887_v19  ;;  %11946 = vmatprep.mubr.msk.f32.mxu1 %vm1075_vm2, %v2724_v14  ;;  %v2744_v34 = vadd.f32 %v2743_v58, %v14024_v23  ;;  %v2922_v52 = vadd.f32 %v2921_v43, %v14007_v6 }
 0x42e   : > { %11964 = vmatpush3.xpose.msk.msra.mxu0 %vm1075_vm2, %v2917_v48  ;;  %11944 = vmatprep.subr.msk.mxu1 %vm1075_vm2, %v2882_v8  ;;  %v11837_v1 = vpop.f32.mrf.mxu0 }
 0x42f   : > { %11965 = vmatprep.subr.msk.mxu0 %vm1075_vm2, %v2912_v51  ;;  %v2759_v36 = vadd.f32 %v11837_v1, %v14024_v23 }
 0x430   : > { %v2753_v61 = vpop.f32.mrf.mxu0 }
 0x431   : > { %v2754_v33 = vadd.f32 %v2753_v61, %v14024_v23  ;;  %11945 = vmatpush3.xpose.msk.msra.mxu1 %vm1075_vm2, %v2882_v8 }
 0x432   : > { %11966 = vmatpush3.xpose.msk.msra.mxu0 %vm1075_vm2, %v2912_v51  ;;  %11956 = vmatprep.subr.msk.mxu1 %vm1075_vm2, %v2907_v29  ;;  %v11840_v45 = vpop.f32.mrf.mxu0 }
 0x433   : > { %11967 = vmatprep.mubr.msk.f32.mxu0 %vm1075_vm2, %v2754_v33  ;;  %v2769_v12 = vadd.f32 %v11840_v45, %v14024_v23 }
 0x434   : > { %11947 = vmatmul.mubr.msk.f32.vlgmr.msra.gmra.mxu1 %vm1075_vm2, %v2729_v53  ;;  %v2763_v40 = vpop.f32.mrf.mxu0 }
 0x435   : > { %11957 = vmatpush3.xpose.msk.msra.mxu1 %vm1075_vm2, %v2907_v29  ;;  %11960 = vmatprep.mubr.msk.f32.mxu1 %vm1075_vm2, %v2744_v34  ;;  %v2764_v50 = vadd.f32 %v2763_v40, %v14024_v23 }
 0x436   : > { %11968 = vmatmul.mubr.msk.f32.vlgmr.msra.gmra.mxu0 %vm1075_vm2, %v2759_v36  ;;  %11958 = vmatprep.subr.msk.mxu1 %vm1075_vm2, %v2902_v9  ;;  %v14099_v44 = vpop.f32.mrf.mxu0 }
 0x438   : > { %v14101_v46 = vpop.f32.mrf.mxu0 }
 0x439   : > { %11959 = vmatpush3.xpose.msk.msra.mxu1 %vm1075_vm2, %v2902_v9 }
 0x43a   : > { %11970 = vmatprep.subr.msk.mxu1 %vm1075_vm2, %v2927_v39  ;;  %v14103_v11 = vpop.f32.mrf.mxu0 }
 0x43c   : > { %11961 = vmatmul.mubr.msk.f32.vlgmr.msra.gmra.mxu1 %vm1075_vm2, %v2749_v63  ;;  %v14105_v6 = vpop.f32.mrf.mxu0 }
 0x43d   : > { %11971 = vmatpush3.xpose.msk.msra.mxu1 %vm1075_vm2, %v2927_v39  ;;  %11974 = vmatprep.mubr.msk.f32.mxu1 %vm1075_vm2, %v2764_v50 }
 0x43e   : > { %11972 = vmatprep.subr.msk.mxu1 %vm1075_vm2, %v2922_v52  ;;  %v14107_v18 = vpop.f32.mrf.mxu0 }
 0x440   : > { %v14109_v3 = vpop.f32.mrf.mxu0 }
 0x441   : > { %11973 = vmatpush3.xpose.msk.msra.mxu1 %vm1075_vm2, %v2922_v52 }
 0x442   : > { %v14111_v27 = vpop.f32.mrf.mxu0 }
 0x444   : > { %11975 = vmatmul.mubr.msk.f32.vlgmr.msra.gmra.mxu1 %vm1075_vm2, %v2769_v12  ;;  %v14113_v41 = vpop.f32.mrf.mxu0 }
 0x446   : > { %v14115_v2 = vpop.f32.mrf.mxu0 }
 0x448   : > { %v14117_v23 = vpop.f32.mrf.mxu0 }
 0x44a   : > { %v14119_v17 = vpop.f32.mrf.mxu0 }
 0x44c   : > { %v14123_v15 = vpop.f32.mrf.mxu0 }
 0x44e   : > { %v14131_v59 = vpop.f32.mrf.mxu0 }
 0x450   : > { %v14135_v47 = vpop.f32.mrf.mxu0 }
 0x452   : > { %v14143_v51 = vpop.f32.mrf.mxu0 }
 0x454   : > { %v14147_v61 = vpop.f32.mrf.mxu0 }
 0x4dc   : > { %v11927_v16 = vpop.f32.mrf.mxu1 }
 0x4dd   : > { %v14121_v20 = vmul.f32 0.25, %v11927_v16 }
 0x4de   : > { %v3166_v7 = vpop.f32.mrf.mxu1 }
 0x4df   : > { %v14125_v48 = vmul.f32 0.25, %v3166_v7  ;;  %v3803_v19 = vsel %vm1075_vm2, %v14121_v20, -inf }
 0x4e0   : > { %3804 = vmax.xlane.f32.xlu0 %v3803_v19 }
 0x4e1   : > { %v3800_v49 = vsel %vm1075_vm2, %v14125_v48, -inf }
 0x4e2   : > { %3801 = vmax.xlane.f32.xlu1 %v3800_v49 }
 0x4e4   : > { %v11934_v22 = vpop.f32.mrf.mxu1 }
 0x4e5   : > { %v14133_v32 = vmul.f32 0.25, %v11934_v22 }
 0x4e6   : > { %v3253_v35 = vpop.f32.mrf.mxu1 }
 0x4e7   : > { %v14137_v14 = vmul.f32 0.25, %v3253_v35  ;;  %v3809_v8 = vsel %vm1075_vm2, %v14133_v32, -inf }
 0x4e8   : > { %3810 = vmax.xlane.f32.xlu1 %v3809_v8 }
 0x4e9   : > { %v3806_v58 = vsel %vm1075_vm2, %v14137_v14, -inf }
 0x4ea   : > { %3807 = vmax.xlane.f32.xlu0 %v3806_v58 }
 0x4ec   : > { %v11941_v1 = vpop.f32.mrf.mxu1  ;;  %v11955_v36 = vpop.f32.mrf.mxu0 }
 0x4ed   : > { %v14145_v29 = vmul.f32 0.25, %v11941_v1  ;;  %v14157_v43 = vmul.f32 0.25, %v11955_v36 }
 0x4ee   : > { %v3340_v33 = vpop.f32.mrf.mxu1  ;;  %v3514_v39 = vpop.f32.mrf.mxu0 }
 0x4ef   : > { %v14149_v53 = vmul.f32 0.25, %v3340_v33  ;;  %v3815_v34 = vsel %vm1075_vm2, %v14145_v29, -inf  ;;  %v14163_v52 = vmul.f32 0.25, %v3514_v39  ;;  %v3827_v7 = vsel %vm1075_vm2, %v14157_v43, -inf }
 0x4f0   : > { %3816 = vmax.xlane.f32.xlu1 %v3815_v34 }
 0x4f1   : > { %v3812_v9 = vsel %vm1075_vm2, %v14149_v53, -inf  ;;  %v3824_v22 = vsel %vm1075_vm2, %v14163_v52, -inf }
 0x4f2   : > { %3813 = vmax.xlane.f32.xlu0 %v3812_v9 }
 0x4f4   : > { %v11948_v45 = vpop.f32.mrf.mxu1 }
 0x4f5   : > { %v14155_v37 = vmul.f32 0.25, %v11948_v45 }
 0x4f6   : > { %v3427_v40 = vpop.f32.mrf.mxu1  ;;  %v11969_v16 = vpop.f32.mrf.mxu0 }
 0x4f7   : > { %v14159_v63 = vmul.f32 0.25, %v3427_v40  ;;  %v3821_v50 = vsel %vm1075_vm2, %v14155_v37, -inf  ;;  %v14173_v58 = vmul.f32 0.25, %v11969_v16 }
 0x4f8   : > { %3822 = vmax.xlane.f32.xlu1 %v3821_v50  ;;  %v3688_v35 = vpop.f32.mrf.mxu0 }
 0x4f9   : > { %v3818_v12 = vsel %vm1075_vm2, %v14159_v63, -inf  ;;  %v14179_v34 = vmul.f32 0.25, %v3688_v35  ;;  %v3839_v36 = vsel %vm1075_vm2, %v14173_v58, -inf }
 0x4fa   : > { %3819 = vmax.xlane.f32.xlu0 %v3818_v12 }
 0x4fb   : > { %v3836_v40 = vsel %vm1075_vm2, %v14179_v34, -inf }
 0x4fc   : > { %3828 = vmax.xlane.f32.xlu1 %v3827_v7  ;;  %v11962_v19 = vpop.f32.mrf.mxu1 }
 0x4fd   : > { %v14169_v49 = vmul.f32 0.25, %v11962_v19 }
 0x4fe   : > { %3825 = vmax.xlane.f32.xlu0 %v3824_v22  ;;  %v3601_v8 = vpop.f32.mrf.mxu1 }
 0x4ff   : > { %v14175_v1 = vmul.f32 0.25, %v3601_v8  ;;  %v3833_v33 = vsel %vm1075_vm2, %v14169_v49, -inf }
 0x500   : > { %3834 = vmax.xlane.f32.xlu1 %v3833_v33 }
 0x501   : > { %v3830_v9 = vsel %vm1075_vm2, %v14175_v1, -inf }
 0x502   : > { %3831 = vmax.xlane.f32.xlu0 %v3830_v9 }
 0x504   : > { %3840 = vmax.xlane.f32.xlu1 %v3839_v36  ;;  %v11976_v45 = vpop.f32.mrf.mxu1 }
 0x505   : > { %v14185_v39 = vmul.f32 0.25, %v11976_v45 }
 0x506   : > { %3837 = vmax.xlane.f32.xlu0 %v3836_v40  ;;  %v3775_v50 = vpop.f32.mrf.mxu1 }
 0x507   : > { %v14189_v12 = vmul.f32 0.25, %v3775_v50  ;;  %v3845_v16 = vsel %vm1075_vm2, %v14185_v39, -inf }
 0x508   : > { %3846 = vmax.xlane.f32.xlu1 %v3845_v16 }
 0x509   : > { %v3842_v7 = vsel %vm1075_vm2, %v14189_v12, -inf }
 0x50a   : > { %3843 = vmax.xlane.f32.xlu0 %v3842_v7 }
 0x569   : > { %v3805_v19 = vpop.xlane.xlu0 %3804 }
 0x56a   : > { %v3849_v22 = vsub.f32 %v14121_v20, %v3805_v19 }
 0x56b   : > { %v3802_v35 = vpop.xlane.xlu1 %3801 }
 0x56c   : > { %v3866_v8 = vmul.f32 1.442695, %v3849_v22  ;;  %v3848_v33 = vsub.f32 %v14125_v48, %v3802_v35 }
 0x56e   : > { %12845 = vpow2.f32 %v3866_v8  ;;  %v3864_v9 = vmul.f32 1.442695, %v3848_v33 }
 0x570   : > { %12847 = vpow2.f32 %v3864_v9 }
 0x571   : > { %v3811_v36 = vpop.xlane.xlu1 %3810 }
 0x572   : > { %v3851_v45 = vsub.f32 %v14133_v32, %v3811_v36 }
 0x573   : > { %v3808_v40 = vpop.xlane.xlu0 %3807 }
 0x574   : > { %v3870_v50 = vmul.f32 1.442695, %v3851_v45  ;;  %v3850_v16 = vsub.f32 %v14137_v14, %v3808_v40 }
 0x576   : > { %12849 = vpow2.f32 %v3870_v50  ;;  %v3868_v57 = vmul.f32 1.442695, %v3850_v16 }
 0x578   : > { %12851 = vpow2.f32 %v3868_v57 }
 0x579   : > { %v3817_v7 = vpop.xlane.xlu1 %3816 }
 0x57a   : > { %v3853_v20 = vsub.f32 %v14145_v29, %v3817_v7 }
 0x57b   : > { %v14200_v19 = vpop.eup %12845  ;;  %v3814_v22 = vpop.xlane.xlu0 %3813 }
 0x57c   : > { %v3874_v48 = vmul.f32 1.442695, %v3853_v20  ;;  %v3852_v35 = vsub.f32 %v14149_v53, %v3814_v22  ;;  %v3899_v8 = vsel %vm1075_vm2, %v14200_v19, 0.0 }
 0x57d   : > { %v14205_v32 = vpop.eup %12847  ;;  %3900 = vadd.xlane.f32.xlu1 %v3899_v8 }
 0x57e   : > { %12853 = vpow2.f32 %v3874_v48  ;;  %v3872_v14 = vmul.f32 1.442695, %v3852_v35  ;;  %v3896_v57 = vsel %vm1075_vm2, %v14205_v32, 0.0 }
 0x57f   : > { %3897 = vadd.xlane.f32.xlu0 %v3896_v57 }
 0x580   : > { %12855 = vpow2.f32 %v3872_v14 }
 0x581   : > { %v3823_v29 = vpop.xlane.xlu1 %3822 }
 0x582   : > { %v3855_v9 = vsub.f32 %v14155_v37, %v3823_v29 }
 0x583   : > { %v14209_v33 = vpop.eup %12849  ;;  %v3820_v36 = vpop.xlane.xlu0 %3819 }
 0x584   : > { %v3905_v53 = vsel %vm1075_vm2, %v14209_v33, 0.0  ;;  %v3854_v50 = vsub.f32 %v14159_v63, %v3820_v36  ;;  %v3878_v20 = vmul.f32 1.442695, %v3855_v9 }
 0x585   : > { %v14214_v45 = vpop.eup %12851  ;;  %v3829_v40 = vpop.xlane.xlu1 %3828  ;;  %3906 = vadd.xlane.f32.xlu1 %v3905_v53 }
 0x586   : > { %v3857_v16 = vsub.f32 %v14157_v43, %v3829_v40  ;;  %v3902_v7 = vsel %vm1075_vm2, %v14214_v45, 0.0  ;;  %v3876_v8 = vmul.f32 1.442695, %v3854_v50 }
 0x587   : > { %v3826_v22 = vpop.xlane.xlu0 %3825  ;;  %3903 = vadd.xlane.f32.xlu0 %v3902_v7 }
 0x588   : > { %v3882_v48 = vmul.f32 1.442695, %v3857_v16  ;;  %v3856_v37 = vsub.f32 %v14163_v52, %v3826_v22 }
 0x589   : > { %v3835_v35 = vpop.xlane.xlu1 %3834 }
 0x58a   : > { %12857 = vpow2.f32 %v3882_v48  ;;  %v3880_v14 = vmul.f32 1.442695, %v3856_v37  ;;  %v3859_v57 = vsub.f32 %v14169_v49, %v3835_v35 }
 0x58b   : > { %v14222_v29 = vpop.eup %12853  ;;  %12859 = vpow2.f32 %v3878_v20  ;;  %v3832_v63 = vpop.xlane.xlu0 %3831 }
 0x58c   : > { %12861 = vpow2.f32 %v3880_v14  ;;  %v3886_v43 = vmul.f32 1.442695, %v3859_v57  ;;  %v3858_v36 = vsub.f32 %v14175_v1, %v3832_v63  ;;  %v3911_v9 = vsel %vm1075_vm2, %v14222_v29, 0.0 }
 0x58d   : > { %v14227_v53 = vpop.eup %12855  ;;  %v3841_v52 = vpop.xlane.xlu1 %3840  ;;  %3912 = vadd.xlane.f32.xlu1 %v3911_v9  ;;  %12863 = vpow2.f32 %v3876_v8 }
 0x58e   : > { %v3884_v40 = vmul.f32 1.442695, %v3858_v36  ;;  %v3908_v49 = vsel %vm1075_vm2, %v14227_v53, 0.0  ;;  %12865 = vpow2.f32 %v3886_v43  ;;  %v3861_v16 = vsub.f32 %v14173_v58, %v3841_v52 }
 0x58f   : > { %v3838_v50 = vpop.xlane.xlu0 %3837  ;;  %3909 = vadd.xlane.f32.xlu0 %v3908_v49 }
 0x590   : > { %v3860_v7 = vsub.f32 %v14179_v34, %v3838_v50  ;;  %12867 = vpow2.f32 %v3884_v40  ;;  %v3890_v22 = vmul.f32 1.442695, %v3861_v16 }
 0x591   : > { %v3847_v37 = vpop.xlane.xlu1 %3846 }
 0x592   : > { %v3888_v1 = vmul.f32 1.442695, %v3860_v7  ;;  %v3863_v14 = vsub.f32 %v14185_v39, %v3847_v37 }
 0x593   : > { %v3844_v20 = vpop.xlane.xlu0 %3843 }
 0x594   : > { %12869 = vpow2.f32 %v3888_v1  ;;  %v3862_v48 = vsub.f32 %v14189_v12, %v3844_v20  ;;  %v3894_v12 = vmul.f32 1.442695, %v3863_v14 }
 0x595   : > { %12871 = vpow2.f32 %v3890_v22 }
 0x596   : > { %v3892_v57 = vmul.f32 1.442695, %v3862_v48 }
 0x597   : > { %v14234_v35 = vpop.eup %12857 }
 0x598   : > { %v14236_v8 = vpop.eup %12859  ;;  %v3923_v58 = vsel %vm1075_vm2, %v14234_v35, 0.0  ;;  %12873 = vpow2.f32 %v3892_v57 }
 0x599   : > { %v14241_v34 = vpop.eup %12861  ;;  %3924 = vadd.xlane.f32.xlu1 %v3923_v58  ;;  %v3917_v36 = vsel %vm1075_vm2, %v14236_v8, 0.0  ;;  %12875 = vpow2.f32 %v3894_v12 }
 0x59a   : > { %v3920_v63 = vsel %vm1075_vm2, %v14241_v34, 0.0  ;;  %v14245_v43 = vpop.eup %12863 }
 0x59b   : > { %3921 = vadd.xlane.f32.xlu0 %v3920_v63  ;;  %v14249_v9 = vpop.eup %12865  ;;  %v3914_v39 = vsel %vm1075_vm2, %v14245_v43, 0.0 }
 0x59c   : > { %v3929_v40 = vsel %vm1075_vm2, %v14249_v9, 0.0 }
 0x59d   : > { %3918 = vadd.xlane.f32.xlu1 %v3917_v36  ;;  %v14253_v52 = vpop.eup %12867 }
 0x59e   : > { %v3926_v50 = vsel %vm1075_vm2, %v14253_v52, 0.0 }
 0x59f   : > { %3915 = vadd.xlane.f32.xlu0 %v3914_v39 }
 0x5a1   : > { %v14257_v49 = vpop.eup %12869  ;;  %3930 = vadd.xlane.f32.xlu1 %v3929_v40 }
 0x5a2   : > { %v3932_v16 = vsel %vm1075_vm2, %v14257_v49, 0.0  ;;  %v14263_v7 = vpop.eup %12871 }
 0x5a3   : > { %3927 = vadd.xlane.f32.xlu0 %v3926_v50  ;;  %v3935_v1 = vsel %vm1075_vm2, %v14263_v7, 0.0 }
 0x5a5   : > { %3933 = vadd.xlane.f32.xlu1 %v3932_v16  ;;  %v14267_v20 = vpop.eup %12873 }
 0x5a6   : > { %v3938_v22 = vsel %vm1075_vm2, %v14267_v20, 0.0  ;;  %v14271_v48 = vpop.eup %12875 }
 0x5a7   : > { %v3941_v37 = vsel %vm1075_vm2, %v14271_v48, 0.0 }
 0x5a9   : > { %3936 = vadd.xlane.f32.xlu1 %v3935_v1 }
 0x5ad   : > { %3939 = vadd.xlane.f32.xlu1 %v3938_v22 }
 0x5b1   : > { %3942 = vadd.xlane.f32.xlu1 %v3941_v37 }
 0x5b9   : > { %2940 = vrot.lane.b32.xlu0 %v13618_v56, %s13228_s0 }
 0x5bd   : > { %5022 = vrot.lane.b32.xlu0 %v13553_v0, %s13229_s1 }
 0x5c2   : > { %5179 = vrot.lane.b32.xlu1 %v13548_v60, %s13229_s1 }
 0x606   : > { %v3901_v63 = vpop.xlane.xlu1 %3900 }
 0x608   : > { %v3898_v14 = vpop.xlane.xlu0 %3897 }
 0x609   : > { %12877 = vrcp.f32 %v3898_v14 }
 0x60e   : > { %v3907_v36 = vpop.xlane.xlu1 %3906 }
 0x610   : > { %v3904_v57 = vpop.xlane.xlu0 %3903 }
 0x611   : > { %12879 = vrcp.f32 %v3904_v57 }
 0x612   : > { %12881 = vrcp.f32 %v3901_v63 }
 0x613   : > { %12883 = vrcp.f32 %v3907_v36 }
 0x616   : > { %v12878_v58 = vpop.eup %12877  ;;  %v3913_v40 = vpop.xlane.xlu1 %3912 }
 0x617   : > { %v3960_v12 = vmul.f32 %v12878_v58, %v14205_v32 }
 0x618   : > { %v3910_v16 = vpop.xlane.xlu0 %3909 }
 0x619   : > { %11981 = vmatprep.mubr.msk.f32.mxu0 %vm1075_vm2, %v3960_v12  ;;  %12885 = vrcp.f32 %v3910_v16 }
 0x61e   : > { %v12880_v39 = vpop.eup %12879 }
 0x61f   : > { %v3962_v50 = vmul.f32 %v12880_v39, %v14214_v45  ;;  %v12882_v12 = vpop.eup %12881 }
 0x620   : > { %v12884_v39 = vpop.eup %12883 }
 0x621   : > { %11988 = vmatprep.mubr.msk.f32.mxu1 %vm1075_vm2, %v3962_v50 }
 0x622   : > { %v3925_v1 = vpop.xlane.xlu1 %3924 }
 0x624   : > { %v3922_v22 = vpop.xlane.xlu0 %3921 }
 0x626   : > { %v3919_v37 = vpop.xlane.xlu1 %3918 }
 0x628   : > { %v3916_v14 = vpop.xlane.xlu0 %3915 }
 0x629   : > { %12887 = vrcp.f32 %v3916_v14 }
 0x62a   : > { %12889 = vrcp.f32 %v3913_v40  ;;  %v3931_v32 = vpop.xlane.xlu1 %3930 }
 0x62b   : > { %12891 = vrcp.f32 %v3919_v37 }
 0x62c   : > { %12893 = vrcp.f32 %v3922_v22  ;;  %v3928_v57 = vpop.xlane.xlu0 %3927 }
 0x62d   : > { %12895 = vrcp.f32 %v3928_v57 }
 0x62e   : > { %v3934_v58 = vpop.xlane.xlu1 %3933  ;;  %12897 = vrcp.f32 %v3925_v1  ;;  %v12886_v1 = vpop.eup %12885 }
 0x62f   : > { %12899 = vrcp.f32 %v3931_v32 }
 0x630   : > { %v14281_v45 = vpop.permute.xlu0 %2940  ;;  %12901 = vrcp.f32 %v3934_v58 }
 0x631   : > { %v3015_v63 = vadd.f32 %v14099_v44, %v14281_v45  ;;  %v3025_v36 = vadd.f32 %v14103_v11, %v14281_v45  ;;  %v3010_v50 = vadd.f32 %v14101_v46, %v14281_v45  ;;  %v3020_v16 = vadd.f32 %v14105_v6, %v14281_v45 }
 0x632   : > { %v3937_v40 = vpop.xlane.xlu1 %3936  ;;  %v3961_v44 = vmul.f32 %v12882_v12, %v14200_v19  ;;  %v3963_v11 = vmul.f32 %v12884_v39, %v14209_v33  ;;  %v3035_v46 = vadd.f32 %v14107_v18, %v14281_v45  ;;  %v3045_v6 = vadd.f32 %v14111_v27, %v14281_v45 }
 0x633   : > { %11977 = vmatprep.subr.mxu0 %v3015_v63  ;;  %11984 = vmatprep.subr.mxu1 %v3025_v36  ;;  %12903 = vrcp.f32 %v3937_v40  ;;  %v3964_v19 = vmul.f32 %v12886_v1, %v14227_v53  ;;  %v3030_v57 = vadd.f32 %v14109_v3, %v14281_v45  ;;  %v3040_v27 = vadd.f32 %v14113_v41, %v14281_v45 }
 0x634   : > { %11978 = vmatpush3.msra.mxu0 %v3015_v63  ;;  %11985 = vmatpush3.msra.mxu1 %v3025_v36  ;;  %v3055_v63 = vadd.f32 %v14115_v2, %v14281_v45  ;;  %v3065_v41 = vadd.f32 %v14119_v17, %v14281_v45  ;;  %v3060_v2 = vadd.f32 %v14123_v15, %v14281_v45 }
 0x635   : > { %11979 = vmatprep.subr.mxu0 %v3010_v50  ;;  %11986 = vmatprep.subr.mxu1 %v3020_v16  ;;  %v3085_v15 = vadd.f32 %v14143_v51, %v14281_v45 }
 0x636   : > { %v12888_v22 = vpop.eup %12887  ;;  %v3940_v37 = vpop.xlane.xlu1 %3939  ;;  %11980 = vmatpush3.msra.mxu0 %v3010_v50  ;;  %11987 = vmatpush3.msra.mxu1 %v3020_v16 }
 0x637   : > { %v12890_v14 = vpop.eup %12889  ;;  %12905 = vrcp.f32 %v3940_v37  ;;  %11982 = vmatmul.mubr.msk.f32.vlgmr.msra.gmra.mxu0 %vm1075_vm2, %v3961_v44  ;;  %11989 = vmatmul.mubr.msk.f32.vlgmr.msra.gmra.mxu1 %vm1075_vm2, %v3963_v11  ;;  %v3966_v33 = vmul.f32 %v12888_v22, %v14245_v43  ;;  %v14427_v44 = vld [vmem:[#allocation2 + $0x50] sm:$0xff]  ;;  %v14431_v11 = vld [vmem:[#allocation2 + $0x58] sm:$0xff]  ;;  %v14435_v22 = vld [vmem:[#allocation2 + $0x60] sm:$0xff] }
 0x638   : > { %v12892_v32 = vpop.eup %12891  ;;  %11991 = vmatprep.subr.mxu0 %v3035_v46  ;;  %11998 = vmatprep.subr.mxu1 %v3045_v6  ;;  %v3965_v53 = vmul.f32 %v12890_v14, %v14222_v29  ;;  %v14439_v37 = vld [vmem:[#allocation2 + $0x68] sm:$0xff]  ;;  %v14448_v14 = vld [vmem:[#allocation2 + $0x78] sm:$0xff] }
 0x639   : > { %v12894_v18 = vpop.eup %12893  ;;  %11992 = vmatpush3.msra.mxu0 %v3035_v46  ;;  %11995 = vmatprep.mubr.msk.f32.mxu0 %vm1075_vm2, %v3964_v19  ;;  %v3967_v43 = vmul.f32 %v12892_v32, %v14236_v8  ;;  %v3050_v8 = vadd.f32 %v14117_v23, %v14281_v45  ;;  %v3075_v23 = vadd.f32 %v14131_v59, %v14281_v45  ;;  %v14443_v46 = vld [vmem:[#allocation2 + $0x70] sm:$0xff] }
 0x63a   : > { %v12896_v58 = vpop.eup %12895  ;;  %11999 = vmatpush3.msra.mxu1 %v3045_v6  ;;  %11993 = vmatprep.subr.mxu0 %v3030_v57  ;;  %v3943_v12 = vpop.xlane.xlu1 %3942  ;;  %v3968_v39 = vmul.f32 %v12894_v18, %v14241_v34  ;;  %v3080_v59 = vadd.f32 %v14147_v61, %v14281_v45  ;;  %v2612_v61 = vld [vmem:[%s13386_s23] sm:$0xff]  ;;  %v10596_v6 = vld [vmem:[%s13370_s26 + $0xb8] sm:$0xff]  ;;  %v10595_v18 = vld [vmem:[%s13370_s26 + $0xb0] sm:$0xff] }
 0x63b   : > { %12000 = vmatprep.subr.mxu1 %v3040_v27  ;;  %12002 = vmatprep.mubr.msk.f32.mxu1 %vm1075_vm2, %v3966_v33  ;;  %12907 = vrcp.f32 %v3943_v12  ;;  %v12898_v3 = vpop.eup %12897  ;;  %v3970_v29 = vmul.f32 %v12896_v58, %v14253_v52 }
 0x63c   : > { %11994 = vmatpush3.msra.mxu0 %v3030_v57  ;;  %12001 = vmatpush3.msra.mxu1 %v3040_v27  ;;  %v12900_v36 = vpop.eup %12899  ;;  %v3969_v34 = vmul.f32 %v12898_v3, %v14234_v35  ;;  %v3070_v35 = vadd.f32 %v14135_v47, %v14281_v45  ;;  %v10617_v45 = vld [vmem:[%s13375_s11 + $0xa0] sm:$0xff]  ;;  %v10594_v27 = vld [vmem:[%s13370_s26 + $0xa8] sm:$0xff]  ;;  %v10592_v3 = vld [vmem:[%s13370_s26 + $0x98] sm:$0xff] }
 0x63d   : > { %11996 = vmatmul.mubr.msk.f32.vlgmr.msra.gmra.mxu0 %vm1075_vm2, %v3965_v53  ;;  %12003 = vmatmul.mubr.msk.f32.vlgmr.msra.gmra.mxu1 %vm1075_vm2, %v3967_v43  ;;  %v12902_v40 = vpop.eup %12901  ;;  %v3971_v52 = vmul.f32 %v12900_v36, %v14249_v9  ;;  %v10593_v53 = vld [vmem:[%s13370_s26 + $0xa0] sm:$0xff] }
 0x63e   : > { %12005 = vmatprep.subr.mxu0 %v3055_v63  ;;  %12012 = vmatprep.subr.mxu1 %v3065_v41  ;;  %v3972_v50 = vmul.f32 %v12902_v40, %v14257_v49  ;;  %v2613_v49 = vld [vmem:[%s13386_s23 + $0x8] sm:$0xff]  ;;  %v10589_v40 = vld [vmem:[%s13370_s26 + $0x80] sm:$0xff] }
 0x63f   : > { %12006 = vmatpush3.msra.mxu0 %v3055_v63  ;;  %12009 = vmatprep.mubr.msk.f32.mxu0 %vm1075_vm2, %v3968_v39  ;;  %v10590_v39 = vld [vmem:[%s13370_s26 + $0x88] sm:$0xff] }
 0x640   : > { %12013 = vmatpush3.msra.mxu1 %v3065_v41  ;;  %12007 = vmatprep.subr.mxu0 %v3050_v8  ;;  %v12904_v17 = vpop.eup %12903  ;;  %v10591_v41 = vld [vmem:[%s13370_s26 + $0x90] sm:$0xff] }
 0x641   : > { %12014 = vmatprep.subr.mxu1 %v3060_v2  ;;  %12016 = vmatprep.mubr.msk.f32.mxu1 %vm1075_vm2, %v3970_v29  ;;  %v3973_v9 = vmul.f32 %v12904_v17, %v14263_v7  ;;  %v10620_v7 = vld [vmem:[%s13375_s11 + $0xb8] sm:$0xff] }
 0x642   : > { %12008 = vmatpush3.msra.mxu0 %v3050_v8  ;;  %12015 = vmatpush3.msra.mxu1 %v3060_v2 }
 0x643   : > { %12010 = vmatmul.mubr.msk.f32.vlgmr.msra.gmra.mxu0 %vm1075_vm2, %v3969_v34  ;;  %12017 = vmatmul.mubr.msk.f32.vlgmr.msra.gmra.mxu1 %vm1075_vm2, %v3971_v52 }
 0x644   : > { %v12906_v16 = vpop.eup %12905  ;;  %12019 = vmatprep.subr.mxu0 %v3075_v23  ;;  %12026 = vmatprep.subr.mxu1 %v3085_v15 }
 0x645   : > { %12020 = vmatpush3.msra.mxu0 %v3075_v23  ;;  %12023 = vmatprep.mubr.msk.f32.mxu0 %vm1075_vm2, %v3972_v50  ;;  %v3974_v51 = vmul.f32 %v12906_v16, %v14267_v20  ;;  %v10619_v20 = vld [vmem:[%s13375_s11 + $0xb0] sm:$0xff] }
 0x646   : > { %12027 = vmatpush3.msra.mxu1 %v3085_v15  ;;  %12021 = vmatprep.subr.mxu0 %v3070_v35 }
 0x647   : > { %12028 = vmatprep.subr.mxu1 %v3080_v59  ;;  %12022 = vmatpush3.msra.mxu0 %v3070_v35 }
 0x648   : > { %v12908_v1 = vpop.eup %12907  ;;  %12029 = vmatpush3.msra.mxu1 %v3080_v59  ;;  %12024 = vmatmul.mubr.msk.f32.vlgmr.msra.gmra.mxu0 %vm1075_vm2, %v3973_v9 }
 0x649   : > { %12030 = vmatprep.mubr.msk.f32.mxu1 %vm1075_vm2, %v3974_v51  ;;  %v3975_v47 = vmul.f32 %v12908_v1, %v14271_v48  ;;  %12061 = vmatprep.subr.mxu1 %v2613_v49  ;;  %v10618_v48 = vld [vmem:[%s13375_s11 + $0xa8] sm:$0xff] }
 0x64b   : > { %12031 = vmatmul.mubr.msk.f32.vlgmr.msra.gmra.mxu1 %vm1075_vm2, %v3975_v47 }
 0x64c   : > { %12062 = vmatpush3.msra.mxu1 %v2613_v49  ;;  %12065 = vmatprep.mubr.msk.f32.mxu1 %vm1075_vm2, %v13991_v21  ;;  %v10615_v21 = vld [vmem:[%s13375_s11 + $0x90] sm:$0xff] }
 0x64d   : > { %12063 = vmatprep.subr.mxu1 %v2612_v61 }
 0x64e   : > { %12064 = vmatpush3.msra.mxu1 %v2612_v61 }
 0x64f   : > { %12066 = vmatmul.mubr.msk.f32.vlgmr.msra.gmra.mxu1 %vm1075_vm2, %v13987_v38  ;;  %12129 = vmatprep.subr.mxu1 %v10620_v7  ;;  %v10616_v38 = vld [vmem:[%s13375_s11 + $0x98] sm:$0xff] }
 0x650   : > { %12068 = vmatprep.mubr.msk.f32.mxu1 %vm1075_vm2, %v13985_v42  ;;  %12130 = vmatpush3.msra.mxu1 %v10620_v7  ;;  %v10614_v42 = vld [vmem:[%s13375_s11 + $0x88] sm:$0xff] }
 0x651   : > { %12131 = vmatprep.subr.mxu1 %v10619_v20 }
 0x652   : > { %12132 = vmatpush3.msra.mxu1 %v10619_v20 }
 0x653   : > { %12069 = vmatmul.mubr.msk.f32.gmra.mxu1 %vm1075_vm2, %v13983_v54  ;;  %12133 = vmatprep.subr.mxu1 %v10618_v48  ;;  %v10613_v54 = vld [vmem:[%s13375_s11 + $0x80] sm:$0xff] }
 0x654   : > { %12071 = vmatprep.mubr.msk.f32.mxu1 %vm1075_vm2, %v13999_v62  ;;  %12134 = vmatpush3.msra.mxu1 %v10618_v48  ;;  %v14401_v62 = vld [vmem:[#allocation2 + $0x20] sm:$0xff] }
 0x655   : > { %12135 = vmatprep.subr.mxu1 %v10617_v45 }
 0x656   : > { %12136 = vmatpush3.msra.mxu1 %v10617_v45 }
 0x657   : > { %12072 = vmatmul.mubr.msk.f32.gmra.mxu1 %vm1075_vm2, %v13995_v10  ;;  %12137 = vmatprep.subr.mxu1 %v10616_v38  ;;  %v14393_v10 = vld [vmem:[#allocation2 + $0x10] sm:$0xff] }
 0x658   : > { %12074 = vmatprep.mubr.msk.f32.mxu1 %vm1075_vm2, %v13993_v55  ;;  %12138 = vmatpush3.msra.mxu1 %v10616_v38  ;;  %v14389_v55 = vld [vmem:[#allocation2 + $0x8] sm:$0xff] }
 0x659   : > { %12139 = vmatprep.subr.mxu1 %v10615_v21 }
 0x65a   : > { %12140 = vmatpush3.msra.mxu1 %v10615_v21 }
 0x65b   : > { %12075 = vmatmul.mubr.msk.f32.gmra.mxu1 %vm1075_vm2, %v13989_v31  ;;  %12141 = vmatprep.subr.mxu1 %v10614_v42  ;;  %v14385_v31 = vld [vmem:[#allocation2] sm:$0xff] }
 0x65c   : > { %12077 = vmatprep.mubr.msk.f32.mxu1 %vm1075_vm2, %v14011_v25  ;;  %12142 = vmatpush3.msra.mxu1 %v10614_v42  ;;  %v14415_v25 = vld [vmem:[#allocation2 + $0x38] sm:$0xff] }
 0x65d   : > { %12143 = vmatprep.subr.mxu1 %v10613_v54 }
 0x65e   : > { %12144 = vmatpush3.msra.mxu1 %v10613_v54 }
 0x65f   : > { %12078 = vmatmul.mubr.msk.f32.gmra.mxu1 %vm1075_vm2, %v14005_v30  ;;  %v14410_v30 = vld [vmem:[#allocation2 + $0x30] sm:$0xff] }
 0x660   : > { %12080 = vmatprep.mubr.msk.f32.mxu1 %vm1075_vm2, %v14001_v5  ;;  %v10556_v5 = vld [vmem:[%s13386_s23 + $0x18] sm:$0xff] }
 0x661   : > { %12033 = vmatprep.subr.mxu0 %v10556_v5 }
 0x662   : > { %12034 = vmatpush3.msra.mxu0 %v10556_v5 }
 0x663   : > { %12081 = vmatmul.mubr.msk.f32.gmra.mxu1 %vm1075_vm2, %v13997_v24  ;;  %v14397_v24 = vld [vmem:[#allocation2 + $0x18] sm:$0xff] }
 0x664   : > { %12083 = vmatprep.mubr.msk.f32.mxu1 %vm1075_vm2, %v14020_v28  ;;  %v14423_v28 = vld [vmem:[#allocation2 + $0x48] sm:$0xff] }
 0x667   : > { %12084 = vmatmul.mubr.msk.f32.gmra.mxu1 %vm1075_vm2, %v14014_v26  ;;  %v14419_v26 = vld [vmem:[#allocation2 + $0x40] sm:$0xff] }
 0x668   : > { %12086 = vmatprep.mubr.msk.f32.mxu1 %vm1075_vm2, %v14009_v13  ;;  %v10555_v13 = vld [vmem:[%s13386_s23 + $0x10] sm:$0xff] }
 0x669   : > { %12035 = vmatprep.subr.mxu0 %v10555_v13 }
 0x66a   : > { %12036 = vmatpush3.msra.mxu0 %v10555_v13 }
 0x66b   : > { %12087 = vmatmul.mubr.msk.f32.gmra.mxu1 %vm1075_vm2, %v14003_v4  ;;  %v14406_v4 = vld [vmem:[#allocation2 + $0x28] sm:$0xff]  ;;  %12089 = vmatprep.subr.mxu0 %v10596_v6 }
 0x66c   : > { %12145 = vmatprep.mubr.msk.f32.mxu1 %vm567_vm1, %v14385_v31 }
 0x66f   : > { %12146 = vmatmul.mubr.msk.f32.vlgmr.msra.gmra.mxu1 %vm567_vm1, %v14389_v55 }
 0x670   : > { %12148 = vmatprep.mubr.msk.f32.mxu1 %vm567_vm1, %v14393_v10 }
 0x673   : > { %12149 = vmatmul.mubr.msk.f32.gmra.mxu1 %vm567_vm1, %v14397_v24 }
 0x674   : > { %12151 = vmatprep.mubr.msk.f32.mxu1 %vm567_vm1, %v14401_v62 }
 0x677   : > { %12152 = vmatmul.mubr.msk.f32.gmra.mxu1 %vm567_vm1, %v14406_v4 }
 0x678   : > { %12154 = vmatprep.mubr.msk.f32.mxu1 %vm567_vm1, %v14410_v30 }
 0x67b   : > { %12155 = vmatmul.mubr.msk.f32.gmra.mxu1 %vm567_vm1, %v14415_v25 }
 0x67c   : > { %12157 = vmatprep.mubr.msk.f32.mxu1 %vm567_vm1, %v14419_v26 }
 0x67f   : > { %12158 = vmatmul.mubr.msk.f32.gmra.mxu1 %vm567_vm1, %v14423_v28 }
 0x680   : > { %12160 = vmatprep.mubr.msk.f32.mxu1 %vm567_vm1, %v14427_v44 }
 0x683   : > { %12161 = vmatmul.mubr.msk.f32.gmra.mxu1 %vm567_vm1, %v14431_v11 }
 0x684   : > { %12163 = vmatprep.mubr.msk.f32.mxu1 %vm567_vm1, %v14435_v22 }
 0x687   : > { %12164 = vmatmul.mubr.msk.f32.gmra.mxu1 %vm567_vm1, %v14439_v37 }
 0x688   : > { %12166 = vmatprep.mubr.msk.f32.mxu1 %vm567_vm1, %v14443_v46 }
 0x68b   : > { %12167 = vmatmul.mubr.msk.f32.gmra.mxu1 %vm567_vm1, %v14448_v14 }
 0x6f7   : > { %v11983_v19 = vpop.f32.mrf.mxu0  ;;  %v11990_v33 = vpop.f32.mrf.mxu1 }
 0x6f9   : > { %v4048_v32 = vpop.f32.mrf.mxu0  ;;  %v4129_v57 = vpop.f32.mrf.mxu1 }
 0x6fa   : > { %12037 = vmatprep.mubr.msk.f32.mxu0 %vm1075_vm2, %v4048_v32  ;;  %v10643_v32 = vld [vmem:[%s13380_s27 + $0xb0] sm:$0xff] }
 0x6fb   : > { %12038 = vmatmul.mubr.msk.f32.vlgmr.msra.gmra.mxu0 %vm1075_vm2, %v11983_v19  ;;  %v10644_v19 = vld [vmem:[%s13380_s27 + $0xb8] sm:$0xff] }
 0x6fc   : > { %12040 = vmatprep.mubr.msk.f32.mxu0 %vm1075_vm2, %v4129_v57  ;;  %12090 = vmatpush3.msra.mxu0 %v10596_v6 }
 0x6fd   : > { %v11997_v58 = vpop.f32.mrf.mxu0  ;;  %v12004_v12 = vpop.f32.mrf.mxu1  ;;  %12091 = vmatprep.subr.mxu0 %v10595_v18 }
 0x6fe   : > { %12092 = vmatpush3.msra.mxu0 %v10595_v18 }
 0x6ff   : > { %v4210_v43 = vpop.f32.mrf.mxu0  ;;  %12041 = vmatmul.mubr.msk.f32.gmra.mxu0 %vm1075_vm2, %v11990_v33  ;;  %12093 = vmatprep.subr.mxu0 %v10594_v27  ;;  %v4291_v63 = vpop.f32.mrf.mxu1 }
 0x700   : > { %12043 = vmatprep.mubr.msk.f32.mxu0 %vm1075_vm2, %v4210_v43  ;;  %12094 = vmatpush3.msra.mxu0 %v10594_v27  ;;  %v10641_v27 = vld [vmem:[%s13380_s27 + $0xa0] sm:$0xff] }
 0x701   : > { %12095 = vmatprep.subr.mxu0 %v10593_v53 }
 0x702   : > { %12096 = vmatpush3.msra.mxu0 %v10593_v53  ;;  %v10639_v53 = vld [vmem:[%s13380_s27 + $0x90] sm:$0xff] }
 0x703   : > { %v12011_v36 = vpop.f32.mrf.mxu0  ;;  %12044 = vmatmul.mubr.msk.f32.gmra.mxu0 %vm1075_vm2, %v11997_v58  ;;  %12097 = vmatprep.subr.mxu0 %v10592_v3  ;;  %v12018_v29 = vpop.f32.mrf.mxu1 }
 0x704   : > { %12046 = vmatprep.mubr.msk.f32.mxu0 %vm1075_vm2, %v4291_v63  ;;  %12098 = vmatpush3.msra.mxu0 %v10592_v3  ;;  %v10638_v3 = vld [vmem:[%s13380_s27 + $0x88] sm:$0xff]  ;;  %v14564_v63 = vpop.permute.xlu1 %5179 }
 0x705   : > { %12099 = vmatprep.subr.mxu0 %v10591_v41  ;;  %v4372_v8 = vpop.f32.mrf.mxu0  ;;  %v4453_v2 = vpop.f32.mrf.mxu1 }
 0x706   : > { %12100 = vmatpush3.msra.mxu0 %v10591_v41  ;;  %v10637_v41 = vld [vmem:[%s13380_s27 + $0x80] sm:$0xff] }
 0x707   : > { %12047 = vmatmul.mubr.msk.f32.gmra.mxu0 %vm1075_vm2, %v12004_v12  ;;  %12101 = vmatprep.subr.mxu0 %v10590_v39  ;;  %v10640_v12 = vld [vmem:[%s13380_s27 + $0x98] sm:$0xff] }
 0x708   : > { %12049 = vmatprep.mubr.msk.f32.mxu0 %vm1075_vm2, %v4372_v8  ;;  %12102 = vmatpush3.msra.mxu0 %v10590_v39  ;;  %v12025_v17 = vpop.f32.mrf.mxu0 }
 0x709   : > { %12103 = vmatprep.subr.mxu0 %v10589_v40 }
 0x70a   : > { %12104 = vmatpush3.msra.mxu0 %v10589_v40  ;;  %v4534_v50 = vpop.f32.mrf.mxu0 }
 0x70b   : > { %v12032_v34 = vpop.f32.mrf.mxu1  ;;  %12050 = vmatmul.mubr.msk.f32.gmra.mxu0 %vm1075_vm2, %v12011_v36  ;;  %12169 = vmatprep.subr.mxu0 %v10644_v19 }
 0x70c   : > { %12052 = vmatprep.mubr.msk.f32.mxu0 %vm1075_vm2, %v4453_v2 }
 0x70d   : > { %v4615_v52 = vpop.f32.mrf.mxu1 }
 0x70f   : > { %12053 = vmatmul.mubr.msk.f32.gmra.mxu0 %vm1075_vm2, %v12018_v29  ;;  %v14475_v23 = vpop.f32.mrf.mxu1 }
 0x710   : > { %12055 = vmatprep.mubr.msk.f32.mxu0 %vm1075_vm2, %v4534_v50 }
 0x711   : > { %v14478_v15 = vpop.f32.mrf.mxu1 }
 0x712   : > { %16120 = vst [vmem:[#allocation16_spill] sm:$0xff] %v14478_v15 }
 0x713   : > { %12056 = vmatmul.mubr.msk.f32.gmra.mxu0 %vm1075_vm2, %v12025_v17  ;;  %v14481_v16 = vpop.f32.mrf.mxu1 }
 0x714   : > { %12058 = vmatprep.mubr.msk.f32.mxu0 %vm1075_vm2, %v4615_v52 }
 0x715   : > { %v14484_v35 = vpop.f32.mrf.mxu1 }
 0x716   : > { %16121 = vst [vmem:[#allocation17_spill] sm:$0xff] %v14484_v35 }
 0x717   : > { %12059 = vmatmul.mubr.msk.f32.gmra.mxu0 %vm1075_vm2, %v12032_v34  ;;  %v14487_v9 = vpop.f32.mrf.mxu1 }
 0x718   : > { %12105 = vmatprep.mubr.msk.f32.mxu0 %vm567_vm1, %v14385_v31 }
 0x719   : > { %v14491_v59 = vpop.f32.mrf.mxu1 }
 0x71a   : > { %16122 = vst [vmem:[#allocation18_spill] sm:$0xff] %v14491_v59 }
 0x71b   : > { %v14493_v51 = vpop.f32.mrf.mxu1  ;;  %12106 = vmatmul.mubr.msk.f32.vlgmr.msra.gmra.mxu0 %vm567_vm1, %v14389_v55 }
 0x71c   : > { %12108 = vmatprep.mubr.msk.f32.mxu0 %vm567_vm1, %v14393_v10  ;;  %12170 = vmatpush3.msra.mxu0 %v10644_v19 }
 0x71d   : > { %v14499_v49 = vpop.f32.mrf.mxu1  ;;  %12171 = vmatprep.subr.mxu0 %v10643_v32 }
 0x71e   : > { %16123 = vst [vmem:[#allocation19_spill] sm:$0xff] %v14499_v49  ;;  %12172 = vmatpush3.msra.mxu0 %v10643_v32 }
 0x71f   : > { %v14501_v1 = vpop.f32.mrf.mxu1  ;;  %12109 = vmatmul.mubr.msk.f32.gmra.mxu0 %vm567_vm1, %v14397_v24 }
 0x720   : > { %12111 = vmatprep.mubr.msk.f32.mxu0 %vm567_vm1, %v14401_v62 }
 0x721   : > { %v14507_v47 = vpop.f32.mrf.mxu1 }
 0x722   : > { %16124 = vst [vmem:[#allocation20_spill] sm:$0xff] %v14507_v47 }
 0x723   : > { %v14509_v61 = vpop.f32.mrf.mxu1  ;;  %12112 = vmatmul.mubr.msk.f32.gmra.mxu0 %vm567_vm1, %v14406_v4 }
 0x724   : > { %12114 = vmatprep.mubr.msk.f32.mxu0 %vm567_vm1, %v14410_v30 }
 0x725   : > { %v14515_v7 = vpop.f32.mrf.mxu1 }
 0x726   : > { %16125 = vst [vmem:[#allocation21_spill] sm:$0xff] %v14515_v7 }
 0x727   : > { %v14517_v20 = vpop.f32.mrf.mxu1  ;;  %12115 = vmatmul.mubr.msk.f32.gmra.mxu0 %vm567_vm1, %v14415_v25 }
 0x728   : > { %12117 = vmatprep.mubr.msk.f32.mxu0 %vm567_vm1, %v14419_v26 }
 0x729   : > { %v14523_v48 = vpop.f32.mrf.mxu1 }
 0x72a   : > { %16126 = vst [vmem:[#allocation22_spill] sm:$0xff] %v14523_v48 }
 0x72b   : > { %12118 = vmatmul.mubr.msk.f32.gmra.mxu0 %vm567_vm1, %v14423_v28  ;;  %v14529_v45 = vpop.f32.mrf.mxu1 }
 0x72c   : > { %12120 = vmatprep.mubr.msk.f32.mxu0 %vm567_vm1, %v14427_v44 }
 0x72d   : > { %v14535_v38 = vpop.f32.mrf.mxu1 }
 0x72e   : > { %16127 = vst [vmem:[#allocation23_spill] sm:$0xff] %v14535_v38 }
 0x72f   : > { %12121 = vmatmul.mubr.msk.f32.gmra.mxu0 %vm567_vm1, %v14431_v11  ;;  %v12147_v21 = vpop.f32.mrf.mxu1 }
 0x730   : > { %12123 = vmatprep.mubr.msk.f32.mxu0 %vm567_vm1, %v14435_v22  ;;  %v5254_v39 = vadd.f32 %v12147_v21, %v14564_v63  ;;  %v14650_v21 = vpop.permute.xlu0 %5022 }
 0x731   : > { %v5248_v42 = vpop.f32.mrf.mxu1 }
 0x732   : > { %12209 = vmatprep.subr.msk.mxu1 %vm1075_vm2, %v5254_v39  ;;  %v5249_v8 = vadd.f32 %v5248_v42, %v14564_v63 }
 0x733   : > { %12124 = vmatmul.mubr.msk.f32.gmra.mxu0 %vm567_vm1, %v14439_v37  ;;  %v12150_v54 = vpop.f32.mrf.mxu1  ;;  %12210 = vmatpush3.xpose.msk.msra.mxu1 %vm1075_vm2, %v5254_v39 }
 0x734   : > { %12126 = vmatprep.mubr.msk.f32.mxu0 %vm567_vm1, %v14443_v46  ;;  %12211 = vmatprep.subr.msk.mxu1 %vm1075_vm2, %v5249_v8 }
 0x735   : > { %v14545_v5 = vpop.f32.mrf.mxu1 }
 0x737   : > { %12127 = vmatmul.mubr.msk.f32.gmra.mxu0 %vm567_vm1, %v14448_v14  ;;  %v14547_v13 = vpop.f32.mrf.mxu1  ;;  %12212 = vmatpush3.xpose.msk.msra.mxu1 %vm1075_vm2, %v5249_v8 }
 0x738   : > { %12185 = vmatprep.mubr.msk.f32.mxu0 %vm567_vm1, %v14385_v31  ;;  %v10642_v31 = vld [vmem:[%s13380_s27 + $0xa8] sm:$0xff] }
 0x739   : > { %v14549_v6 = vpop.f32.mrf.mxu1  ;;  %12173 = vmatprep.subr.mxu0 %v10642_v31 }
 0x73a   : > { %12174 = vmatpush3.msra.mxu0 %v10642_v31 }
 0x73b   : > { %v14552_v33 = vpop.f32.mrf.mxu1  ;;  %12175 = vmatprep.subr.mxu0 %v10641_v27 }
 0x73c   : > { %12176 = vmatpush3.msra.mxu0 %v10641_v27  ;;  %v5284_v8 = vadd.f32 %v14552_v33, %v14564_v63 }
 0x73d   : > { %v14555_v57 = vpop.f32.mrf.mxu1  ;;  %12177 = vmatprep.subr.mxu0 %v10640_v12 }
 0x73e   : > { %12178 = vmatpush3.msra.mxu0 %v10640_v12  ;;  %v5279_v33 = vadd.f32 %v14555_v57, %v14564_v63 }
 0x73f   : > { %v12159_v18 = vpop.f32.mrf.mxu1  ;;  %12179 = vmatprep.subr.mxu0 %v10639_v53 }
 0x740   : > { %12180 = vmatpush3.msra.mxu0 %v10639_v53  ;;  %v5294_v29 = vadd.f32 %v12159_v18, %v14564_v63  ;;  %v5259_v18 = vadd.f32 %v14545_v5, %v14564_v63  ;;  %v5274_v53 = vadd.f32 %v14547_v13, %v14564_v63 }
 0x741   : > { %v5288_v58 = vpop.f32.mrf.mxu1  ;;  %12181 = vmatprep.subr.mxu0 %v10638_v3 }
 0x742   : > { %12182 = vmatpush3.msra.mxu0 %v10638_v3  ;;  %v5289_v2 = vadd.f32 %v5288_v58, %v14564_v63 }
 0x743   : > { %v14561_v43 = vpop.f32.mrf.mxu1  ;;  %12183 = vmatprep.subr.mxu0 %v10637_v41 }
 0x744   : > { %12184 = vmatpush3.msra.mxu0 %v10637_v41 }
 0x745   : > { %v14567_v36 = vpop.f32.mrf.mxu1  ;;  %12186 = vmatmul.mubr.msk.f32.vlgmr.msra.gmra.mxu0 %vm567_vm1, %v14389_v55  ;;  %12237 = vmatprep.subr.msk.mxu0 %vm1075_vm2, %v5294_v29  ;;  %v5264_v55 = vadd.f32 %v12150_v54, %v14564_v63 }
 0x746   : > { %12238 = vmatpush3.xpose.msk.msra.mxu0 %vm1075_vm2, %v5294_v29  ;;  %12188 = vmatprep.mubr.msk.f32.mxu0 %vm567_vm1, %v14393_v10  ;;  %v5269_v29 = vadd.f32 %v14549_v6, %v14564_v63 }
 0x747   : > { %v12165_v40 = vpop.f32.mrf.mxu1  ;;  %12239 = vmatprep.subr.msk.mxu0 %vm1075_vm2, %v5289_v2  ;;  %12216 = vmatprep.subr.msk.mxu1 %vm1075_vm2, %v5264_v55 }
 0x748   : > { %v14582_v17 = vadd.f32 %v12165_v40, %v14564_v63 }
 0x749   : > { %12189 = vmatmul.mubr.msk.f32.gmra.mxu0 %vm567_vm1, %v14397_v24 }
 0x74a   : > { %12240 = vmatpush3.xpose.msk.msra.mxu0 %vm1075_vm2, %v5289_v2  ;;  %12191 = vmatprep.mubr.msk.f32.mxu0 %vm567_vm1, %v14401_v62 }
 0x74b   : > { %12251 = vmatprep.subr.msk.mxu0 %vm1075_vm2, %v14582_v17 }
 0x74d   : > { %12192 = vmatmul.mubr.msk.f32.gmra.mxu0 %vm567_vm1, %v14406_v4 }
 0x74e   : > { %12194 = vmatprep.mubr.msk.f32.mxu0 %vm567_vm1, %v14410_v30 }
 0x751   : > { %12195 = vmatmul.mubr.msk.f32.gmra.mxu0 %vm567_vm1, %v14415_v25 }
 0x752   : > { %12197 = vmatprep.mubr.msk.f32.mxu0 %vm567_vm1, %v14419_v26 }
 0x755   : > { %12198 = vmatmul.mubr.msk.f32.gmra.mxu0 %vm567_vm1, %v14423_v28 }
 0x756   : > { %12200 = vmatprep.mubr.msk.f32.mxu0 %vm567_vm1, %v14427_v44 }
 0x759   : > { %12201 = vmatmul.mubr.msk.f32.gmra.mxu0 %vm567_vm1, %v14431_v11 }
 0x75a   : > { %12203 = vmatprep.mubr.msk.f32.mxu0 %vm567_vm1, %v14435_v22 }
 0x75d   : > { %12204 = vmatmul.mubr.msk.f32.gmra.mxu0 %vm567_vm1, %v14439_v37 }
 0x75e   : > { %12206 = vmatprep.mubr.msk.f32.mxu0 %vm567_vm1, %v14443_v46 }
 0x761   : > { %12207 = vmatmul.mubr.msk.f32.gmra.mxu0 %vm567_vm1, %v14448_v14 }
 0x7bb   : > { %v14618_v10 = vpop.f32.mrf.mxu0 }
 0x7bd   : > { %v14620_v24 = vpop.f32.mrf.mxu0 }
 0x7be   : > { %16128 = vst [vmem:[#allocation24_spill] sm:$0xff] %v14620_v24 }
 0x7bf   : > { %v14622_v62 = vpop.f32.mrf.mxu0 }
 0x7c1   : > { %v14624_v4 = vpop.f32.mrf.mxu0 }
 0x7c2   : > { %16129 = vst [vmem:[#allocation25_spill] sm:$0xff] %v14624_v4 }
 0x7c3   : > { %v14626_v30 = vpop.f32.mrf.mxu0 }
 0x7c5   : > { %v14628_v25 = vpop.f32.mrf.mxu0 }
 0x7c6   : > { %16130 = vst [vmem:[#allocation26_spill] sm:$0xff] %v14628_v25 }
 0x7c7   : > { %v14630_v26 = vpop.f32.mrf.mxu0 }
 0x7c9   : > { %v14632_v28 = vpop.f32.mrf.mxu0 }
 0x7ca   : > { %16131 = vst [vmem:[#allocation27_spill] sm:$0xff] %v14632_v28 }
 0x7cb   : > { %v14634_v44 = vpop.f32.mrf.mxu0 }
 0x7cd   : > { %v14636_v11 = vpop.f32.mrf.mxu0 }
 0x7ce   : > { %16132 = vst [vmem:[#allocation28_spill] sm:$0xff] %v14636_v11 }
 0x7cf   : > { %v14638_v22 = vpop.f32.mrf.mxu0 }
 0x7d1   : > { %v14640_v37 = vpop.f32.mrf.mxu0 }
 0x7d2   : > { %16133 = vst [vmem:[#allocation29_spill] sm:$0xff] %v14640_v37 }
 0x7d3   : > { %v14642_v46 = vpop.f32.mrf.mxu0 }
 0x7d5   : > { %v14644_v14 = vpop.f32.mrf.mxu0 }
 0x7d6   : > { %16134 = vst [vmem:[#allocation30_spill] sm:$0xff] %v14644_v14 }
 0x7d7   : > { %v14646_v34 = vpop.f32.mrf.mxu0 }
 0x7d9   : > { %v14648_v52 = vpop.f32.mrf.mxu0 }
 0x7da   : > { %16135 = vst [vmem:[#allocation31_spill] sm:$0xff] %v14648_v52 }
 0x7db   : > { %v12107_v50 = vpop.f32.mrf.mxu0 }
 0x7dc   : > { %v5097_v32 = vadd.f32 %v12107_v50, %v14650_v21 }
 0x7dd   : > { %v5091_v42 = vpop.f32.mrf.mxu0 }
 0x7de   : > { %v5092_v54 = vadd.f32 %v5091_v42, %v14650_v21 }
 0x7df   : > { %v12110_v19 = vpop.f32.mrf.mxu0 }
 0x7e0   : > { %12213 = vmatprep.mubr.msk.f32.mxu1 %vm1075_vm2, %v5092_v54  ;;  %v5107_v41 = vadd.f32 %v12110_v19, %v14650_v21  ;;  %v5308_v54 = vpop.f32.mrf.mxu1 }
 0x7e1   : > { %v5101_v31 = vpop.f32.mrf.mxu0  ;;  %12214 = vmatmul.mubr.msk.f32.vlgmr.msra.gmra.mxu1 %vm1075_vm2, %v5097_v32  ;;  %v5309_v32 = vadd.f32 %v5308_v54, %v14564_v63 }
 0x7e2   : > { %v5102_v27 = vadd.f32 %v5101_v31, %v14650_v21  ;;  %12217 = vmatpush3.xpose.msk.msra.mxu1 %vm1075_vm2, %v5264_v55 }
 0x7e3   : > { %12218 = vmatprep.subr.msk.mxu1 %vm1075_vm2, %v5259_v18  ;;  %v12113_v58 = vpop.f32.mrf.mxu0 }
 0x7e4   : > { %12220 = vmatprep.mubr.msk.f32.mxu1 %vm1075_vm2, %v5102_v27  ;;  %v5117_v55 = vadd.f32 %v12113_v58, %v14650_v21  ;;  %v5304_v27 = vadd.f32 %v14561_v43, %v14564_v63  ;;  %v5299_v43 = vadd.f32 %v14567_v36, %v14564_v63 }
 0x7e5   : > { %v5111_v12 = vpop.f32.mrf.mxu0 }
 0x7e6   : > { %v5112_v3 = vadd.f32 %v5111_v12, %v14650_v21  ;;  %12219 = vmatpush3.xpose.msk.msra.mxu1 %vm1075_vm2, %v5259_v18 }
 0x7e7   : > { %12223 = vmatprep.subr.msk.mxu1 %vm1075_vm2, %v5274_v53  ;;  %v12116_v5 = vpop.f32.mrf.mxu0 }
 0x7e8   : > { %v5127_v58 = vadd.f32 %v12116_v5, %v14650_v21 }
 0x7e9   : > { %12221 = vmatmul.mubr.msk.f32.vlgmr.msra.gmra.mxu1 %vm1075_vm2, %v5107_v41  ;;  %v5121_v39 = vpop.f32.mrf.mxu0 }
 0x7ea   : > { %12224 = vmatpush3.xpose.msk.msra.mxu1 %vm1075_vm2, %v5274_v53  ;;  %12227 = vmatprep.mubr.msk.f32.mxu1 %vm1075_vm2, %v5112_v3  ;;  %v5122_v42 = vadd.f32 %v5121_v39, %v14650_v21  ;;  %v12168_v3 = vpop.f32.mrf.mxu1 }
 0x7eb   : > { %12225 = vmatprep.subr.msk.mxu1 %vm1075_vm2, %v5269_v29  ;;  %v12119_v13 = vpop.f32.mrf.mxu0  ;;  %v5324_v41 = vadd.f32 %v12168_v3, %v14564_v63 }
 0x7ec   : > { %v5137_v50 = vadd.f32 %v12119_v13, %v14650_v21  ;;  %v5318_v39 = vpop.f32.mrf.mxu1 }
 0x7ed   : > { %v5131_v40 = vpop.f32.mrf.mxu0  ;;  %v5319_v13 = vadd.f32 %v5318_v39, %v14564_v63 }
 0x7ee   : > { %v5132_v2 = vadd.f32 %v5131_v40, %v14650_v21  ;;  %12226 = vmatpush3.xpose.msk.msra.mxu1 %vm1075_vm2, %v5269_v29 }
 0x7ef   : > { %12230 = vmatprep.subr.msk.mxu1 %vm1075_vm2, %v5284_v8  ;;  %v12122_v6 = vpop.f32.mrf.mxu0 }
 0x7f0   : > { %12241 = vmatprep.mubr.msk.f32.mxu0 %vm1075_vm2, %v5132_v2  ;;  %v5147_v29 = vadd.f32 %v12122_v6, %v14650_v21 }
 0x7f1   : > { %12228 = vmatmul.mubr.msk.f32.vlgmr.msra.gmra.mxu1 %vm1075_vm2, %v5117_v55  ;;  %v5141_v19 = vpop.f32.mrf.mxu0  ;;  %12242 = vmatmul.mubr.msk.f32.vlgmr.msra.gmra.mxu0 %vm1075_vm2, %v5137_v50 }
 0x7f2   : > { %12231 = vmatpush3.xpose.msk.msra.mxu1 %vm1075_vm2, %v5284_v8  ;;  %12234 = vmatprep.mubr.msk.f32.mxu1 %vm1075_vm2, %v5122_v42 }
 0x7f3   : > { %12252 = vmatpush3.xpose.msk.msra.mxu0 %vm1075_vm2, %v14582_v17  ;;  %12232 = vmatprep.subr.msk.mxu1 %vm1075_vm2, %v5279_v33  ;;  %v12125_v31 = vpop.f32.mrf.mxu0  ;;  %v5142_v17 = vadd.f32 %v5141_v19, %v14650_v21 }
 0x7f4   : > { %12253 = vmatprep.subr.msk.mxu0 %vm1075_vm2, %v5309_v32  ;;  %v5157_v12 = vadd.f32 %v12125_v31, %v14650_v21 }
 0x7f5   : > { %v5151_v18 = vpop.f32.mrf.mxu0 }
 0x7f6   : > { %v5152_v57 = vadd.f32 %v5151_v18, %v14650_v21  ;;  %12233 = vmatpush3.xpose.msk.msra.mxu1 %vm1075_vm2, %v5279_v33 }
 0x7f7   : > { %12254 = vmatpush3.xpose.msk.msra.mxu0 %vm1075_vm2, %v5309_v32  ;;  %12244 = vmatprep.subr.msk.mxu1 %vm1075_vm2, %v5304_v27  ;;  %v12128_v53 = vpop.f32.mrf.mxu0 }
 0x7f8   : > { %12255 = vmatprep.mubr.msk.f32.mxu0 %vm1075_vm2, %v5152_v57  ;;  %v5167_v40 = vadd.f32 %v12128_v53, %v14650_v21 }
 0x7f9   : > { %12235 = vmatmul.mubr.msk.f32.vlgmr.msra.gmra.mxu1 %vm1075_vm2, %v5127_v58  ;;  %v5161_v5 = vpop.f32.mrf.mxu0 }
 0x7fa   : > { %12245 = vmatpush3.xpose.msk.msra.mxu1 %vm1075_vm2, %v5304_v27  ;;  %12248 = vmatprep.mubr.msk.f32.mxu1 %vm1075_vm2, %v5142_v17  ;;  %v5162_v36 = vadd.f32 %v5161_v5, %v14650_v21 }
 0x7fb   : > { %12256 = vmatmul.mubr.msk.f32.vlgmr.msra.gmra.mxu0 %vm1075_vm2, %v5157_v12  ;;  %12246 = vmatprep.subr.msk.mxu1 %vm1075_vm2, %v5299_v43 }
 0x7fe   : > { %12247 = vmatpush3.xpose.msk.msra.mxu1 %vm1075_vm2, %v5299_v43 }
 0x7ff   : > { %12258 = vmatprep.subr.msk.mxu1 %vm1075_vm2, %v5324_v41 }
 0x801   : > { %12249 = vmatmul.mubr.msk.f32.vlgmr.msra.gmra.mxu1 %vm1075_vm2, %v5147_v29 }
 0x802   : > { %12259 = vmatpush3.xpose.msk.msra.mxu1 %vm1075_vm2, %v5324_v41  ;;  %12262 = vmatprep.mubr.msk.f32.mxu1 %vm1075_vm2, %v5162_v36 }
 0x803   : > { %12260 = vmatprep.subr.msk.mxu1 %vm1075_vm2, %v5319_v13 }
 0x805   : > { %v14724_v8 = vpop.f32.mrf.mxu0 }
 0x806   : > { %12261 = vmatpush3.xpose.msk.msra.mxu1 %vm1075_vm2, %v5319_v13 }
 0x807   : > { %v14726_v2 = vpop.f32.mrf.mxu0 }
 0x809   : > { %12263 = vmatmul.mubr.msk.f32.vlgmr.msra.gmra.mxu1 %vm1075_vm2, %v5167_v40  ;;  %v14728_v55 = vpop.f32.mrf.mxu0 }
 0x80b   : > { %v14730_v63 = vpop.f32.mrf.mxu0 }
 0x80d   : > { %v14732_v50 = vpop.f32.mrf.mxu0 }
 0x80f   : > { %v14734_v6 = vpop.f32.mrf.mxu0 }
 0x811   : > { %v14736_v42 = vpop.f32.mrf.mxu0 }
 0x813   : > { %v14738_v54 = vpop.f32.mrf.mxu0 }
 0x815   : > { %v14740_v19 = vpop.f32.mrf.mxu0 }
 0x817   : > { %v14742_v21 = vpop.f32.mrf.mxu0 }
 0x819   : > { %v14744_v33 = vpop.f32.mrf.mxu0 }
 0x81b   : > { %v14748_v27 = vpop.f32.mrf.mxu0 }
 0x81d   : > { %v14756_v12 = vpop.f32.mrf.mxu0 }
 0x81f   : > { %v14760_v41 = vpop.f32.mrf.mxu0 }
 0x821   : > { %v14766_v29 = vpop.f32.mrf.mxu0 }
 0x823   : > { %v14770_v40 = vpop.f32.mrf.mxu0 }
 0x8a1   : > { %v12215_v32 = vpop.f32.mrf.mxu1 }
 0x8a2   : > { %v14746_v31 = vmul.f32 0.25, %v12215_v32 }
 0x8a3   : > { %v5562_v18 = vpop.f32.mrf.mxu1 }
 0x8a4   : > { %v14750_v57 = vmul.f32 0.25, %v5562_v18  ;;  %v6199_v58 = vsel %vm1075_vm2, %v14746_v31, -inf }
 0x8a5   : > { %6200 = vmax.xlane.f32.xlu1 %v6199_v58 }
 0x8a6   : > { %v6196_v17 = vsel %vm1075_vm2, %v14750_v57, -inf }
 0x8a7   : > { %6197 = vmax.xlane.f32.xlu0 %v6196_v17 }
 0x8a9   : > { %v12222_v53 = vpop.f32.mrf.mxu1 }
 0x8aa   : > { %v14758_v43 = vmul.f32 0.25, %v12222_v53 }
 0x8ab   : > { %v5649_v3 = vpop.f32.mrf.mxu1 }
 0x8ac   : > { %v14762_v5 = vmul.f32 0.25, %v5649_v3  ;;  %v6205_v39 = vsel %vm1075_vm2, %v14758_v43, -inf }
 0x8ad   : > { %6206 = vmax.xlane.f32.xlu0 %v6205_v39 }
 0x8ae   : > { %v6202_v36 = vsel %vm1075_vm2, %v14762_v5, -inf }
 0x8b1   : > { %6203 = vmax.xlane.f32.xlu0 %v6202_v36  ;;  %v12229_v13 = vpop.f32.mrf.mxu1  ;;  %v12243_v53 = vpop.f32.mrf.mxu0 }
 0x8b2   : > { %v14774_v58 = vmul.f32 0.25, %v12229_v13 }
 0x8b3   : > { %v5736_v32 = vpop.f32.mrf.mxu1  ;;  %v5910_v36 = vpop.f32.mrf.mxu0 }
 0x8b4   : > { %v14772_v18 = vmul.f32 0.25, %v5736_v32  ;;  %v6211_v48 = vsel %vm1075_vm2, %v14774_v58, -inf  ;;  %v14784_v32 = vmul.f32 0.25, %v12243_v53  ;;  %v14786_v13 = vmul.f32 0.25, %v5910_v36 }
 0x8b6   : > { %v6208_v17 = vsel %vm1075_vm2, %v14772_v18, -inf }
 0x8b7   : > { %6209 = vmax.xlane.f32.xlu0 %v6208_v17 }
 0x8b9   : > { %v12236_v3 = vpop.f32.mrf.mxu1 }
 0x8ba   : > { %v14778_v39 = vmul.f32 0.25, %v12236_v3 }
 0x8bb   : > { %6212 = vmax.xlane.f32.xlu0 %v6211_v48  ;;  %v5823_v14 = vpop.f32.mrf.mxu1  ;;  %v12257_v3 = vpop.f32.mrf.mxu0  ;;  %v6223_v48 = vsel %vm1075_vm2, %v14784_v32, -inf }
 0x8bc   : > { %v14782_v7 = vmul.f32 0.25, %v5823_v14  ;;  %v6217_v37 = vsel %vm1075_vm2, %v14778_v39, -inf  ;;  %v6220_v14 = vsel %vm1075_vm2, %v14786_v13, -inf  ;;  %v14800_v28 = vmul.f32 0.25, %v12257_v3 }
 0x8bd   : > { %v6084_v53 = vpop.f32.mrf.mxu0 }
 0x8be   : > { %v6214_v17 = vsel %vm1075_vm2, %v14782_v7, -inf  ;;  %v14802_v59 = vmul.f32 0.25, %v6084_v53 }
 0x8bf   : > { %6218 = vmax.xlane.f32.xlu0 %v6217_v37  ;;  %6215 = vmax.xlane.f32.xlu1 %v6214_v17 }
 0x8c0   : > { %v6232_v3 = vsel %vm1075_vm2, %v14802_v59, -inf }
 0x8c1   : > { %v12250_v47 = vpop.f32.mrf.mxu1 }
 0x8c2   : > { %v14792_v11 = vmul.f32 0.25, %v12250_v47 }
 0x8c3   : > { %6224 = vmax.xlane.f32.xlu0 %v6223_v48  ;;  %6221 = vmax.xlane.f32.xlu1 %v6220_v14  ;;  %v5997_v36 = vpop.f32.mrf.mxu1  ;;  %v6235_v48 = vsel %vm1075_vm2, %v14800_v28, -inf }
 0x8c4   : > { %v14798_v49 = vmul.f32 0.25, %v5997_v36  ;;  %v6229_v47 = vsel %vm1075_vm2, %v14792_v11, -inf }
 0x8c6   : > { %v6226_v37 = vsel %vm1075_vm2, %v14798_v49, -inf }
 0x8c7   : > { %6230 = vmax.xlane.f32.xlu0 %v6229_v47  ;;  %6227 = vmax.xlane.f32.xlu1 %v6226_v37 }
 0x8c9   : > { %v12264_v17 = vpop.f32.mrf.mxu1 }
 0x8ca   : > { %v14808_v25 = vmul.f32 0.25, %v12264_v17 }
 0x8cb   : > { %6236 = vmax.xlane.f32.xlu0 %v6235_v48  ;;  %6233 = vmax.xlane.f32.xlu1 %v6232_v3  ;;  %v6171_v14 = vpop.f32.mrf.mxu1 }
 0x8cc   : > { %v14814_v53 = vmul.f32 0.25, %v6171_v14  ;;  %v6241_v36 = vsel %vm1075_vm2, %v14808_v25, -inf }
 0x8ce   : > { %v6238_v47 = vsel %vm1075_vm2, %v14814_v53, -inf }
 0x8cf   : > { %6242 = vmax.xlane.f32.xlu0 %v6241_v36  ;;  %6239 = vmax.xlane.f32.xlu1 %v6238_v47 }
 0x92e   : > { %v6201_v37 = vpop.xlane.xlu1 %6200 }
 0x92f   : > { %v6245_v17 = vsub.f32 %v14746_v31, %v6201_v37 }
 0x930   : > { %v6198_v35 = vpop.xlane.xlu0 %6197 }
 0x931   : > { %v6262_v4 = vmul.f32 1.442695, %v6245_v17  ;;  %v6244_v15 = vsub.f32 %v14750_v57, %v6198_v35 }
 0x933   : > { %12909 = vpow2.f32 %v6262_v4  ;;  %v6260_v48 = vmul.f32 1.442695, %v6244_v15 }
 0x935   : > { %12911 = vpow2.f32 %v6260_v48 }
 0x936   : > { %v6207_v3 = vpop.xlane.xlu0 %6206 }
 0x937   : > { %v6247_v14 = vsub.f32 %v14758_v43, %v6207_v3 }
 0x939   : > { %v6266_v24 = vmul.f32 1.442695, %v6247_v14 }
 0x93a   : > { %v6204_v38 = vpop.xlane.xlu0 %6203 }
 0x93b   : > { %12913 = vpow2.f32 %v6266_v24  ;;  %v6246_v52 = vsub.f32 %v14762_v5, %v6204_v38 }
 0x93d   : > { %v6264_v36 = vmul.f32 1.442695, %v6246_v52 }
 0x93f   : > { %12915 = vpow2.f32 %v6264_v36 }
 0x940   : > { %v14824_v47 = vpop.eup %12909  ;;  %v6210_v31 = vpop.xlane.xlu0 %6209 }
 0x941   : > { %v6248_v37 = vsub.f32 %v14772_v18, %v6210_v31  ;;  %v6295_v35 = vsel %vm1075_vm2, %v14824_v47, 0.0 }
 0x942   : > { %v14829_v15 = vpop.eup %12911  ;;  %6296 = vadd.xlane.f32.xlu0 %v6295_v35 }
 0x943   : > { %v6268_v4 = vmul.f32 1.442695, %v6248_v37  ;;  %v6292_v57 = vsel %vm1075_vm2, %v14829_v15, 0.0 }
 0x944   : > { %v6213_v24 = vpop.xlane.xlu0 %6212  ;;  %6293 = vadd.xlane.f32.xlu1 %v6292_v57 }
 0x945   : > { %12917 = vpow2.f32 %v6268_v4  ;;  %v6249_v38 = vsub.f32 %v14774_v58, %v6213_v24 }
 0x947   : > { %v6270_v52 = vmul.f32 1.442695, %v6249_v38 }
 0x948   : > { %v14834_v43 = vpop.eup %12913  ;;  %v6219_v5 = vpop.xlane.xlu0 %6218 }
 0x949   : > { %v6216_v18 = vpop.xlane.xlu1 %6215  ;;  %12919 = vpow2.f32 %v6270_v52  ;;  %v6301_v17 = vsel %vm1075_vm2, %v14834_v43, 0.0  ;;  %v6251_v48 = vsub.f32 %v14778_v39, %v6219_v5 }
 0x94a   : > { %6302 = vadd.xlane.f32.xlu0 %v6301_v17  ;;  %v6250_v14 = vsub.f32 %v14782_v7, %v6216_v18 }
 0x94b   : > { %v6274_v4 = vmul.f32 1.442695, %v6251_v48 }
 0x94c   : > { %v14839_v3 = vpop.eup %12915  ;;  %v6225_v36 = vpop.xlane.xlu0 %6224  ;;  %v6272_v38 = vmul.f32 1.442695, %v6250_v14 }
 0x94d   : > { %v6222_v31 = vpop.xlane.xlu1 %6221  ;;  %v6253_v58 = vsub.f32 %v14784_v32, %v6225_v36  ;;  %v6298_v35 = vsel %vm1075_vm2, %v14839_v3, 0.0 }
 0x94e   : > { %v6252_v37 = vsub.f32 %v14786_v13, %v6222_v31  ;;  %6299 = vadd.xlane.f32.xlu1 %v6298_v35 }
 0x94f   : > { %v6278_v57 = vmul.f32 1.442695, %v6253_v58 }
 0x950   : > { %v6276_v24 = vmul.f32 1.442695, %v6252_v37  ;;  %v6231_v52 = vpop.xlane.xlu0 %6230 }
 0x951   : > { %v6228_v39 = vpop.xlane.xlu1 %6227  ;;  %12921 = vpow2.f32 %v6278_v57  ;;  %v6255_v5 = vsub.f32 %v14792_v11, %v6231_v52 }
 0x952   : > { %v6254_v7 = vsub.f32 %v14798_v49, %v6228_v39  ;;  %v14848_v18 = vpop.eup %12917  ;;  %12923 = vpow2.f32 %v6276_v24 }
 0x953   : > { %12925 = vpow2.f32 %v6274_v4  ;;  %v6282_v32 = vmul.f32 1.442695, %v6255_v5  ;;  %v6304_v13 = vsel %vm1075_vm2, %v14848_v18, 0.0 }
 0x954   : > { %12927 = vpow2.f32 %v6272_v38  ;;  %v6280_v17 = vmul.f32 1.442695, %v6254_v7  ;;  %v6237_v48 = vpop.xlane.xlu0 %6236  ;;  %6305 = vadd.xlane.f32.xlu1 %v6304_v13 }
 0x955   : > { %v6234_v36 = vpop.xlane.xlu1 %6233  ;;  %12929 = vpow2.f32 %v6282_v32  ;;  %v6257_v49 = vsub.f32 %v14800_v28, %v6237_v48 }
 0x956   : > { %v6256_v14 = vsub.f32 %v14802_v59, %v6234_v36  ;;  %v14853_v31 = vpop.eup %12919  ;;  %12931 = vpow2.f32 %v6280_v17 }
 0x957   : > { %v6307_v58 = vsel %vm1075_vm2, %v14853_v31, 0.0  ;;  %v6286_v35 = vmul.f32 1.442695, %v6257_v49 }
 0x958   : > { %v6284_v11 = vmul.f32 1.442695, %v6256_v14  ;;  %6308 = vadd.xlane.f32.xlu0 %v6307_v58  ;;  %v6243_v57 = vpop.xlane.xlu0 %6242 }
 0x959   : > { %v6240_v37 = vpop.xlane.xlu1 %6239  ;;  %v6259_v38 = vsub.f32 %v14808_v25, %v6243_v57 }
 0x95a   : > { %12933 = vpow2.f32 %v6284_v11  ;;  %v6258_v4 = vsub.f32 %v14814_v53, %v6240_v37 }
 0x95b   : > { %12935 = vpow2.f32 %v6286_v35  ;;  %v6290_v53 = vmul.f32 1.442695, %v6259_v38 }
 0x95c   : > { %v6288_v28 = vmul.f32 1.442695, %v6258_v4 }
 0x95e   : > { %v14859_v24 = vpop.eup %12921  ;;  %12937 = vpow2.f32 %v6288_v28 }
 0x95f   : > { %v14861_v59 = vpop.eup %12923  ;;  %v6319_v52 = vsel %vm1075_vm2, %v14859_v24, 0.0  ;;  %12939 = vpow2.f32 %v6290_v53 }
 0x960   : > { %v14866_v39 = vpop.eup %12925  ;;  %6320 = vadd.xlane.f32.xlu0 %v6319_v52  ;;  %v6316_v5 = vsel %vm1075_vm2, %v14861_v59, 0.0 }
 0x961   : > { %v14870_v7 = vpop.eup %12927  ;;  %6317 = vadd.xlane.f32.xlu1 %v6316_v5  ;;  %v6313_v32 = vsel %vm1075_vm2, %v14866_v39, 0.0 }
 0x962   : > { %v14874_v13 = vpop.eup %12929  ;;  %v6310_v25 = vsel %vm1075_vm2, %v14870_v7, 0.0 }
 0x963   : > { %v14878_v17 = vpop.eup %12931  ;;  %v6325_v48 = vsel %vm1075_vm2, %v14874_v13, 0.0 }
 0x964   : > { %6314 = vadd.xlane.f32.xlu0 %v6313_v32  ;;  %v6322_v14 = vsel %vm1075_vm2, %v14878_v17, 0.0 }
 0x965   : > { %6311 = vadd.xlane.f32.xlu1 %v6310_v25 }
 0x967   : > { %v14882_v36 = vpop.eup %12933 }
 0x968   : > { %6326 = vadd.xlane.f32.xlu0 %v6325_v48  ;;  %v6328_v49 = vsel %vm1075_vm2, %v14882_v36, 0.0  ;;  %v14888_v11 = vpop.eup %12935 }
 0x969   : > { %6323 = vadd.xlane.f32.xlu1 %v6322_v14  ;;  %v6331_v58 = vsel %vm1075_vm2, %v14888_v11, 0.0 }
 0x96b   : > { %v14892_v37 = vpop.eup %12937 }
 0x96c   : > { %6329 = vadd.xlane.f32.xlu0 %v6328_v49  ;;  %v6334_v35 = vsel %vm1075_vm2, %v14892_v37, 0.0  ;;  %v14896_v4 = vpop.eup %12939 }
 0x96d   : > { %v6337_v57 = vsel %vm1075_vm2, %v14896_v4, 0.0 }
 0x970   : > { %6332 = vadd.xlane.f32.xlu0 %v6331_v58 }
 0x974   : > { %6335 = vadd.xlane.f32.xlu0 %v6334_v35 }
 0x978   : > { %6338 = vadd.xlane.f32.xlu0 %v6337_v57 }
 0x97a   : > { %5336 = vrot.lane.b32.xlu1 %v13618_v56, %s13229_s1 }
 0x97e   : > { %7398 = vrot.lane.b32.xlu1 %v13548_v60, %s13230_s2  ;;  %v10755_v60 = vld [vmem:[%s13375_s11 + $0xe0] sm:$0xff] }
 0x98e   : > { %7241 = vrot.lane.b32.xlu0 %v13553_v0, %s13230_s2 }
 0x9cb   : > { %v6297_v53 = vpop.xlane.xlu0 %6296 }
 0x9cd   : > { %v6294_v38 = vpop.xlane.xlu1 %6293 }
 0x9ce   : > { %12941 = vrcp.f32 %v6294_v38 }
 0x9d3   : > { %v6303_v32 = vpop.xlane.xlu0 %6302 }
 0x9d7   : > { %v6300_v28 = vpop.xlane.xlu1 %6299 }
 0x9d8   : > { %12943 = vrcp.f32 %v6300_v28 }
 0x9d9   : > { %12945 = vrcp.f32 %v6297_v53 }
 0x9da   : > { %12947 = vrcp.f32 %v6303_v32 }
 0x9db   : > { %v12942_v52 = vpop.eup %12941 }
 0x9dc   : > { %v6356_v5 = vmul.f32 %v12942_v52, %v14829_v15 }
 0x9dd   : > { %v6306_v14 = vpop.xlane.xlu1 %6305 }
 0x9de   : > { %12269 = vmatprep.mubr.msk.f32.mxu0 %vm1075_vm2, %v6356_v5  ;;  %12949 = vrcp.f32 %v6306_v14 }
 0x9e1   : > { %v6309_v48 = vpop.xlane.xlu0 %6308 }
 0x9e5   : > { %v12944_v25 = vpop.eup %12943 }
 0x9e6   : > { %v6358_v49 = vmul.f32 %v12944_v25, %v14839_v3  ;;  %v12946_v3 = vpop.eup %12945 }
 0x9e7   : > { %v12948_v25 = vpop.eup %12947 }
 0x9e8   : > { %12276 = vmatprep.mubr.msk.f32.mxu1 %vm1075_vm2, %v6358_v49 }
 0x9e9   : > { %v6321_v58 = vpop.xlane.xlu0 %6320 }
 0x9ea   : > { %v6318_v35 = vpop.xlane.xlu1 %6317 }
 0x9ed   : > { %v6315_v57 = vpop.xlane.xlu0 %6314 }
 0x9ee   : > { %v6312_v38 = vpop.xlane.xlu1 %6311 }
 0x9ef   : > { %12951 = vrcp.f32 %v6312_v38 }
 0x9f0   : > { %12953 = vrcp.f32 %v6309_v48 }
 0x9f1   : > { %12955 = vrcp.f32 %v6315_v57  ;;  %v6327_v15 = vpop.xlane.xlu0 %6326 }
 0x9f2   : > { %12957 = vrcp.f32 %v6318_v35  ;;  %v6324_v28 = vpop.xlane.xlu1 %6323  ;;  %v6359_v35 = vmul.f32 %v12948_v25, %v14834_v43 }
 0x9f3   : > { %12959 = vrcp.f32 %v6324_v28 }
 0x9f4   : > { %12961 = vrcp.f32 %v6321_v58  ;;  %v12950_v58 = vpop.eup %12949 }
 0x9f5   : > { %v6330_v52 = vpop.xlane.xlu0 %6329  ;;  %12963 = vrcp.f32 %v6327_v15 }
 0x9f6   : > { %v14906_v5 = vpop.permute.xlu1 %5336  ;;  %12965 = vrcp.f32 %v6330_v52 }
 0x9f7   : > { %v5411_v53 = vadd.f32 %v14724_v8, %v14906_v5  ;;  %v5421_v32 = vadd.f32 %v14728_v55, %v14906_v5  ;;  %v5406_v14 = vadd.f32 %v14726_v2, %v14906_v5  ;;  %v5416_v49 = vadd.f32 %v14730_v63, %v14906_v5 }
 0x9f8   : > { %v6357_v8 = vmul.f32 %v12946_v3, %v14824_v47  ;;  %v5431_v57 = vadd.f32 %v14732_v50, %v14906_v5  ;;  %v5441_v2 = vadd.f32 %v14736_v42, %v14906_v5  ;;  %v6360_v47 = vmul.f32 %v12950_v58, %v14848_v18  ;;  %v10732_v58 = vld [vmem:[%s13370_s26 + $0xe8] sm:$0xff] }
 0x9f9   : > { %12265 = vmatprep.subr.mxu0 %v5411_v53  ;;  %12272 = vmatprep.subr.mxu1 %v5421_v32  ;;  %v6333_v48 = vpop.xlane.xlu0 %6332  ;;  %v5426_v50 = vadd.f32 %v14734_v6, %v14906_v5  ;;  %v5436_v42 = vadd.f32 %v14738_v54, %v14906_v5  ;;  %v5451_v6 = vadd.f32 %v14740_v19, %v14906_v5 }
 0x9fa   : > { %12967 = vrcp.f32 %v6333_v48  ;;  %12266 = vmatpush3.msra.mxu0 %v5411_v53  ;;  %12273 = vmatpush3.msra.mxu1 %v5421_v32  ;;  %v5461_v53 = vadd.f32 %v14744_v33, %v14906_v5  ;;  %v5446_v25 = vadd.f32 %v14742_v21, %v14906_v5  ;;  %v5456_v33 = vadd.f32 %v14748_v27, %v14906_v5 }
 0x9fb   : > { %12267 = vmatprep.subr.mxu0 %v5406_v14  ;;  %12274 = vmatprep.subr.mxu1 %v5416_v49  ;;  %v5471_v21 = vadd.f32 %v14756_v12, %v14906_v5  ;;  %v5476_v12 = vadd.f32 %v14770_v40, %v14906_v5  ;;  %v14968_v40 = vld [vmem:[#allocation2] sm:$0xff] }
 0x9fc   : > { %v12952_v55 = vpop.eup %12951  ;;  %12268 = vmatpush3.msra.mxu0 %v5406_v14  ;;  %12275 = vmatpush3.msra.mxu1 %v5416_v49  ;;  %v5481_v14 = vadd.f32 %v14766_v29, %v14906_v5 }
 0x9fd   : > { %v12954_v63 = vpop.eup %12953  ;;  %12270 = vmatmul.mubr.msk.f32.vlgmr.msra.gmra.mxu0 %vm1075_vm2, %v6357_v8  ;;  %12277 = vmatmul.mubr.msk.f32.vlgmr.msra.gmra.mxu1 %vm1075_vm2, %v6359_v35  ;;  %v6336_v38 = vpop.xlane.xlu0 %6335  ;;  %v6362_v43 = vmul.f32 %v12952_v55, %v14870_v7  ;;  %v10731_v8 = vld [vmem:[%s13370_s26 + $0xe0] sm:$0xff]  ;;  %v10730_v35 = vld [vmem:[%s13370_s26 + $0xd8] sm:$0xff]  ;;  %v10729_v55 = vld [vmem:[%s13370_s26 + $0xd0] sm:$0xff] }
 0x9fe   : > { %v12956_v15 = vpop.eup %12955  ;;  %12279 = vmatprep.subr.mxu0 %v5431_v57  ;;  %12286 = vmatprep.subr.mxu1 %v5441_v2  ;;  %12969 = vrcp.f32 %v6336_v38  ;;  %v6361_v18 = vmul.f32 %v12954_v63, %v14853_v31  ;;  %v10758_v63 = vld [vmem:[%s13375_s11 + $0xf8] sm:$0xff]  ;;  %v14983_v38 = vld [vmem:[#allocation2 + $0x8] sm:$0xff] }
 0x9ff   : > { %v12958_v28 = vpop.eup %12957  ;;  %12280 = vmatpush3.msra.mxu0 %v5431_v57  ;;  %12283 = vmatprep.mubr.msk.f32.mxu0 %vm1075_vm2, %v6360_v47  ;;  %v6363_v7 = vmul.f32 %v12956_v15, %v14866_v39  ;;  %v10728_v57 = vld [vmem:[%s13370_s26 + $0xc8] sm:$0xff]  ;;  %v14987_v47 = vld [vmem:[#allocation2 + $0x10] sm:$0xff]  ;;  %v14995_v15 = vld [vmem:[#allocation2 + $0x20] sm:$0xff] }
 0xa00   : > { %v12960_v52 = vpop.eup %12959  ;;  %12287 = vmatpush3.msra.mxu1 %v5441_v2  ;;  %12281 = vmatprep.subr.mxu0 %v5426_v50  ;;  %v6364_v31 = vmul.f32 %v12958_v28, %v14861_v59  ;;  %v10727_v2 = vld [vmem:[%s13370_s26 + $0xc0] sm:$0xff]  ;;  %v15003_v28 = vld [vmem:[#allocation2 + $0x30] sm:$0xff] }
 0xa01   : > { %12288 = vmatprep.subr.mxu1 %v5436_v42  ;;  %12290 = vmatprep.mubr.msk.f32.mxu1 %vm1075_vm2, %v6362_v43  ;;  %v6339_v3 = vpop.xlane.xlu0 %6338  ;;  %v12962_v54 = vpop.eup %12961  ;;  %v6366_v39 = vmul.f32 %v12960_v52, %v14878_v17  ;;  %v14991_v43 = vld [vmem:[#allocation2 + $0x18] sm:$0xff]  ;;  %v15011_v52 = vld [vmem:[#allocation2 + $0x40] sm:$0xff] }
 0xa02   : > { %12282 = vmatpush3.msra.mxu0 %v5426_v50  ;;  %12289 = vmatpush3.msra.mxu1 %v5436_v42  ;;  %12971 = vrcp.f32 %v6339_v3  ;;  %v12964_v32 = vpop.eup %12963  ;;  %v6365_v59 = vmul.f32 %v12962_v54, %v14859_v24  ;;  %v14999_v50 = vld [vmem:[#allocation2 + $0x28] sm:$0xff]  ;;  %v15007_v42 = vld [vmem:[#allocation2 + $0x38] sm:$0xff]  ;;  %v15035_v54 = vld [vmem:[#allocation2 + $0x70] sm:$0xff] }
 0xa03   : > { %12284 = vmatmul.mubr.msk.f32.vlgmr.msra.gmra.mxu0 %vm1075_vm2, %v6361_v18  ;;  %12291 = vmatmul.mubr.msk.f32.vlgmr.msra.gmra.mxu1 %vm1075_vm2, %v6363_v7  ;;  %v12966_v19 = vpop.eup %12965  ;;  %v6367_v17 = vmul.f32 %v12964_v32, %v14874_v13  ;;  %v5466_v13 = vadd.f32 %v14760_v41, %v14906_v5  ;;  %v10734_v5 = vld [vmem:[%s13370_s26 + $0xf8] sm:$0xff]  ;;  %v15015_v18 = vld [vmem:[#allocation2 + $0x48] sm:$0xff]  ;;  %v15019_v7 = vld [vmem:[#allocation2 + $0x50] sm:$0xff] }
 0xa04   : > { %12293 = vmatprep.subr.mxu0 %v5451_v6  ;;  %12300 = vmatprep.subr.mxu1 %v5461_v53  ;;  %v6368_v27 = vmul.f32 %v12966_v19, %v14882_v36  ;;  %v15023_v3 = vld [vmem:[#allocation2 + $0x58] sm:$0xff]  ;;  %v10757_v19 = vld [vmem:[%s13375_s11 + $0xf0] sm:$0xff] }
 0xa05   : > { %12294 = vmatpush3.msra.mxu0 %v5451_v6  ;;  %12297 = vmatprep.mubr.msk.f32.mxu0 %vm1075_vm2, %v6364_v31  ;;  %v15027_v6 = vld [vmem:[#allocation2 + $0x60] sm:$0xff]  ;;  %v15039_v31 = vld [vmem:[#allocation2 + $0x78] sm:$0xff] }
 0xa06   : > { %12301 = vmatpush3.msra.mxu1 %v5461_v53  ;;  %12295 = vmatprep.subr.mxu0 %v5446_v25  ;;  %v15031_v53 = vld [vmem:[#allocation2 + $0x68] sm:$0xff] }
 0xa07   : > { %v12968_v48 = vpop.eup %12967  ;;  %12302 = vmatprep.subr.mxu1 %v5456_v33  ;;  %12304 = vmatprep.mubr.msk.f32.mxu1 %vm1075_vm2, %v6366_v39 }
 0xa08   : > { %12296 = vmatpush3.msra.mxu0 %v5446_v25  ;;  %12303 = vmatpush3.msra.mxu1 %v5456_v33  ;;  %v6369_v24 = vmul.f32 %v12968_v48, %v14888_v11  ;;  %v10710_v11 = vld [vmem:[%s13386_s23 + $0x28] sm:$0xff] }
 0xa09   : > { %12298 = vmatmul.mubr.msk.f32.vlgmr.msra.gmra.mxu0 %vm1075_vm2, %v6365_v59  ;;  %12305 = vmatmul.mubr.msk.f32.vlgmr.msra.gmra.mxu1 %vm1075_vm2, %v6367_v17  ;;  %v10756_v48 = vld [vmem:[%s13375_s11 + $0xe8] sm:$0xff] }
 0xa0a   : > { %12307 = vmatprep.subr.mxu0 %v5471_v21  ;;  %12314 = vmatprep.subr.mxu1 %v5481_v14 }
 0xa0b   : > { %v12970_v49 = vpop.eup %12969  ;;  %12308 = vmatpush3.msra.mxu0 %v5471_v21  ;;  %12315 = vmatpush3.msra.mxu1 %v5481_v14  ;;  %v10754_v21 = vld [vmem:[%s13375_s11 + $0xd8] sm:$0xff]  ;;  %v10753_v14 = vld [vmem:[%s13375_s11 + $0xd0] sm:$0xff] }
 0xa0c   : > { %12309 = vmatprep.subr.mxu0 %v5466_v13  ;;  %12311 = vmatprep.mubr.msk.f32.mxu0 %vm1075_vm2, %v6368_v27  ;;  %v6370_v29 = vmul.f32 %v12970_v49, %v14892_v37  ;;  %v10709_v37 = vld [vmem:[%s13386_s23 + $0x20] sm:$0xff] }
 0xa0d   : > { %12316 = vmatprep.subr.mxu1 %v5476_v12  ;;  %12310 = vmatpush3.msra.mxu0 %v5466_v13  ;;  %v10752_v13 = vld [vmem:[%s13375_s11 + $0xc8] sm:$0xff]  ;;  %v10751_v49 = vld [vmem:[%s13375_s11 + $0xc0] sm:$0xff] }
 0xa0e   : > { %12317 = vmatpush3.msra.mxu1 %v5476_v12  ;;  %12312 = vmatmul.mubr.msk.f32.vlgmr.msra.gmra.mxu0 %vm1075_vm2, %v6369_v24 }
 0xa0f   : > { %v12972_v41 = vpop.eup %12971  ;;  %12318 = vmatprep.mubr.msk.f32.mxu1 %vm1075_vm2, %v6370_v29  ;;  %12321 = vmatprep.subr.mxu0 %v10710_v11 }
 0xa10   : > { %v6371_v36 = vmul.f32 %v12972_v41, %v14896_v4  ;;  %12322 = vmatpush3.msra.mxu0 %v10710_v11  ;;  %12349 = vmatprep.subr.mxu1 %v10734_v5  ;;  %v10733_v4 = vld [vmem:[%s13370_s26 + $0xf0] sm:$0xff] }
 0xa11   : > { %12323 = vmatprep.subr.mxu0 %v10709_v37 }
 0xa12   : > { %12319 = vmatmul.mubr.msk.f32.vlgmr.msra.gmra.mxu1 %vm1075_vm2, %v6371_v36  ;;  %12324 = vmatpush3.msra.mxu0 %v10709_v37 }
 0xa13   : > { %12365 = vmatprep.mubr.msk.f32.mxu1 %vm567_vm1, %v14968_v40  ;;  %12350 = vmatpush3.msra.mxu1 %v10734_v5 }
 0xa14   : > { %12351 = vmatprep.subr.mxu1 %v10733_v4  ;;  %12389 = vmatprep.subr.mxu0 %v10758_v63 }
 0xa15   : > { %12352 = vmatpush3.msra.mxu1 %v10733_v4  ;;  %v10781_v4 = vld [vmem:[%s13380_s27 + $0xf0] sm:$0xff] }
 0xa16   : > { %12353 = vmatprep.subr.mxu1 %v10732_v58 }
 0xa17   : > { %12354 = vmatpush3.msra.mxu1 %v10732_v58  ;;  %v10780_v58 = vld [vmem:[%s13380_s27 + $0xe8] sm:$0xff] }
 0xa18   : > { %12355 = vmatprep.subr.mxu1 %v10731_v8 }
 0xa19   : > { %12356 = vmatpush3.msra.mxu1 %v10731_v8  ;;  %v10779_v8 = vld [vmem:[%s13380_s27 + $0xe0] sm:$0xff] }
 0xa1a   : > { %12357 = vmatprep.subr.mxu1 %v10730_v35 }
 0xa1b   : > { %12358 = vmatpush3.msra.mxu1 %v10730_v35  ;;  %v10778_v35 = vld [vmem:[%s13380_s27 + $0xd8] sm:$0xff] }
 0xa1c   : > { %12359 = vmatprep.subr.mxu1 %v10729_v55 }
 0xa1d   : > { %12360 = vmatpush3.msra.mxu1 %v10729_v55  ;;  %v10777_v55 = vld [vmem:[%s13380_s27 + $0xd0] sm:$0xff] }
 0xa1e   : > { %12361 = vmatprep.subr.mxu1 %v10728_v57 }
 0xa1f   : > { %12362 = vmatpush3.msra.mxu1 %v10728_v57  ;;  %v10776_v57 = vld [vmem:[%s13380_s27 + $0xc8] sm:$0xff] }
 0xa20   : > { %12363 = vmatprep.subr.mxu1 %v10727_v2 }
 0xa21   : > { %12364 = vmatpush3.msra.mxu1 %v10727_v2  ;;  %v10775_v2 = vld [vmem:[%s13380_s27 + $0xc0] sm:$0xff] }
 0xa22   : > { %12366 = vmatmul.mubr.msk.f32.vlgmr.msra.gmra.mxu1 %vm567_vm1, %v14983_v38 }
 0xa23   : > { %12368 = vmatprep.mubr.msk.f32.mxu1 %vm567_vm1, %v14987_v47 }
 0xa26   : > { %12369 = vmatmul.mubr.msk.f32.gmra.mxu1 %vm567_vm1, %v14991_v43 }
 0xa27   : > { %12371 = vmatprep.mubr.msk.f32.mxu1 %vm567_vm1, %v14995_v15 }
 0xa2a   : > { %12372 = vmatmul.mubr.msk.f32.gmra.mxu1 %vm567_vm1, %v14999_v50 }
 0xa2b   : > { %12374 = vmatprep.mubr.msk.f32.mxu1 %vm567_vm1, %v15003_v28 }
 0xa2e   : > { %12375 = vmatmul.mubr.msk.f32.gmra.mxu1 %vm567_vm1, %v15007_v42 }
 0xa2f   : > { %12377 = vmatprep.mubr.msk.f32.mxu1 %vm567_vm1, %v15011_v52 }
 0xa32   : > { %12378 = vmatmul.mubr.msk.f32.gmra.mxu1 %vm567_vm1, %v15015_v18 }
 0xa33   : > { %12380 = vmatprep.mubr.msk.f32.mxu1 %vm567_vm1, %v15019_v7 }
 0xa36   : > { %12381 = vmatmul.mubr.msk.f32.gmra.mxu1 %vm567_vm1, %v15023_v3 }
 0xa37   : > { %12383 = vmatprep.mubr.msk.f32.mxu1 %vm567_vm1, %v15027_v6 }
 0xa3a   : > { %12384 = vmatmul.mubr.msk.f32.gmra.mxu1 %vm567_vm1, %v15031_v53 }
 0xa3b   : > { %12386 = vmatprep.mubr.msk.f32.mxu1 %vm567_vm1, %v15035_v54 }
 0xa3e   : > { %12387 = vmatmul.mubr.msk.f32.gmra.mxu1 %vm567_vm1, %v15039_v31 }
 0xa3f   : > { %12445 = vmatprep.mubr.msk.f32.mxu1 %vm567_vm1, %v14968_v40 }
 0xabd   : > { %v12271_v39 = vpop.f32.mrf.mxu0  ;;  %v12278_v32 = vpop.f32.mrf.mxu1 }
 0xabf   : > { %v6444_v25 = vpop.f32.mrf.mxu0  ;;  %v6525_v33 = vpop.f32.mrf.mxu1 }
 0xac0   : > { %12325 = vmatprep.mubr.msk.f32.mxu0 %vm1075_vm2, %v6444_v25 }
 0xac1   : > { %12326 = vmatmul.mubr.msk.f32.vlgmr.msra.gmra.mxu0 %vm1075_vm2, %v12271_v39 }
 0xac2   : > { %12328 = vmatprep.mubr.msk.f32.mxu0 %vm1075_vm2, %v6525_v33  ;;  %12390 = vmatpush3.msra.mxu0 %v10758_v63 }
 0xac3   : > { %v12285_v59 = vpop.f32.mrf.mxu0  ;;  %12391 = vmatprep.subr.mxu0 %v10757_v19  ;;  %v12292_v0 = vpop.f32.mrf.mxu1 }
 0xac4   : > { %12392 = vmatpush3.msra.mxu0 %v10757_v19 }
 0xac5   : > { %v6606_v17 = vpop.f32.mrf.mxu0  ;;  %12329 = vmatmul.mubr.msk.f32.gmra.mxu0 %vm1075_vm2, %v12278_v32  ;;  %12393 = vmatprep.subr.mxu0 %v10756_v48  ;;  %v6687_v27 = vpop.f32.mrf.mxu1 }
 0xac6   : > { %12331 = vmatprep.mubr.msk.f32.mxu0 %vm1075_vm2, %v6606_v17  ;;  %12394 = vmatpush3.msra.mxu0 %v10756_v48 }
 0xac7   : > { %12395 = vmatprep.subr.mxu0 %v10755_v60 }
 0xac8   : > { %12396 = vmatpush3.msra.mxu0 %v10755_v60 }
 0xac9   : > { %v12299_v24 = vpop.f32.mrf.mxu0  ;;  %12332 = vmatmul.mubr.msk.f32.gmra.mxu0 %vm1075_vm2, %v12285_v59  ;;  %12397 = vmatprep.subr.mxu0 %v10754_v21  ;;  %v12306_v12 = vpop.f32.mrf.mxu1 }
 0xaca   : > { %12334 = vmatprep.mubr.msk.f32.mxu0 %vm1075_vm2, %v6687_v27  ;;  %12398 = vmatpush3.msra.mxu0 %v10754_v21 }
 0xacb   : > { %12399 = vmatprep.subr.mxu0 %v10753_v14  ;;  %v6768_v29 = vpop.f32.mrf.mxu0  ;;  %v6849_v41 = vpop.f32.mrf.mxu1 }
 0xacc   : > { %12400 = vmatpush3.msra.mxu0 %v10753_v14 }
 0xacd   : > { %12335 = vmatmul.mubr.msk.f32.gmra.mxu0 %vm1075_vm2, %v12292_v0  ;;  %12401 = vmatprep.subr.mxu0 %v10752_v13 }
 0xace   : > { %12337 = vmatprep.mubr.msk.f32.mxu0 %vm1075_vm2, %v6768_v29  ;;  %12402 = vmatpush3.msra.mxu0 %v10752_v13  ;;  %v12313_v36 = vpop.f32.mrf.mxu0  ;;  %v15206_v29 = vpop.permute.xlu1 %7398 }
 0xacf   : > { %12403 = vmatprep.subr.mxu0 %v10751_v49 }
 0xad0   : > { %12404 = vmatpush3.msra.mxu0 %v10751_v49  ;;  %v6930_v11 = vpop.f32.mrf.mxu0 }
 0xad1   : > { %12338 = vmatmul.mubr.msk.f32.gmra.mxu0 %vm1075_vm2, %v12299_v24 }
 0xad2   : > { %12340 = vmatprep.mubr.msk.f32.mxu0 %vm1075_vm2, %v6849_v41  ;;  %v12320_v37 = vpop.f32.mrf.mxu1 }
 0xad4   : > { %v7011_v5 = vpop.f32.mrf.mxu1 }
 0xad5   : > { %12341 = vmatmul.mubr.msk.f32.gmra.mxu0 %vm1075_vm2, %v12306_v12 }
 0xad6   : > { %12343 = vmatprep.mubr.msk.f32.mxu0 %vm1075_vm2, %v6930_v11 }
 0xad9   : > { %12344 = vmatmul.mubr.msk.f32.gmra.mxu0 %vm1075_vm2, %v12313_v36 }
 0xada   : > { %12346 = vmatprep.mubr.msk.f32.mxu0 %vm1075_vm2, %v7011_v5 }
 0xadd   : > { %12347 = vmatmul.mubr.msk.f32.gmra.mxu0 %vm1075_vm2, %v12320_v37 }
 0xade   : > { %12405 = vmatprep.mubr.msk.f32.mxu0 %vm567_vm1, %v14968_v40  ;;  %v10782_v40 = vld [vmem:[%s13380_s27 + $0xf8] sm:$0xff] }
 0xadf   : > { %12429 = vmatprep.subr.mxu1 %v10782_v40 }
 0xae0   : > { %12430 = vmatpush3.msra.mxu1 %v10782_v40 }
 0xae1   : > { %12406 = vmatmul.mubr.msk.f32.vlgmr.msra.gmra.mxu0 %vm567_vm1, %v14983_v38  ;;  %12431 = vmatprep.subr.mxu1 %v10781_v4 }
 0xae2   : > { %12408 = vmatprep.mubr.msk.f32.mxu0 %vm567_vm1, %v14987_v47  ;;  %12432 = vmatpush3.msra.mxu1 %v10781_v4  ;;  %v15118_v63 = vpop.f32.mrf.mxu1 }
 0xae3   : > { %12433 = vmatprep.subr.mxu1 %v10780_v58 }
 0xae4   : > { %12434 = vmatpush3.msra.mxu1 %v10780_v58  ;;  %v7310_v39 = vpop.f32.mrf.mxu1 }
 0xae5   : > { %12409 = vmatmul.mubr.msk.f32.gmra.mxu0 %vm567_vm1, %v14991_v43  ;;  %12435 = vmatprep.subr.mxu1 %v10779_v8 }
 0xae6   : > { %12411 = vmatprep.mubr.msk.f32.mxu0 %vm567_vm1, %v14995_v15  ;;  %12436 = vmatpush3.msra.mxu1 %v10779_v8 }
 0xae7   : > { %12437 = vmatprep.subr.mxu1 %v10778_v35 }
 0xae8   : > { %12438 = vmatpush3.msra.mxu1 %v10778_v35 }
 0xae9   : > { %12412 = vmatmul.mubr.msk.f32.gmra.mxu0 %vm567_vm1, %v14999_v50  ;;  %12439 = vmatprep.subr.mxu1 %v10777_v55 }
 0xaea   : > { %12414 = vmatprep.mubr.msk.f32.mxu0 %vm567_vm1, %v15003_v28  ;;  %12440 = vmatpush3.msra.mxu1 %v10777_v55 }
 0xaeb   : > { %12441 = vmatprep.subr.mxu1 %v10776_v57 }
 0xaec   : > { %12442 = vmatpush3.msra.mxu1 %v10776_v57 }
 0xaed   : > { %12415 = vmatmul.mubr.msk.f32.gmra.mxu0 %vm567_vm1, %v15007_v42  ;;  %12443 = vmatprep.subr.mxu1 %v10775_v2 }
 0xaee   : > { %12417 = vmatprep.mubr.msk.f32.mxu0 %vm567_vm1, %v15011_v52  ;;  %12444 = vmatpush3.msra.mxu1 %v10775_v2 }
 0xaef   : > { %12446 = vmatmul.mubr.msk.f32.vlgmr.msra.gmra.mxu1 %vm567_vm1, %v14983_v38  ;;  %v15128_v38 = vpop.f32.mrf.mxu1 }
 0xaf0   : > { %12448 = vmatprep.mubr.msk.f32.mxu1 %vm567_vm1, %v14987_v47 }
 0xaf1   : > { %12418 = vmatmul.mubr.msk.f32.gmra.mxu0 %vm567_vm1, %v15015_v18  ;;  %v15134_v47 = vpop.f32.mrf.mxu1 }
 0xaf2   : > { %12420 = vmatprep.mubr.msk.f32.mxu0 %vm567_vm1, %v15019_v7 }
 0xaf3   : > { %12449 = vmatmul.mubr.msk.f32.gmra.mxu1 %vm567_vm1, %v14991_v43  ;;  %v15138_v43 = vpop.permute.xlu0 %7241 }
 0xaf4   : > { %12451 = vmatprep.mubr.msk.f32.mxu1 %vm567_vm1, %v14995_v15  ;;  %v15142_v15 = vpop.f32.mrf.mxu1  ;;  %v7316_v35 = vadd.f32 %v15118_v63, %v15138_v43  ;;  %v7321_v55 = vadd.f32 %v15134_v47, %v15138_v43 }
 0xaf5   : > { %12421 = vmatmul.mubr.msk.f32.gmra.mxu0 %vm567_vm1, %v15023_v3 }
 0xaf6   : > { %12423 = vmatprep.mubr.msk.f32.mxu0 %vm567_vm1, %v15027_v6 }
 0xaf7   : > { %12452 = vmatmul.mubr.msk.f32.gmra.mxu1 %vm567_vm1, %v14999_v50  ;;  %v7311_v50 = vadd.f32 %v7310_v39, %v15138_v43 }
 0xaf8   : > { %12454 = vmatprep.mubr.msk.f32.mxu1 %vm567_vm1, %v15003_v28  ;;  %v7330_v28 = vpop.f32.mrf.mxu1 }
 0xaf9   : > { %12424 = vmatmul.mubr.msk.f32.gmra.mxu0 %vm567_vm1, %v15031_v53 }
 0xafa   : > { %12426 = vmatprep.mubr.msk.f32.mxu0 %vm567_vm1, %v15035_v54  ;;  %v15200_v24 = vpop.f32.mrf.mxu1 }
 0xafb   : > { %12455 = vmatmul.mubr.msk.f32.gmra.mxu1 %vm567_vm1, %v15007_v42  ;;  %v7331_v42 = vadd.f32 %v7330_v28, %v15138_v43 }
 0xafc   : > { %12457 = vmatprep.mubr.msk.f32.mxu1 %vm567_vm1, %v15011_v52  ;;  %v4940_v52 = vadd.f32 %v14475_v23, %v14618_v10  ;;  %v4970_v10 = vadd.f32 %v14493_v51, %v14630_v26  ;;  %v5000_v26 = vadd.f32 %v14517_v20, %v14642_v46  ;;  %v7340_v41 = vpop.f32.mrf.mxu1 }
 0xafd   : > { %12427 = vmatmul.mubr.msk.f32.gmra.mxu0 %vm567_vm1, %v15039_v31 }
 0xafe   : > { %12473 = vmatprep.mubr.msk.f32.mxu0 %vm1075_vm2, %v7311_v50  ;;  %v12379_v37 = vpop.f32.mrf.mxu1 }
 0xaff   : > { %12458 = vmatmul.mubr.msk.f32.gmra.mxu1 %vm567_vm1, %v15015_v18 }
 0xb00   : > { %12460 = vmatprep.mubr.msk.f32.mxu1 %vm567_vm1, %v15019_v7  ;;  %v7350_v58 = vpop.f32.mrf.mxu1 }
 0xb02   : > { %v12382_v28 = vpop.f32.mrf.mxu1 }
 0xb03   : > { %12461 = vmatmul.mubr.msk.f32.gmra.mxu1 %vm567_vm1, %v15023_v3 }
 0xb04   : > { %12463 = vmatprep.mubr.msk.f32.mxu1 %vm567_vm1, %v15027_v6  ;;  %v4950_v6 = vadd.f32 %v14481_v16, %v14622_v62  ;;  %v4980_v62 = vadd.f32 %v14501_v1, %v14634_v44  ;;  %v5010_v44 = vadd.f32 %v14529_v45, %v14646_v34 }
 0xb07   : > { %12464 = vmatmul.mubr.msk.f32.gmra.mxu1 %vm567_vm1, %v15031_v53 }
 0xb08   : > { %12466 = vmatprep.mubr.msk.f32.mxu1 %vm567_vm1, %v15035_v54 }
 0xb0b   : > { %12467 = vmatmul.mubr.msk.f32.gmra.mxu1 %vm567_vm1, %v15039_v31  ;;  %v4960_v31 = vadd.f32 %v14487_v9, %v14626_v30  ;;  %v4990_v30 = vadd.f32 %v14509_v61, %v14638_v22  ;;  %v16136_v61 = vld [vmem:[#allocation31_spill] sm:$0xff] }
 0xb0c   : > { %12487 = vmatprep.mubr.msk.f32.mxu1 %vm1075_vm2, %v7331_v42  ;;  %v16137_v22 = vld [vmem:[#allocation23_spill] sm:$0xff] }
 0xb0d   : > { %v5005_v13 = vadd.f32 %v16137_v22, %v16136_v61 }
 0xb81   : > { %v12327_v18 = vpop.f32.mrf.mxu0 }
 0xb82   : > { %v15158_v7 = vadd.f32 %v12327_v18, %v4940_v52  ;;  %v7360_v52 = vpop.f32.mrf.mxu1 }
 0xb83   : > { %v15160_v3 = vpop.f32.mrf.mxu0 }
 0xb85   : > { %v12330_v53 = vpop.f32.mrf.mxu0 }
 0xb86   : > { %v15164_v32 = vadd.f32 %v12330_v53, %v4950_v6  ;;  %v7326_v6 = vadd.f32 %v15128_v38, %v15138_v43  ;;  %v7336_v53 = vadd.f32 %v15142_v15, %v15138_v43  ;;  %v12385_v38 = vpop.f32.mrf.mxu1 }
 0xb87   : > { %v15166_v54 = vpop.f32.mrf.mxu0 }
 0xb89   : > { %v12333_v25 = vpop.f32.mrf.mxu0 }
 0xb8a   : > { %v15170_v19 = vadd.f32 %v12333_v25, %v4960_v31 }
 0xb8b   : > { %v15172_v23 = vpop.f32.mrf.mxu0 }
 0xb8d   : > { %v12336_v33 = vpop.f32.mrf.mxu0 }
 0xb8e   : > { %v15176_v48 = vadd.f32 %v12336_v33, %v4970_v10  ;;  %v7341_v33 = vadd.f32 %v7340_v41, %v15138_v43 }
 0xb8f   : > { %v15178_v16 = vpop.f32.mrf.mxu0 }
 0xb91   : > { %v12339_v59 = vpop.f32.mrf.mxu0 }
 0xb92   : > { %v15182_v60 = vadd.f32 %v12339_v59, %v4980_v62  ;;  %v7351_v59 = vadd.f32 %v7350_v58, %v15138_v43 }
 0xb93   : > { %v15184_v9 = vpop.f32.mrf.mxu0 }
 0xb95   : > { %v12342_v0 = vpop.f32.mrf.mxu0 }
 0xb96   : > { %v15188_v17 = vadd.f32 %v12342_v0, %v4990_v30 }
 0xb97   : > { %v15190_v51 = vpop.f32.mrf.mxu0 }
 0xb99   : > { %v12345_v21 = vpop.f32.mrf.mxu0 }
 0xb9a   : > { %v15194_v14 = vadd.f32 %v12345_v21, %v5000_v26  ;;  %v7370_v26 = vpop.f32.mrf.mxu1  ;;  %v7346_v21 = vadd.f32 %v15200_v24, %v15138_v43 }
 0xb9b   : > { %v15196_v1 = vpop.f32.mrf.mxu0  ;;  %v7371_v41 = vadd.f32 %v7370_v26, %v15138_v43 }
 0xb9d   : > { %v12348_v27 = vpop.f32.mrf.mxu0 }
 0xb9e   : > { %v15204_v49 = vadd.f32 %v12348_v27, %v5010_v44  ;;  %v7356_v27 = vadd.f32 %v12379_v37, %v15138_v43  ;;  %v7376_v37 = vadd.f32 %v12385_v38, %v15138_v43 }
 0xb9f   : > { %v7207_v12 = vpop.f32.mrf.mxu0 }
 0xba0   : > { %v15208_v20 = vadd.f32 %v7207_v12, %v5005_v13  ;;  %v7361_v12 = vadd.f32 %v7360_v52, %v15138_v43 }
 0xba1   : > { %v12407_v46 = vpop.f32.mrf.mxu0 }
 0xba2   : > { %v7473_v36 = vadd.f32 %v12407_v46, %v15206_v29  ;;  %v12388_v46 = vpop.f32.mrf.mxu1 }
 0xba3   : > { %v7467_v11 = vpop.f32.mrf.mxu0 }
 0xba4   : > { %v7468_v45 = vadd.f32 %v7467_v11, %v15206_v29  ;;  %12469 = vmatprep.subr.msk.mxu0 %vm1075_vm2, %v7473_v36 }
 0xba5   : > { %v12410_v34 = vpop.f32.mrf.mxu0  ;;  %12470 = vmatpush3.xpose.msk.msra.mxu0 %vm1075_vm2, %v7473_v36 }
 0xba6   : > { %12471 = vmatprep.subr.msk.mxu0 %vm1075_vm2, %v7468_v45  ;;  %v7483_v40 = vadd.f32 %v12410_v34, %v15206_v29  ;;  %v7366_v34 = vadd.f32 %v12382_v28, %v15138_v43 }
 0xba7   : > { %v7477_v5 = vpop.f32.mrf.mxu0 }
 0xba8   : > { %v7478_v2 = vadd.f32 %v7477_v5, %v15206_v29 }
 0xba9   : > { %v12413_v4 = vpop.f32.mrf.mxu0  ;;  %12472 = vmatpush3.xpose.msk.msra.mxu0 %vm1075_vm2, %v7468_v45  ;;  %v7380_v45 = vpop.f32.mrf.mxu1 }
 0xbaa   : > { %v7493_v8 = vadd.f32 %v12413_v4, %v15206_v29  ;;  %12476 = vmatprep.subr.msk.mxu0 %vm1075_vm2, %v7483_v40  ;;  %v7386_v4 = vadd.f32 %v12388_v46, %v15138_v43 }
 0xbab   : > { %v7487_v57 = vpop.f32.mrf.mxu0 }
 0xbac   : > { %v7488_v39 = vadd.f32 %v7487_v57, %v15206_v29  ;;  %12474 = vmatmul.mubr.msk.f32.vlgmr.msra.gmra.mxu0 %vm1075_vm2, %v7316_v35  ;;  %12483 = vmatprep.subr.msk.mxu1 %vm1075_vm2, %v7493_v8 }
 0xbad   : > { %v12416_v50 = vpop.f32.mrf.mxu0  ;;  %12477 = vmatpush3.xpose.msk.msra.mxu0 %vm1075_vm2, %v7483_v40  ;;  %12484 = vmatpush3.xpose.msk.msra.mxu1 %vm1075_vm2, %v7493_v8  ;;  %v7381_v40 = vadd.f32 %v7380_v45, %v15138_v43 }
 0xbae   : > { %12478 = vmatprep.subr.msk.mxu0 %vm1075_vm2, %v7478_v2  ;;  %12485 = vmatprep.subr.msk.mxu1 %vm1075_vm2, %v7488_v39  ;;  %v7503_v47 = vadd.f32 %v12416_v50, %v15206_v29 }
 0xbaf   : > { %v7497_v63 = vpop.f32.mrf.mxu0  ;;  %12480 = vmatprep.mubr.msk.f32.mxu0 %vm1075_vm2, %v7321_v55  ;;  %v15291_v58 = vpop.f32.mrf.mxu1 }
 0xbb0   : > { %v7498_v25 = vadd.f32 %v7497_v63, %v15206_v29 }
 0xbb1   : > { %v12419_v42 = vpop.f32.mrf.mxu0  ;;  %12479 = vmatpush3.xpose.msk.msra.mxu0 %vm1075_vm2, %v7478_v2  ;;  %12486 = vmatpush3.xpose.msk.msra.mxu1 %vm1075_vm2, %v7488_v39 }
 0xbb2   : > { %v7513_v18 = vadd.f32 %v12419_v42, %v15206_v29  ;;  %12490 = vmatprep.subr.msk.mxu0 %vm1075_vm2, %v7503_v47 }
 0xbb3   : > { %v7507_v31 = vpop.f32.mrf.mxu0 }
 0xbb4   : > { %v7508_v10 = vadd.f32 %v7507_v31, %v15206_v29  ;;  %12481 = vmatmul.mubr.msk.f32.vlgmr.msra.gmra.mxu0 %vm1075_vm2, %v7326_v6  ;;  %12497 = vmatprep.subr.msk.mxu1 %vm1075_vm2, %v7513_v18 }
 0xbb5   : > { %v12422_v62 = vpop.f32.mrf.mxu0  ;;  %12488 = vmatmul.mubr.msk.f32.vlgmr.msra.gmra.mxu1 %vm1075_vm2, %v7336_v53  ;;  %12491 = vmatpush3.xpose.msk.msra.mxu0 %vm1075_vm2, %v7503_v47 }
 0xbb6   : > { %12498 = vmatpush3.xpose.msk.msra.mxu1 %vm1075_vm2, %v7513_v18  ;;  %12492 = vmatprep.subr.msk.mxu0 %vm1075_vm2, %v7498_v25  ;;  %v7523_v30 = vadd.f32 %v12422_v62, %v15206_v29 }
 0xbb7   : > { %12499 = vmatprep.subr.msk.mxu1 %vm1075_vm2, %v7508_v10  ;;  %v7517_v15 = vpop.f32.mrf.mxu0  ;;  %12494 = vmatprep.mubr.msk.f32.mxu0 %vm1075_vm2, %v7341_v33 }
 0xbb8   : > { %12501 = vmatprep.mubr.msk.f32.mxu1 %vm1075_vm2, %v7351_v59  ;;  %v7518_v22 = vadd.f32 %v7517_v15, %v15206_v29 }
 0xbb9   : > { %v12425_v0 = vpop.f32.mrf.mxu0  ;;  %12493 = vmatpush3.xpose.msk.msra.mxu0 %vm1075_vm2, %v7498_v25 }
 0xbba   : > { %v7533_v44 = vadd.f32 %v12425_v0, %v15206_v29  ;;  %12500 = vmatpush3.xpose.msk.msra.mxu1 %vm1075_vm2, %v7508_v10  ;;  %12504 = vmatprep.subr.msk.mxu0 %vm1075_vm2, %v7523_v30 }
 0xbbb   : > { %v7527_v61 = vpop.f32.mrf.mxu0 }
 0xbbc   : > { %v7528_v13 = vadd.f32 %v7527_v61, %v15206_v29  ;;  %12495 = vmatmul.mubr.msk.f32.vlgmr.msra.gmra.mxu0 %vm1075_vm2, %v7346_v21  ;;  %12511 = vmatprep.subr.msk.mxu1 %vm1075_vm2, %v7533_v44 }
 0xbbd   : > { %v12428_v24 = vpop.f32.mrf.mxu0  ;;  %12502 = vmatmul.mubr.msk.f32.vlgmr.msra.gmra.mxu1 %vm1075_vm2, %v7356_v27  ;;  %12505 = vmatpush3.xpose.msk.msra.mxu0 %vm1075_vm2, %v7523_v30 }
 0xbbe   : > { %12512 = vmatpush3.xpose.msk.msra.mxu1 %vm1075_vm2, %v7533_v44  ;;  %12506 = vmatprep.subr.msk.mxu0 %vm1075_vm2, %v7518_v22  ;;  %v7543_v36 = vadd.f32 %v12428_v24, %v15206_v29 }
 0xbbf   : > { %12513 = vmatprep.subr.msk.mxu1 %vm1075_vm2, %v7528_v13  ;;  %12508 = vmatprep.mubr.msk.f32.mxu0 %vm1075_vm2, %v7361_v12  ;;  %v7537_v11 = vpop.f32.mrf.mxu0 }
 0xbc0   : > { %12515 = vmatprep.mubr.msk.f32.mxu1 %vm1075_vm2, %v7371_v41  ;;  %v7538_v5 = vadd.f32 %v7537_v11, %v15206_v29  ;;  %v15293_v29 = vpop.f32.mrf.mxu1 }
 0xbc1   : > { %12507 = vmatpush3.xpose.msk.msra.mxu0 %vm1075_vm2, %v7518_v22 }
 0xbc2   : > { %12514 = vmatpush3.xpose.msk.msra.mxu1 %vm1075_vm2, %v7528_v13  ;;  %12518 = vmatprep.subr.msk.mxu0 %vm1075_vm2, %v7543_v36  ;;  %v15295_v8 = vpop.f32.mrf.mxu1 }
 0xbc4   : > { %12509 = vmatmul.mubr.msk.f32.vlgmr.msra.gmra.mxu0 %vm1075_vm2, %v7366_v34  ;;  %v15297_v35 = vpop.f32.mrf.mxu1 }
 0xbc5   : > { %12516 = vmatmul.mubr.msk.f32.vlgmr.msra.gmra.mxu1 %vm1075_vm2, %v7376_v37  ;;  %12519 = vmatpush3.xpose.msk.msra.mxu0 %vm1075_vm2, %v7543_v36 }
 0xbc6   : > { %12522 = vmatprep.mubr.msk.f32.mxu0 %vm1075_vm2, %v7381_v40  ;;  %12520 = vmatprep.subr.msk.mxu0 %vm1075_vm2, %v7538_v5  ;;  %v15299_v55 = vpop.f32.mrf.mxu1 }
 0xbc8   : > { %v15301_v57 = vpop.f32.mrf.mxu1 }
 0xbc9   : > { %12521 = vmatpush3.xpose.msk.msra.mxu0 %vm1075_vm2, %v7538_v5 }
 0xbca   : > { %v15303_v2 = vpop.f32.mrf.mxu1 }
 0xbcc   : > { %12523 = vmatmul.mubr.msk.f32.vlgmr.msra.gmra.mxu0 %vm1075_vm2, %v7386_v4  ;;  %v15305_v39 = vpop.f32.mrf.mxu1 }
 0xbce   : > { %v15307_v50 = vpop.f32.mrf.mxu1 }
 0xbd0   : > { %v15309_v43 = vpop.f32.mrf.mxu1 }
 0xbd2   : > { %v15311_v28 = vpop.f32.mrf.mxu1 }
 0xbd4   : > { %v15313_v63 = vpop.f32.mrf.mxu1 }
 0xbd6   : > { %v15315_v47 = vpop.f32.mrf.mxu1 }
 0xbd8   : > { %v15317_v42 = vpop.f32.mrf.mxu1 }
 0xbda   : > { %v15321_v6 = vpop.f32.mrf.mxu1 }
 0xbdc   : > { %v15329_v33 = vpop.f32.mrf.mxu1 }
 0xc6c   : > { %v12475_v52 = vpop.f32.mrf.mxu0 }
 0xc6d   : > { %v15319_v18 = vmul.f32 0.25, %v12475_v52 }
 0xc6e   : > { %v7781_v53 = vpop.f32.mrf.mxu0 }
 0xc6f   : > { %v15323_v31 = vmul.f32 0.25, %v7781_v53  ;;  %v8418_v25 = vsel %vm1075_vm2, %v15319_v18, -inf }
 0xc70   : > { %8419 = vmax.xlane.f32.xlu0 %v8418_v25 }
 0xc71   : > { %v8415_v10 = vsel %vm1075_vm2, %v15323_v31, -inf }
 0xc72   : > { %8416 = vmax.xlane.f32.xlu1 %v8415_v10 }
 0xc74   : > { %v12482_v62 = vpop.f32.mrf.mxu0 }
 0xc75   : > { %v15331_v38 = vmul.f32 0.25, %v12482_v62  ;;  %v12489_v59 = vpop.f32.mrf.mxu1 }
 0xc76   : > { %v7868_v15 = vpop.f32.mrf.mxu0  ;;  %v15341_v13 = vmul.f32 0.25, %v12489_v59 }
 0xc77   : > { %v8424_v30 = vsel %vm1075_vm2, %v15331_v38, -inf  ;;  %v15335_v0 = vmul.f32 0.25, %v7868_v15  ;;  %v7955_v26 = vpop.f32.mrf.mxu1 }
 0xc78   : > { %8425 = vmax.xlane.f32.xlu1 %v8424_v30  ;;  %v15337_v21 = vmul.f32 0.25, %v7955_v26  ;;  %v8430_v45 = vsel %vm1075_vm2, %v15341_v13, -inf }
 0xc79   : > { %v8421_v44 = vsel %vm1075_vm2, %v15335_v0, -inf }
 0xc7a   : > { %v8427_v24 = vsel %vm1075_vm2, %v15337_v21, -inf }
 0xc7c   : > { %8422 = vmax.xlane.f32.xlu1 %v8421_v44  ;;  %v12496_v27 = vpop.f32.mrf.mxu0 }
 0xc7d   : > { %v12503_v61 = vpop.f32.mrf.mxu1  ;;  %v15351_v11 = vmul.f32 0.25, %v12496_v27 }
 0xc7e   : > { %v8042_v22 = vpop.f32.mrf.mxu0  ;;  %v15357_v4 = vmul.f32 0.25, %v12503_v61 }
 0xc7f   : > { %v15343_v12 = vmul.f32 0.25, %v8042_v22  ;;  %v8129_v46 = vpop.f32.mrf.mxu1  ;;  %v8436_v25 = vsel %vm1075_vm2, %v15351_v11, -inf }
 0xc80   : > { %8428 = vmax.xlane.f32.xlu1 %v8427_v24  ;;  %v15347_v41 = vmul.f32 0.25, %v8129_v46  ;;  %v8442_v15 = vsel %vm1075_vm2, %v15357_v4, -inf }
 0xc81   : > { %v8433_v36 = vsel %vm1075_vm2, %v15343_v12, -inf }
 0xc82   : > { %8434 = vmax.xlane.f32.xlu0 %v8433_v36  ;;  %v8439_v5 = vsel %vm1075_vm2, %v15347_v41, -inf }
 0xc84   : > { %8431 = vmax.xlane.f32.xlu1 %v8430_v45  ;;  %v12510_v34 = vpop.f32.mrf.mxu0 }
 0xc85   : > { %v12517_v37 = vpop.f32.mrf.mxu1  ;;  %v15367_v59 = vmul.f32 0.25, %v12510_v34 }
 0xc86   : > { %8440 = vmax.xlane.f32.xlu0 %v8439_v5  ;;  %v8216_v40 = vpop.f32.mrf.mxu0  ;;  %v15373_v27 = vmul.f32 0.25, %v12517_v37 }
 0xc87   : > { %v8303_v52 = vpop.f32.mrf.mxu1  ;;  %v15359_v53 = vmul.f32 0.25, %v8216_v40  ;;  %v8448_v22 = vsel %vm1075_vm2, %v15367_v59, -inf }
 0xc88   : > { %8437 = vmax.xlane.f32.xlu1 %v8436_v25  ;;  %v15363_v10 = vmul.f32 0.25, %v8303_v52  ;;  %v8454_v36 = vsel %vm1075_vm2, %v15373_v27, -inf }
 0xc89   : > { %v8445_v62 = vsel %vm1075_vm2, %v15359_v53, -inf }
 0xc8a   : > { %8446 = vmax.xlane.f32.xlu0 %v8445_v62  ;;  %v8451_v26 = vsel %vm1075_vm2, %v15363_v10, -inf }
 0xc8c   : > { %8443 = vmax.xlane.f32.xlu1 %v8442_v15  ;;  %v12524_v30 = vpop.f32.mrf.mxu0 }
 0xc8d   : > { %v15381_v46 = vmul.f32 0.25, %v12524_v30 }
 0xc8e   : > { %8452 = vmax.xlane.f32.xlu0 %v8451_v26  ;;  %v8390_v44 = vpop.f32.mrf.mxu0 }
 0xc8f   : > { %v15375_v61 = vmul.f32 0.25, %v8390_v44  ;;  %v8460_v45 = vsel %vm1075_vm2, %v15381_v46, -inf }
 0xc90   : > { %8449 = vmax.xlane.f32.xlu1 %v8448_v22 }
 0xc91   : > { %v8457_v24 = vsel %vm1075_vm2, %v15375_v61, -inf }
 0xc92   : > { %8458 = vmax.xlane.f32.xlu0 %v8457_v24 }
 0xc94   : > { %8455 = vmax.xlane.f32.xlu1 %v8454_v36 }
 0xc98   : > { %8461 = vmax.xlane.f32.xlu1 %v8460_v45 }
 0xcf9   : > { %v8420_v34 = vpop.xlane.xlu0 %8419 }
 0xcfa   : > { %v8464_v37 = vsub.f32 %v15319_v18, %v8420_v34 }
 0xcfb   : > { %v8417_v5 = vpop.xlane.xlu1 %8416 }
 0xcfc   : > { %v8481_v40 = vmul.f32 1.442695, %v8464_v37  ;;  %v8463_v52 = vsub.f32 %v15323_v31, %v8417_v5 }
 0xcfe   : > { %12973 = vpow2.f32 %v8481_v40  ;;  %v8479_v25 = vmul.f32 1.442695, %v8463_v52 }
 0xd00   : > { %12975 = vpow2.f32 %v8479_v25 }
 0xd01   : > { %v8426_v62 = vpop.xlane.xlu1 %8425 }
 0xd02   : > { %v8466_v15 = vsub.f32 %v15331_v38, %v8426_v62 }
 0xd04   : > { %v8485_v30 = vmul.f32 1.442695, %v8466_v15 }
 0xd05   : > { %v8423_v26 = vpop.xlane.xlu1 %8422 }
 0xd06   : > { %12977 = vpow2.f32 %v8485_v30  ;;  %v8465_v44 = vsub.f32 %v15335_v0, %v8423_v26 }
 0xd08   : > { %v8483_v22 = vmul.f32 1.442695, %v8465_v44 }
 0xd09   : > { %v8429_v24 = vpop.xlane.xlu1 %8428 }
 0xd0a   : > { %12979 = vpow2.f32 %v8483_v22  ;;  %v8467_v18 = vsub.f32 %v15337_v21, %v8429_v24 }
 0xd0b   : > { %v15392_v36 = vpop.eup %12973  ;;  %v8435_v45 = vpop.xlane.xlu0 %8434 }
 0xd0c   : > { %v8487_v31 = vmul.f32 1.442695, %v8467_v18  ;;  %v8469_v34 = vsub.f32 %v15343_v12, %v8435_v45  ;;  %v8514_v37 = vsel %vm1075_vm2, %v15392_v36, 0.0 }
 0xd0d   : > { %v15397_v38 = vpop.eup %12975  ;;  %v8432_v5 = vpop.xlane.xlu1 %8431  ;;  %8515 = vadd.xlane.f32.xlu1 %v8514_v37 }
 0xd0e   : > { %12981 = vpow2.f32 %v8487_v31  ;;  %v8491_v0 = vmul.f32 1.442695, %v8469_v34  ;;  %v8468_v40 = vsub.f32 %v15341_v13, %v8432_v5  ;;  %v8511_v21 = vsel %vm1075_vm2, %v15397_v38, 0.0 }
 0xd0f   : > { %v8441_v52 = vpop.xlane.xlu0 %8440  ;;  %8512 = vadd.xlane.f32.xlu0 %v8511_v21 }
 0xd10   : > { %12983 = vpow2.f32 %v8491_v0  ;;  %v8489_v25 = vmul.f32 1.442695, %v8468_v40  ;;  %v8471_v12 = vsub.f32 %v15347_v41, %v8441_v52 }
 0xd11   : > { %v8438_v62 = vpop.xlane.xlu1 %8437 }
 0xd12   : > { %12985 = vpow2.f32 %v8489_v25  ;;  %v8495_v15 = vmul.f32 1.442695, %v8471_v12  ;;  %v8470_v30 = vsub.f32 %v15351_v11, %v8438_v62 }
 0xd13   : > { %v15404_v26 = vpop.eup %12977  ;;  %v8447_v44 = vpop.xlane.xlu0 %8446 }
 0xd14   : > { %12987 = vpow2.f32 %v8495_v15  ;;  %v8493_v22 = vmul.f32 1.442695, %v8470_v30  ;;  %v8473_v13 = vsub.f32 %v15359_v53, %v8447_v44  ;;  %v8520_v24 = vsel %vm1075_vm2, %v15404_v26, 0.0 }
 0xd15   : > { %v8444_v18 = vpop.xlane.xlu1 %8443  ;;  %8521 = vadd.xlane.f32.xlu1 %v8520_v24 }
 0xd16   : > { %12989 = vpow2.f32 %v8493_v22  ;;  %v8499_v45 = vmul.f32 1.442695, %v8473_v13  ;;  %v8472_v41 = vsub.f32 %v15357_v4, %v8444_v18 }
 0xd17   : > { %v15410_v31 = vpop.eup %12979  ;;  %v8453_v34 = vpop.xlane.xlu0 %8452 }
 0xd18   : > { %12991 = vpow2.f32 %v8499_v45  ;;  %v8497_v11 = vmul.f32 1.442695, %v8472_v41  ;;  %v8517_v37 = vsel %vm1075_vm2, %v15410_v31, 0.0  ;;  %v8475_v40 = vsub.f32 %v15363_v10, %v8453_v34 }
 0xd19   : > { %v8450_v5 = vpop.xlane.xlu1 %8449  ;;  %8518 = vadd.xlane.f32.xlu0 %v8517_v37 }
 0xd1a   : > { %12993 = vpow2.f32 %v8497_v11  ;;  %v8474_v53 = vsub.f32 %v15367_v59, %v8450_v5  ;;  %v8503_v30 = vmul.f32 1.442695, %v8475_v40 }
 0xd1b   : > { %v15415_v0 = vpop.eup %12981  ;;  %v8459_v25 = vpop.xlane.xlu0 %8458 }
 0xd1c   : > { %v8501_v21 = vmul.f32 1.442695, %v8474_v53  ;;  %v8523_v4 = vsel %vm1075_vm2, %v15415_v0, 0.0  ;;  %v8477_v59 = vsub.f32 %v15375_v61, %v8459_v25 }
 0xd1d   : > { %v15420_v52 = vpop.eup %12983  ;;  %v8456_v12 = vpop.xlane.xlu1 %8455  ;;  %8524 = vadd.xlane.f32.xlu0 %v8523_v4 }
 0xd1e   : > { %12995 = vpow2.f32 %v8501_v21  ;;  %v8476_v62 = vsub.f32 %v15373_v27, %v8456_v12  ;;  %v8529_v22 = vsel %vm1075_vm2, %v15420_v52, 0.0  ;;  %v8507_v27 = vmul.f32 1.442695, %v8477_v59 }
 0xd1f   : > { %v15423_v15 = vpop.eup %12985 }
 0xd20   : > { %v8505_v44 = vmul.f32 1.442695, %v8476_v62  ;;  %v8526_v10 = vsel %vm1075_vm2, %v15423_v15, 0.0 }
 0xd21   : > { %v15430_v13 = vpop.eup %12987  ;;  %8527 = vadd.xlane.f32.xlu1 %v8526_v10  ;;  %v8462_v24 = vpop.xlane.xlu1 %8461  ;;  %8530 = vadd.xlane.f32.xlu0 %v8529_v22 }
 0xd22   : > { %12997 = vpow2.f32 %v8505_v44  ;;  %v8478_v45 = vsub.f32 %v15381_v46, %v8462_v24  ;;  %v8535_v41 = vsel %vm1075_vm2, %v15430_v13, 0.0 }
 0xd23   : > { %v15432_v18 = vpop.eup %12989  ;;  %12999 = vpow2.f32 %v8503_v30 }
 0xd24   : > { %v8532_v61 = vsel %vm1075_vm2, %v15432_v18, 0.0  ;;  %13001 = vpow2.f32 %v8507_v27  ;;  %v8509_v37 = vmul.f32 1.442695, %v8478_v45 }
 0xd25   : > { %v15439_v34 = vpop.eup %12991  ;;  %8533 = vadd.xlane.f32.xlu1 %v8532_v61  ;;  %8536 = vadd.xlane.f32.xlu0 %v8535_v41 }
 0xd26   : > { %v8541_v46 = vsel %vm1075_vm2, %v15439_v34, 0.0  ;;  %13003 = vpow2.f32 %v8509_v37 }
 0xd27   : > { %v15441_v11 = vpop.eup %12993 }
 0xd28   : > { %v8538_v5 = vsel %vm1075_vm2, %v15441_v11, 0.0 }
 0xd29   : > { %8539 = vadd.xlane.f32.xlu1 %v8538_v5  ;;  %8542 = vadd.xlane.f32.xlu0 %v8541_v46 }
 0xd2b   : > { %v15447_v53 = vpop.eup %12995 }
 0xd2c   : > { %v8544_v40 = vsel %vm1075_vm2, %v15447_v53, 0.0 }
 0xd2d   : > { %8545 = vadd.xlane.f32.xlu1 %v8544_v40 }
 0xd2f   : > { %v15451_v21 = vpop.eup %12997 }
 0xd30   : > { %v15453_v4 = vpop.eup %12999  ;;  %v8550_v25 = vsel %vm1075_vm2, %v15451_v21, 0.0 }
 0xd31   : > { %8551 = vadd.xlane.f32.xlu1 %v8550_v25  ;;  %v8547_v12 = vsel %vm1075_vm2, %v15453_v4, 0.0  ;;  %v15459_v62 = vpop.eup %13001 }
 0xd32   : > { %v8553_v30 = vsel %vm1075_vm2, %v15459_v62, 0.0 }
 0xd33   : > { %v15463_v59 = vpop.eup %13003 }
 0xd34   : > { %v8556_v44 = vsel %vm1075_vm2, %v15463_v59, 0.0 }
 0xd35   : > { %8548 = vadd.xlane.f32.xlu1 %v8547_v12 }
 0xd39   : > { %8554 = vadd.xlane.f32.xlu1 %v8553_v30 }
 0xd3d   : > { %8557 = vadd.xlane.f32.xlu1 %v8556_v44 }
 0xd3f   : > { %7555 = vrot.lane.b32.xlu0 %v13618_v56, %s13230_s2 }
 0xd96   : > { %v8516_v22 = vpop.xlane.xlu1 %8515 }
 0xd98   : > { %v8513_v10 = vpop.xlane.xlu0 %8512 }
 0xd99   : > { %13005 = vrcp.f32 %v8513_v10 }
 0xd9e   : > { %v8522_v45 = vpop.xlane.xlu1 %8521 }
 0xda2   : > { %v8519_v24 = vpop.xlane.xlu0 %8518 }
 0xda3   : > { %13007 = vrcp.f32 %v8519_v24 }
 0xda4   : > { %13009 = vrcp.f32 %v8516_v22 }
 0xda5   : > { %13011 = vrcp.f32 %v8522_v45 }
 0xda6   : > { %v13006_v27 = vpop.eup %13005  ;;  %v8525_v61 = vpop.xlane.xlu0 %8524 }
 0xda7   : > { %v8575_v41 = vmul.f32 %v13006_v27, %v15397_v38  ;;  %13013 = vrcp.f32 %v8525_v61 }
 0xda9   : > { %12529 = vmatprep.mubr.msk.f32.mxu1 %vm1075_vm2, %v8575_v41 }
 0xdaa   : > { %v8528_v37 = vpop.xlane.xlu1 %8527  ;;  %v8531_v5 = vpop.xlane.xlu0 %8530 }
 0xdab   : > { %13015 = vrcp.f32 %v8531_v5 }
 0xdac   : > { %13017 = vrcp.f32 %v8528_v37 }
 0xdae   : > { %v8534_v46 = vpop.xlane.xlu1 %8533  ;;  %v8537_v56 = vpop.xlane.xlu0 %8536 }
 0xdaf   : > { %13019 = vrcp.f32 %v8534_v46 }
 0xdb0   : > { %v13008_v40 = vpop.eup %13007  ;;  %13021 = vrcp.f32 %v8537_v56 }
 0xdb1   : > { %v8577_v25 = vmul.f32 %v13008_v40, %v15410_v31  ;;  %v13010_v10 = vpop.eup %13009 }
 0xdb2   : > { %v8540_v12 = vpop.xlane.xlu1 %8539  ;;  %v8543_v30 = vpop.xlane.xlu0 %8542  ;;  %v8576_v5 = vmul.f32 %v13010_v10, %v15392_v36 }
 0xdb3   : > { %12536 = vmatprep.mubr.msk.f32.mxu0 %vm1075_vm2, %v8577_v25  ;;  %13023 = vrcp.f32 %v8543_v30  ;;  %v13012_v27 = vpop.eup %13011 }
 0xdb4   : > { %13025 = vrcp.f32 %v8540_v12  ;;  %v13014_v61 = vpop.eup %13013 }
 0xdb5   : > { %v8579_v46 = vmul.f32 %v13014_v61, %v15415_v0 }
 0xdb6   : > { %v8546_v38 = vpop.xlane.xlu1 %8545  ;;  %v15473_v44 = vpop.permute.xlu0 %7555 }
 0xdb7   : > { %13027 = vrcp.f32 %v8546_v38  ;;  %v7630_v22 = vadd.f32 %v15291_v58, %v15473_v44  ;;  %v7640_v24 = vadd.f32 %v15295_v8, %v15473_v44  ;;  %v7625_v31 = vadd.f32 %v15293_v29, %v15473_v44 }
 0xdb8   : > { %v7635_v45 = vadd.f32 %v15297_v35, %v15473_v44  ;;  %v13016_v37 = vpop.eup %13015  ;;  %v8578_v58 = vmul.f32 %v13012_v27, %v15404_v26  ;;  %v7650_v8 = vadd.f32 %v15299_v55, %v15473_v44  ;;  %v7660_v29 = vadd.f32 %v15303_v2, %v15473_v44 }
 0xdb9   : > { %12525 = vmatprep.subr.mxu1 %v7630_v22  ;;  %12532 = vmatprep.subr.mxu0 %v7640_v24  ;;  %v13018_v35 = vpop.eup %13017  ;;  %v8581_v56 = vmul.f32 %v13016_v37, %v15420_v52  ;;  %v7645_v55 = vadd.f32 %v15301_v57, %v15473_v44  ;;  %v7655_v2 = vadd.f32 %v15305_v39, %v15473_v44 }
 0xdba   : > { %v8552_v41 = vpop.xlane.xlu1 %8551  ;;  %12526 = vmatpush3.msra.mxu1 %v7630_v22  ;;  %12533 = vmatpush3.msra.mxu0 %v7640_v24  ;;  %v8580_v25 = vmul.f32 %v13018_v35, %v15423_v15  ;;  %v7670_v52 = vadd.f32 %v15307_v50, %v15473_v44  ;;  %v7680_v57 = vadd.f32 %v15311_v28, %v15473_v44 }
 0xdbb   : > { %12527 = vmatprep.subr.mxu1 %v7625_v31  ;;  %12534 = vmatprep.subr.mxu0 %v7635_v45  ;;  %13029 = vrcp.f32 %v8552_v41  ;;  %v7665_v50 = vadd.f32 %v15309_v43, %v15473_v44  ;;  %v7675_v28 = vadd.f32 %v15313_v63, %v15473_v44  ;;  %v7700_v43 = vadd.f32 %v15321_v6, %v15473_v44 }
 0xdbc   : > { %12528 = vmatpush3.msra.mxu1 %v7625_v31  ;;  %12535 = vmatpush3.msra.mxu0 %v7635_v45  ;;  %v13020_v36 = vpop.eup %13019  ;;  %v7685_v63 = vadd.f32 %v15317_v42, %v15473_v44  ;;  %v10848_v31 = vld [vmem:[%s13386_s23 + $0x38] sm:$0xff] }
 0xdbd   : > { %12530 = vmatmul.mubr.msk.f32.vlgmr.msra.gmra.mxu1 %vm1075_vm2, %v8576_v5  ;;  %12537 = vmatmul.mubr.msk.f32.vlgmr.msra.gmra.mxu0 %vm1075_vm2, %v8578_v58  ;;  %v13022_v40 = vpop.eup %13021  ;;  %v8582_v12 = vmul.f32 %v13020_v36, %v15432_v18 }
 0xdbe   : > { %12539 = vmatprep.subr.mxu1 %v7650_v8  ;;  %12546 = vmatprep.subr.mxu0 %v7660_v29  ;;  %v8549_v26 = vpop.xlane.xlu1 %8548  ;;  %v8583_v15 = vmul.f32 %v13022_v40, %v15430_v13  ;;  %v9532_v40 = vld [vmem:[%s13391_s19 + $0x28] sm:$0xff] }
 0xdbf   : > { %13031 = vrcp.f32 %v8549_v26  ;;  %12540 = vmatpush3.msra.mxu1 %v7650_v8  ;;  %12543 = vmatprep.mubr.msk.f32.mxu1 %vm1075_vm2, %v8579_v46 }
 0xdc0   : > { %12547 = vmatpush3.msra.mxu0 %v7660_v29  ;;  %12550 = vmatprep.mubr.msk.f32.mxu0 %vm1075_vm2, %v8581_v56  ;;  %v13024_v0 = vpop.eup %13023 }
 0xdc1   : > { %12541 = vmatprep.subr.mxu1 %v7645_v55  ;;  %12548 = vmatprep.subr.mxu0 %v7655_v2  ;;  %v13026_v30 = vpop.eup %13025  ;;  %v8585_v18 = vmul.f32 %v13024_v0, %v15439_v34  ;;  %v7690_v34 = vadd.f32 %v15315_v47, %v15473_v44  ;;  %v7695_v47 = vadd.f32 %v15329_v33, %v15473_v44  ;;  %v9531_v0 = vld [vmem:[%s13391_s19 + $0x20] sm:$0xff] }
 0xdc2   : > { %12542 = vmatpush3.msra.mxu1 %v7645_v55  ;;  %12549 = vmatpush3.msra.mxu0 %v7655_v2  ;;  %v8555_v39 = vpop.xlane.xlu1 %8554  ;;  %v8584_v22 = vmul.f32 %v13026_v30, %v15441_v11  ;;  %v9533_v2 = vld [vmem:[%s13391_s19 + $0x30] sm:$0xff] }
 0xdc3   : > { %12544 = vmatmul.mubr.msk.f32.vlgmr.msra.gmra.mxu1 %vm1075_vm2, %v8580_v25  ;;  %12551 = vmatmul.mubr.msk.f32.vlgmr.msra.gmra.mxu0 %vm1075_vm2, %v8582_v12  ;;  %13033 = vrcp.f32 %v8555_v39  ;;  %v9530_v25 = vld [vmem:[%s13391_s19 + $0x18] sm:$0xff]  ;;  %v9529_v12 = vld [vmem:[%s13391_s19 + $0x10] sm:$0xff]  ;;  %v16138_v39 = vld [vmem:[#allocation15_spill] sm:$0xff] }
 0xdc4   : > { %v13028_v38 = vpop.eup %13027  ;;  %12553 = vmatprep.subr.mxu1 %v7670_v52  ;;  %12560 = vmatprep.subr.mxu0 %v7680_v57  ;;  %v9453_v30 = vsub.s32 3, %v16138_v39 }
 0xdc5   : > { %12554 = vmatpush3.msra.mxu1 %v7670_v52  ;;  %12557 = vmatprep.mubr.msk.f32.mxu1 %vm1075_vm2, %v8583_v15  ;;  %v8586_v13 = vmul.f32 %v13028_v38, %v15447_v53  ;;  %v9528_v52 = vld [vmem:[%s13391_s19 + $0x8] sm:$0xff] }
 0xdc6   : > { %12561 = vmatpush3.msra.mxu0 %v7680_v57  ;;  %12555 = vmatprep.subr.mxu1 %v7665_v50  ;;  %v8558_v10 = vpop.xlane.xlu1 %8557  ;;  %v9527_v57 = vld [vmem:[%s13391_s19] sm:$0xff]  ;;  %v16139_v15 = vld [vmem:[#allocation24_spill] sm:$0xff] }
 0xdc7   : > { %12562 = vmatprep.subr.mxu0 %v7675_v28  ;;  %12564 = vmatprep.mubr.msk.f32.mxu0 %vm1075_vm2, %v8585_v18  ;;  %13035 = vrcp.f32 %v8558_v10  ;;  %v16140_v18 = vld [vmem:[#allocation16_spill] sm:$0xff] }
 0xdc8   : > { %12556 = vmatpush3.msra.mxu1 %v7665_v50  ;;  %12563 = vmatpush3.msra.mxu0 %v7675_v28  ;;  %v13030_v11 = vpop.eup %13029  ;;  %v4935_v38 = vadd.f32 %v16140_v18, %v16139_v15  ;;  %v15565_v50 = vld [vmem:[%s13403_s22] sm:$0xff] }
 0xdc9   : > { %12558 = vmatmul.mubr.msk.f32.vlgmr.msra.gmra.mxu1 %vm1075_vm2, %v8584_v22  ;;  %12567 = vmatprep.subr.mxu1 %v7690_v34  ;;  %v8588_v24 = vmul.f32 %v13030_v11, %v15451_v21  ;;  %v10847_v21 = vld [vmem:[%s13386_s23 + $0x30] sm:$0xff]  ;;  %v15568_v28 = vrot.slane %v15565_v50, %v9453_v30  ;;  %v9489_v22 = vsub.s32 4, %v16138_v39 }
 0xdca   : > { %12574 = vmatprep.subr.mxu0 %v7700_v43  ;;  %12568 = vmatpush3.msra.mxu1 %v7690_v34  ;;  %v16142_v11 = vld [vmem:[#allocation17_spill] sm:$0xff] }
 0xdcb   : > { %12565 = vmatmul.mubr.msk.f32.vlgmr.msra.gmra.mxu0 %vm1075_vm2, %v8586_v13  ;;  %12569 = vmatprep.subr.mxu1 %v7685_v63  ;;  %v7216_v13 = vadd.f32 %v15160_v3, %v4935_v38 }
 0xdcc   : > { %v13032_v53 = vpop.eup %13031  ;;  %12575 = vmatpush3.msra.mxu0 %v7700_v43  ;;  %12570 = vmatpush3.msra.mxu1 %v7685_v63  ;;  %v16141_v63 = vld [vmem:[#allocation25_spill] sm:$0xff] }
 0xdcd   : > { %12576 = vmatprep.subr.mxu0 %v7695_v47  ;;  %v8587_v6 = vmul.f32 %v13032_v53, %v15453_v4  ;;  %12581 = vmatprep.subr.mxu1 %v10848_v31  ;;  %v9534_v4 = vld [vmem:[%s13391_s19 + $0x38] sm:$0xff] }
 0xdce   : > { %12577 = vmatpush3.msra.mxu0 %v7695_v47  ;;  %v4945_v47 = vadd.f32 %v16142_v11, %v16141_v63  ;;  %v13123_v11 = vld [vmem:[#allocation2 + $0x20] sm:$0xff] }
 0xdcf   : > { %12571 = vmatprep.mubr.msk.f32.mxu1 %vm1075_vm2, %v8587_v6  ;;  %12609 = vmatprep.subr.mxu0 %v9534_v4 }
 0xdd0   : > { %v13034_v42 = vpop.eup %13033  ;;  %12572 = vmatmul.mubr.msk.f32.vlgmr.msra.gmra.mxu1 %vm1075_vm2, %v8588_v24  ;;  %v15577_v24 = vrot.slane %v15565_v50, %v9489_v22  ;;  %v16148_v22 = vld [vmem:[#allocation20_spill] sm:$0xff] }
 0xdd1   : > { %v8589_v27 = vmul.f32 %v13034_v42, %v15459_v62  ;;  %12582 = vmatpush3.msra.mxu1 %v10848_v31  ;;  %v9509_v42 = vsub.s32 5, %v16138_v39 }
 0xdd2   : > { %12583 = vmatprep.subr.mxu1 %v10847_v21 }
 0xdd3   : > { %12578 = vmatprep.mubr.msk.f32.mxu0 %vm1075_vm2, %v8589_v27  ;;  %12584 = vmatpush3.msra.mxu1 %v10847_v21 }
 0xdd4   : > { %v13036_v33 = vpop.eup %13035 }
 0xdd5   : > { %v8590_v44 = vmul.f32 %v13036_v33, %v15463_v59  ;;  %v7218_v33 = vadd.f32 %v15166_v54, %v4945_v47 }
 0xdd7   : > { %12579 = vmatmul.mubr.msk.f32.vlgmr.msra.gmra.mxu0 %vm1075_vm2, %v8590_v44  ;;  %v13118_v44 = vld [vmem:[#allocation2 + $0x8] sm:$0xff] }
 0xdd8   : > { %12610 = vmatpush3.msra.mxu0 %v9534_v4  ;;  %v16143_v4 = vld [vmem:[#allocation26_spill] sm:$0xff] }
 0xdd9   : > { %12611 = vmatprep.subr.mxu0 %v9533_v2 }
 0xdda   : > { %12612 = vmatpush3.msra.mxu0 %v9533_v2 }
 0xddb   : > { %12613 = vmatprep.subr.mxu0 %v9532_v40 }
 0xddc   : > { %12614 = vmatpush3.msra.mxu0 %v9532_v40  ;;  %v13121_v40 = vld [vmem:[#allocation2 + $0x10] sm:$0xff] }
 0xddd   : > { %12615 = vmatprep.subr.mxu0 %v9531_v0 }
 0xdde   : > { %12616 = vmatpush3.msra.mxu0 %v9531_v0 }
 0xddf   : > { %12617 = vmatprep.subr.mxu0 %v9530_v25 }
 0xde0   : > { %12618 = vmatpush3.msra.mxu0 %v9530_v25 }
 0xde1   : > { %12619 = vmatprep.subr.mxu0 %v9529_v12 }
 0xde2   : > { %12620 = vmatpush3.msra.mxu0 %v9529_v12 }
 0xde3   : > { %12621 = vmatprep.subr.mxu0 %v9528_v52 }
 0xde4   : > { %12622 = vmatpush3.msra.mxu0 %v9528_v52 }
 0xde5   : > { %12623 = vmatprep.subr.mxu0 %v9527_v57 }
 0xde6   : > { %12624 = vmatpush3.msra.mxu0 %v9527_v57 }
 0xe7d   : > { %v12531_v45 = vpop.f32.mrf.mxu1  ;;  %v12538_v61 = vpop.f32.mrf.mxu0 }
 0xe7f   : > { %v8663_v41 = vpop.f32.mrf.mxu1  ;;  %v8744_v62 = vpop.f32.mrf.mxu0 }
 0xe80   : > { %12585 = vmatprep.mubr.msk.f32.mxu1 %vm1075_vm2, %v8663_v41  ;;  %v13119_v41 = vld [vmem:[#allocation2] sm:$0xff] }
 0xe81   : > { %12586 = vmatmul.mubr.msk.f32.vlgmr.msra.gmra.mxu1 %vm1075_vm2, %v12531_v45  ;;  %v16144_v45 = vld [vmem:[#allocation18_spill] sm:$0xff] }
 0xe82   : > { %12588 = vmatprep.mubr.msk.f32.mxu1 %vm1075_vm2, %v8744_v62 }
 0xe83   : > { %v12545_v59 = vpop.f32.mrf.mxu1  ;;  %v12552_v37 = vpop.f32.mrf.mxu0 }
 0xe85   : > { %v8825_v5 = vpop.f32.mrf.mxu1  ;;  %12589 = vmatmul.mubr.msk.f32.gmra.mxu1 %vm1075_vm2, %v12538_v61  ;;  %v8906_v58 = vpop.f32.mrf.mxu0  ;;  %v4955_v61 = vadd.f32 %v16144_v45, %v16143_v4  ;;  %v16149_v4 = vld [vmem:[#allocation29_spill] sm:$0xff] }
 0xe86   : > { %12591 = vmatprep.mubr.msk.f32.mxu1 %vm1075_vm2, %v8825_v5  ;;  %v16150_v45 = vld [vmem:[#allocation21_spill] sm:$0xff] }
 0xe89   : > { %v12559_v8 = vpop.f32.mrf.mxu1  ;;  %12592 = vmatmul.mubr.msk.f32.gmra.mxu1 %vm1075_vm2, %v12545_v59 }
 0xe8a   : > { %12594 = vmatprep.mubr.msk.f32.mxu1 %vm1075_vm2, %v8906_v58  ;;  %v15588_v58 = vrot.slane %v15565_v50, %v9509_v42 }
 0xe8b   : > { %v8987_v29 = vpop.f32.mrf.mxu1  ;;  %v12566_v35 = vpop.f32.mrf.mxu0 }
 0xe8d   : > { %12595 = vmatmul.mubr.msk.f32.gmra.mxu1 %vm1075_vm2, %v12552_v37  ;;  %v9068_v46 = vpop.f32.mrf.mxu0 }
 0xe8e   : > { %12597 = vmatprep.mubr.msk.f32.mxu1 %vm1075_vm2, %v8987_v29 }
 0xe90   : > { %v12573_v36 = vpop.f32.mrf.mxu1 }
 0xe91   : > { %12598 = vmatmul.mubr.msk.f32.gmra.mxu1 %vm1075_vm2, %v12559_v8  ;;  %v7220_v8 = vadd.f32 %v15172_v23, %v4955_v61 }
 0xe92   : > { %12600 = vmatprep.mubr.msk.f32.mxu1 %vm1075_vm2, %v9068_v46  ;;  %v9149_v26 = vpop.f32.mrf.mxu1 }
 0xe95   : > { %12601 = vmatmul.mubr.msk.f32.gmra.mxu1 %vm1075_vm2, %v12566_v35 }
 0xe96   : > { %12603 = vmatprep.mubr.msk.f32.mxu1 %vm1075_vm2, %v9149_v26 }
 0xe97   : > { %v12580_v56 = vpop.f32.mrf.mxu0 }
 0xe99   : > { %v9230_v55 = vpop.f32.mrf.mxu0  ;;  %12604 = vmatmul.mubr.msk.f32.gmra.mxu1 %vm1075_vm2, %v12573_v36 }
 0xe9a   : > { %12606 = vmatprep.mubr.msk.f32.mxu1 %vm1075_vm2, %v9230_v55  ;;  %v16146_v55 = vld [vmem:[#allocation19_spill] sm:$0xff] }
 0xe9d   : > { %12607 = vmatmul.mubr.msk.f32.gmra.mxu1 %vm1075_vm2, %v12580_v56  ;;  %v16145_v56 = vld [vmem:[#allocation27_spill] sm:$0xff] }
 0xe9e   : > { %v4965_v2 = vadd.f32 %v16146_v55, %v16145_v56  ;;  %v16152_v56 = vld [vmem:[#allocation22_spill] sm:$0xff] }
 0xf41   : > { %v12587_v10 = vpop.f32.mrf.mxu1 }
 0xf42   : > { %v9436_v34 = vadd.f32 %v12587_v10, %v15158_v7  ;;  %v16147_v10 = vld [vmem:[#allocation28_spill] sm:$0xff] }
 0xf43   : > { %v9356_v43 = vpop.f32.mrf.mxu1 }
 0xf44   : > { %v9456_v53 = vadd.f32 %v15568_v28, %v9436_v34  ;;  %v9435_v6 = vadd.f32 %v9356_v43, %v7216_v13  ;;  %v4975_v13 = vadd.f32 %v16148_v22, %v16147_v10  ;;  %v13122_v34 = vld [vmem:[#allocation2 + $0x28] sm:$0xff]  ;;  %v13128_v22 = vld [vmem:[#allocation2 + $0x58] sm:$0xff] }
 0xf45   : > { %v12590_v27 = vpop.f32.mrf.mxu1 }
 0xf46   : > { %v9472_v31 = vadd.f32 %v13118_v44, %v9456_v53  ;;  %v9455_v3 = vadd.f32 %v15568_v28, %v9435_v6  ;;  %v9438_v7 = vadd.f32 %v12590_v27, %v15164_v32  ;;  %v13120_v32 = vld [vmem:[#allocation2 + $0x18] sm:$0xff] }
 0xf47   : > { %v9366_v21 = vpop.f32.mrf.mxu1 }
 0xf48   : > { %v9471_v62 = vadd.f32 %v13119_v41, %v9455_v3  ;;  %v9458_v59 = vadd.f32 %v15568_v28, %v9438_v7  ;;  %v9437_v37 = vadd.f32 %v9366_v21, %v7218_v33  ;;  %v9492_v5 = vmul.f32 %v15577_v24, %v9472_v31  ;;  %v13124_v31 = vld [vmem:[#allocation2 + $0x38] sm:$0xff]  ;;  %v13125_v41 = vld [vmem:[#allocation2 + $0x30] sm:$0xff] }
 0xf49   : > { %v12593_v54 = vpop.f32.mrf.mxu1 }
 0xf4a   : > { %v9491_v29 = vmul.f32 %v15577_v24, %v9471_v62  ;;  %v9474_v35 = vadd.f32 %v13120_v32, %v9458_v59  ;;  %v9457_v46 = vadd.f32 %v15568_v28, %v9437_v37  ;;  %v9440_v36 = vadd.f32 %v12593_v54, %v15170_v19 }
 0xf4b   : > { %v9376_v26 = vpop.f32.mrf.mxu1  ;;  %v15600_v23 = vadd.f32 %v15588_v58, %v9492_v5  ;;  %v7222_v19 = vadd.f32 %v15178_v16, %v4965_v2 }
 0xf4c   : > { %v9473_v0 = vadd.f32 %v13121_v40, %v9457_v46  ;;  %v9439_v25 = vadd.f32 %v9376_v26, %v7220_v8  ;;  %v15597_v12 = vadd.f32 %v15588_v58, %v9491_v29  ;;  %v9494_v52 = vmul.f32 %v15577_v24, %v9474_v35  ;;  %v13126_v35 = vld [vmem:[#allocation2 + $0x48] sm:$0xff]  ;;  %v16151_v26 = vld [vmem:[#allocation30_spill] sm:$0xff]  ;;  %v13127_v40 = vld [vmem:[#allocation2 + $0x40] sm:$0xff] }
 0xf4d   : > { %v9460_v57 = vadd.f32 %v15568_v28, %v9440_v36  ;;  %v12596_v30 = vpop.f32.mrf.mxu1  ;;  %v4995_v55 = vadd.f32 %v16152_v56, %v16151_v26  ;;  %v9892_v26 = vld [vmem:[%s13398_s9 + $0x68] sm:$0xff]  ;;  %v9890_v56 = vld [vmem:[%s13398_s9 + $0x58] sm:$0xff] }
 0xf4e   : > { %v9493_v15 = vmul.f32 %v15577_v24, %v9473_v0  ;;  %v9459_v18 = vadd.f32 %v15568_v28, %v9439_v25  ;;  %v9442_v38 = vadd.f32 %v12596_v30, %v15176_v48  ;;  %12625 = vmatprep.mubr.msk.f32.mxu0 %vm567_vm1, %v15597_v12  ;;  %v7224_v48 = vadd.f32 %v15184_v9, %v4975_v13 }
 0xf4f   : > { %v9476_v43 = vadd.f32 %v13122_v34, %v9460_v57  ;;  %v9386_v63 = vpop.f32.mrf.mxu1  ;;  %12626 = vmatmul.mubr.msk.f32.vlgmr.msra.gmra.mxu0 %vm567_vm1, %v15600_v23  ;;  %v15620_v42 = vadd.f32 %v15588_v58, %v9494_v52  ;;  %v4985_v9 = vadd.f32 %v16150_v45, %v16149_v4  ;;  %v7228_v57 = vadd.f32 %v15196_v1, %v4995_v55  ;;  %v13129_v34 = vld [vmem:[#allocation2 + $0x50] sm:$0xff] }
 0xf50   : > { %v9475_v16 = vadd.f32 %v13123_v11, %v9459_v18  ;;  %v9462_v47 = vadd.f32 %v15568_v28, %v9442_v38  ;;  %v9441_v53 = vadd.f32 %v9386_v63, %v7222_v19  ;;  %v15616_v6 = vadd.f32 %v15588_v58, %v9493_v15  ;;  %v9889_v55 = vld [vmem:[%s13398_s9 + $0x50] sm:$0xff] }
 0xf51   : > { %v9496_v27 = vmul.f32 %v15577_v24, %v9476_v43  ;;  %v12599_v33 = vpop.f32.mrf.mxu1  ;;  %v7226_v5 = vadd.f32 %v15190_v51, %v4985_v9 }
 0xf52   : > { %v9495_v44 = vmul.f32 %v15577_v24, %v9475_v16  ;;  %v9478_v3 = vadd.f32 %v13124_v31, %v9462_v47  ;;  %v9461_v7 = vadd.f32 %v15568_v28, %v9441_v53  ;;  %v9444_v21 = vadd.f32 %v12599_v33, %v15182_v60  ;;  %12628 = vmatprep.mubr.msk.f32.mxu0 %vm567_vm1, %v15616_v6 }
 0xf53   : > { %v9396_v61 = vpop.f32.mrf.mxu1  ;;  %12629 = vmatmul.mubr.msk.f32.gmra.mxu0 %vm567_vm1, %v15620_v42  ;;  %v15635_v54 = vadd.f32 %v15588_v58, %v9496_v27  ;;  %v13130_v27 = vld [vmem:[#allocation2 + $0x68] sm:$0xff] }
 0xf54   : > { %v9477_v62 = vadd.f32 %v13125_v41, %v9461_v7  ;;  %v9464_v59 = vadd.f32 %v15568_v28, %v9444_v21  ;;  %v9443_v37 = vadd.f32 %v9396_v61, %v7224_v48  ;;  %v15638_v8 = vadd.f32 %v15588_v58, %v9495_v44  ;;  %v13131_v7 = vld [vmem:[#allocation2 + $0x60] sm:$0xff] }
 0xf55   : > { %v12602_v60 = vpop.f32.mrf.mxu1  ;;  %v9498_v29 = vmul.f32 %v15577_v24, %v9478_v3 }
 0xf56   : > { %v9497_v32 = vmul.f32 %v15577_v24, %v9477_v62  ;;  %v9480_v46 = vadd.f32 %v13126_v35, %v9464_v59  ;;  %v9463_v36 = vadd.f32 %v15568_v28, %v9443_v37  ;;  %v9446_v51 = vadd.f32 %v12602_v60, %v15188_v17  ;;  %12631 = vmatprep.mubr.msk.f32.mxu0 %vm567_vm1, %v15638_v8  ;;  %v13132_v62 = vld [vmem:[#allocation2 + $0x78] sm:$0xff] }
 0xf57   : > { %v9406_v2 = vpop.f32.mrf.mxu1  ;;  %12632 = vmatmul.mubr.msk.f32.gmra.mxu0 %vm567_vm1, %v15635_v54  ;;  %v15657_v15 = vadd.f32 %v15588_v58, %v9498_v29 }
 0xf58   : > { %v9479_v0 = vadd.f32 %v13127_v40, %v9463_v36  ;;  %v9445_v25 = vadd.f32 %v9406_v2, %v7226_v5  ;;  %v15651_v52 = vadd.f32 %v15588_v58, %v9497_v32  ;;  %v9500_v30 = vmul.f32 %v15577_v24, %v9480_v46  ;;  %v9893_v36 = vld [vmem:[%s13398_s9 + $0x70] sm:$0xff]  ;;  %v9887_v2 = vld [vmem:[%s13398_s9 + $0x40] sm:$0xff]  ;;  %v9886_v40 = vld [vmem:[%s13398_s9 + $0x38] sm:$0xff] }
 0xf59   : > { %v9466_v19 = vadd.f32 %v15568_v28, %v9446_v51  ;;  %v12605_v17 = vpop.f32.mrf.mxu1  ;;  %v9888_v51 = vld [vmem:[%s13398_s9 + $0x48] sm:$0xff] }
 0xf5a   : > { %v9499_v18 = vmul.f32 %v15577_v24, %v9479_v0  ;;  %v9465_v38 = vadd.f32 %v15568_v28, %v9445_v25  ;;  %v9448_v10 = vadd.f32 %v12605_v17, %v15194_v14  ;;  %12634 = vmatprep.mubr.msk.f32.mxu0 %vm567_vm1, %v15651_v52  ;;  %v15671_v47 = vadd.f32 %v15588_v58, %v9500_v30  ;;  %v9885_v0 = vld [vmem:[%s13398_s9 + $0x30] sm:$0xff]  ;;  %v9884_v25 = vld [vmem:[%s13398_s9 + $0x28] sm:$0xff]  ;;  %v9882_v30 = vld [vmem:[%s13398_s9 + $0x18] sm:$0xff] }
 0xf5b   : > { %v9482_v13 = vadd.f32 %v13128_v22, %v9466_v19  ;;  %v9416_v1 = vpop.f32.mrf.mxu1  ;;  %12635 = vmatmul.mubr.msk.f32.gmra.mxu0 %vm567_vm1, %v15657_v15  ;;  %v9881_v19 = vld [vmem:[%s13398_s9 + $0x10] sm:$0xff]  ;;  %v9880_v17 = vld [vmem:[%s13398_s9 + $0x8] sm:$0xff] }
 0xf5c   : > { %v9481_v43 = vadd.f32 %v13129_v34, %v9465_v38  ;;  %v9468_v63 = vadd.f32 %v15568_v28, %v9448_v10  ;;  %v9447_v11 = vadd.f32 %v9416_v1, %v7228_v57  ;;  %v15668_v16 = vadd.f32 %v15588_v58, %v9499_v18  ;;  %v9883_v57 = vld [vmem:[%s13398_s9 + $0x20] sm:$0xff] }
 0xf5d   : > { %v9502_v14 = vmul.f32 %v15577_v24, %v9482_v13  ;;  %v12608_v53 = vpop.f32.mrf.mxu1  ;;  %v9879_v18 = vld [vmem:[%s13398_s9] sm:$0xff] }
 0xf5e   : > { %v9501_v48 = vmul.f32 %v15577_v24, %v9481_v43  ;;  %v9484_v33 = vadd.f32 %v13130_v27, %v9468_v63  ;;  %v9467_v44 = vadd.f32 %v15568_v28, %v9447_v11  ;;  %v9450_v31 = vadd.f32 %v12608_v53, %v15204_v49  ;;  %12637 = vmatprep.mubr.msk.f32.mxu0 %vm567_vm1, %v15668_v16  ;;  %v15739_v38 = vld [vmem:[%s498_s3] ss:$0 sm:$0xff] }
 0xf5f   : > { %v9426_v3 = vpop.f32.mrf.mxu1  ;;  %12638 = vmatmul.mubr.msk.f32.gmra.mxu0 %vm567_vm1, %v15671_v47  ;;  %v15684_v9 = vadd.f32 %v15588_v58, %v9502_v14 }
 0xf60   : > { %v9483_v21 = vadd.f32 %v13131_v7, %v9467_v44  ;;  %v9470_v4 = vadd.f32 %v15568_v28, %v9450_v31  ;;  %v9449_v45 = vadd.f32 %v9426_v3, %v15208_v20  ;;  %v15687_v61 = vadd.f32 %v15588_v58, %v9501_v48  ;;  %v13133_v20 = vld [vmem:[#allocation2 + $0x70] sm:$0xff] }
 0xf61   : > { %v9504_v49 = vmul.f32 %v15577_v24, %v9484_v33 }
 0xf62   : > { %v9503_v41 = vmul.f32 %v15577_v24, %v9483_v21  ;;  %v9486_v59 = vadd.f32 %v13132_v62, %v9470_v4  ;;  %v9469_v37 = vadd.f32 %v15568_v28, %v9449_v45  ;;  %12640 = vmatprep.mubr.msk.f32.mxu0 %vm567_vm1, %v15687_v61 }
 0xf63   : > { %12641 = vmatmul.mubr.msk.f32.gmra.mxu0 %vm567_vm1, %v15684_v9  ;;  %v15700_v29 = vadd.f32 %v15588_v58, %v9504_v49 }
 0xf64   : > { %v9485_v5 = vadd.f32 %v13133_v20, %v9469_v37  ;;  %v15697_v60 = vadd.f32 %v15588_v58, %v9503_v41  ;;  %v9506_v32 = vmul.f32 %v15577_v24, %v9486_v59 }
 0xf66   : > { %v9505_v28 = vmul.f32 %v15577_v24, %v9485_v5  ;;  %12643 = vmatprep.mubr.msk.f32.mxu0 %vm567_vm1, %v15697_v60  ;;  %v15712_v46 = vadd.f32 %v15588_v58, %v9506_v32  ;;  %v9894_v24 = vld [vmem:[%s13398_s9 + $0x78] sm:$0xff] }
 0xf67   : > { %12644 = vmatmul.mubr.msk.f32.gmra.mxu0 %vm567_vm1, %v15700_v29  ;;  %12649 = vmatprep.subr.mxu1 %v9894_v24 }
 0xf68   : > { %v15709_v35 = vadd.f32 %v15588_v58, %v9505_v28  ;;  %12650 = vmatpush3.msra.mxu1 %v9894_v24  ;;  %v9891_v58 = vld [vmem:[%s13398_s9 + $0x60] sm:$0xff] }
 0xf69   : > { %12651 = vmatprep.subr.mxu1 %v9893_v36 }
 0xf6a   : > { %12646 = vmatprep.mubr.msk.f32.mxu0 %vm567_vm1, %v15709_v35  ;;  %12652 = vmatpush3.msra.mxu1 %v9893_v36 }
 0xf6b   : > { %12647 = vmatmul.mubr.msk.f32.gmra.mxu0 %vm567_vm1, %v15712_v46  ;;  %12653 = vmatprep.subr.mxu1 %v9892_v26 }
 0xf6c   : > { %12654 = vmatpush3.msra.mxu1 %v9892_v26 }
 0xf6d   : > { %12655 = vmatprep.subr.mxu1 %v9891_v58 }
 0xf6e   : > { %12656 = vmatpush3.msra.mxu1 %v9891_v58 }
 0xf6f   : > { %12657 = vmatprep.subr.mxu1 %v9890_v56 }
 0xf70   : > { %12658 = vmatpush3.msra.mxu1 %v9890_v56 }
 0xf71   : > { %12659 = vmatprep.subr.mxu1 %v9889_v55 }
 0xf72   : > { %12660 = vmatpush3.msra.mxu1 %v9889_v55 }
 0xf73   : > { %12661 = vmatprep.subr.mxu1 %v9888_v51 }
 0xf74   : > { %12662 = vmatpush3.msra.mxu1 %v9888_v51 }
 0xf75   : > { %12663 = vmatprep.subr.mxu1 %v9887_v2 }
 0xf76   : > { %12664 = vmatpush3.msra.mxu1 %v9887_v2 }
 0xf77   : > { %12665 = vmatprep.subr.mxu1 %v9886_v40 }
 0xf78   : > { %12666 = vmatpush3.msra.mxu1 %v9886_v40 }
 0xf79   : > { %12667 = vmatprep.subr.mxu1 %v9885_v0 }
 0xf7a   : > { %12668 = vmatpush3.msra.mxu1 %v9885_v0 }
 0xf7b   : > { %12669 = vmatprep.subr.mxu1 %v9884_v25 }
 0xf7c   : > { %12670 = vmatpush3.msra.mxu1 %v9884_v25 }
 0xf7d   : > { %12671 = vmatprep.subr.mxu1 %v9883_v57 }
 0xf7e   : > { %12672 = vmatpush3.msra.mxu1 %v9883_v57 }
 0xf7f   : > { %12673 = vmatprep.subr.mxu1 %v9882_v30 }
 0xf80   : > { %12674 = vmatpush3.msra.mxu1 %v9882_v30 }
 0xf81   : > { %12675 = vmatprep.subr.mxu1 %v9881_v19 }
 0xf82   : > { %12676 = vmatpush3.msra.mxu1 %v9881_v19 }
 0xf83   : > { %12677 = vmatprep.subr.mxu1 %v9880_v17 }
 0xf84   : > { %12678 = vmatpush3.msra.mxu1 %v9880_v17 }
 0xf85   : > { %12679 = vmatprep.subr.mxu1 %v9879_v18 }
 0xf86   : > { %12680 = vmatpush3.msra.mxu1 %v9879_v18 }
0x100f   : > { %v12627_v10 = vpop.f32.mrf.mxu0 }
0x1010   : > { %v15742_v22 = vadd.f32 %v12627_v10, %v15739_v38 }
0x1011   : > { %v9656_v13 = vpop.f32.mrf.mxu0 }
0x1012   : > { %v9736_v1 = vmul.f32 %v15742_v22, %v15742_v22  ;;  %v15747_v34 = vadd.f32 %v15739_v38, %v9656_v13 }
0x1013   : > { %v12630_v43 = vpop.f32.mrf.mxu0 }
0x1014   : > { %v9752_v63 = vmul.f32 %v9736_v1, %v15742_v22  ;;  %v9735_v11 = vmul.f32 %v15747_v34, %v15747_v34  ;;  %v15753_v14 = vadd.f32 %v12630_v43, %v15739_v38 }
0x1015   : > { %v9666_v53 = vpop.f32.mrf.mxu0 }
0x1016   : > { %v9768_v48 = vmul.f32 0.044715, %v9752_v63  ;;  %v9751_v27 = vmul.f32 %v9735_v11, %v15747_v34  ;;  %v9738_v33 = vmul.f32 %v15753_v14, %v15753_v14  ;;  %v15759_v44 = vadd.f32 %v15739_v38, %v9666_v53 }
0x1017   : > { %v12633_v4 = vpop.f32.mrf.mxu0 }
0x1018   : > { %v9784_v31 = vadd.f32 %v9768_v48, %v15742_v22  ;;  %v9767_v3 = vmul.f32 0.044715, %v9751_v27  ;;  %v9754_v7 = vmul.f32 %v9738_v33, %v15753_v14  ;;  %v9737_v21 = vmul.f32 %v15759_v44, %v15759_v44 }
0x1019   : > { %v15766_v45 = vadd.f32 %v12633_v4, %v15739_v38  ;;  %v9676_v37 = vpop.f32.mrf.mxu0 }
0x101a   : > { %v9800_v49 = vmul.f32 0.7978846, %v9784_v31  ;;  %v9783_v41 = vadd.f32 %v9767_v3, %v15747_v34  ;;  %v9770_v62 = vmul.f32 0.044715, %v9754_v7  ;;  %v9753_v59 = vmul.f32 %v9737_v21, %v15759_v44 }
0x101b   : > { %v9740_v20 = vmul.f32 %v15766_v45, %v15766_v45  ;;  %v15773_v5 = vadd.f32 %v15739_v38, %v9676_v37  ;;  %v12636_v36 = vpop.f32.mrf.mxu0 }
0x101c   : > { %13037 = vtanh.f32 %v9800_v49  ;;  %v9799_v32 = vmul.f32 0.7978846, %v9783_v41  ;;  %v9786_v28 = vadd.f32 %v9770_v62, %v15753_v14  ;;  %v9769_v24 = vmul.f32 0.044715, %v9753_v59 }
0x101d   : > { %v9756_v26 = vmul.f32 %v9740_v20, %v15766_v45  ;;  %v9739_v58 = vmul.f32 %v15773_v5, %v15773_v5  ;;  %v15780_v56 = vadd.f32 %v12636_v36, %v15739_v38  ;;  %v9686_v51 = vpop.f32.mrf.mxu0 }
0x101e   : > { %v9785_v55 = vadd.f32 %v9769_v24, %v15759_v44  ;;  %v15787_v25 = vadd.f32 %v15739_v38, %v9686_v51  ;;  %13039 = vtanh.f32 %v9799_v32  ;;  %v9802_v57 = vmul.f32 0.7978846, %v9786_v28 }
0x101f   : > { %v9772_v2 = vmul.f32 0.044715, %v9756_v26  ;;  %v9755_v40 = vmul.f32 %v9739_v58, %v15773_v5  ;;  %v9742_v0 = vmul.f32 %v15780_v56, %v15780_v56  ;;  %v12639_v19 = vpop.f32.mrf.mxu0 }
0x1020   : > { %v9801_v30 = vmul.f32 0.7978846, %v9785_v55  ;;  %v9741_v13 = vmul.f32 %v15787_v25, %v15787_v25  ;;  %v15794_v1 = vadd.f32 %v12639_v19, %v15739_v38 }
0x1021   : > { %v9788_v17 = vadd.f32 %v9772_v2, %v15766_v45  ;;  %v9771_v18 = vmul.f32 0.044715, %v9755_v40  ;;  %v9758_v10 = vmul.f32 %v9742_v0, %v15780_v56  ;;  %v9696_v43 = vpop.f32.mrf.mxu0 }
0x1022   : > { %13041 = vtanh.f32 %v9801_v30  ;;  %v9757_v48 = vmul.f32 %v9741_v13, %v15787_v25  ;;  %v9744_v27 = vmul.f32 %v15794_v1, %v15794_v1  ;;  %v15801_v33 = vadd.f32 %v15739_v38, %v9696_v43 }
0x1023   : > { %v9804_v63 = vmul.f32 0.7978846, %v9788_v17  ;;  %v9787_v11 = vadd.f32 %v9771_v18, %v15773_v5  ;;  %v9774_v53 = vmul.f32 0.044715, %v9758_v10  ;;  %13043 = vtanh.f32 %v9802_v57  ;;  %v12642_v31 = vpop.f32.mrf.mxu0 }
0x1024   : > { %v9773_v21 = vmul.f32 0.044715, %v9757_v48  ;;  %v9760_v4 = vmul.f32 %v9744_v27, %v15794_v1  ;;  %v9743_v49 = vmul.f32 %v15801_v33, %v15801_v33  ;;  %v15808_v41 = vadd.f32 %v12642_v31, %v15739_v38 }
0x1025   : > { %v9803_v3 = vmul.f32 0.7978846, %v9787_v11  ;;  %v9790_v7 = vadd.f32 %v9774_v53, %v15780_v56  ;;  %13045 = vtanh.f32 %v9804_v63  ;;  %v9706_v62 = vpop.f32.mrf.mxu0 }
0x1026   : > { %v9789_v37 = vadd.f32 %v9773_v21, %v15787_v25  ;;  %v15812_v20 = vadd.f32 %v15739_v38, %v9706_v62  ;;  %v9776_v32 = vmul.f32 0.044715, %v9760_v4  ;;  %v9759_v28 = vmul.f32 %v9743_v49, %v15801_v33 }
0x1027   : > { %13047 = vtanh.f32 %v9803_v3  ;;  %v9806_v59 = vmul.f32 0.7978846, %v9790_v7  ;;  %v9746_v24 = vmul.f32 %v15808_v41, %v15808_v41  ;;  %v12645_v36 = vpop.f32.mrf.mxu0 }
0x1028   : > { %v9805_v58 = vmul.f32 0.7978846, %v9789_v37  ;;  %v9745_v55 = vmul.f32 %v15812_v20, %v15812_v20  ;;  %v15820_v51 = vadd.f32 %v12645_v36, %v15739_v38  ;;  %v9792_v40 = vadd.f32 %v9776_v32, %v15794_v1 }
0x1029   : > { %v13038_v26 = vpop.eup %13037  ;;  %13049 = vtanh.f32 %v9806_v59  ;;  %v9775_v0 = vmul.f32 0.044715, %v9759_v28  ;;  %v9762_v57 = vmul.f32 %v9746_v24, %v15808_v41  ;;  %v9716_v30 = vpop.f32.mrf.mxu0 }
0x102a   : > { %v9832_v2 = vadd.f32 1.0, %v13038_v26  ;;  %13051 = vtanh.f32 %v9805_v58  ;;  %v9761_v19 = vmul.f32 %v9745_v55, %v15812_v20  ;;  %v9748_v17 = vmul.f32 %v15820_v51, %v15820_v51 }
0x102b   : > { %v15828_v18 = vadd.f32 %v15739_v38, %v9716_v30  ;;  %v9808_v13 = vmul.f32 0.7978846, %v9792_v40  ;;  %v9791_v43 = vadd.f32 %v9775_v0, %v15801_v33  ;;  %v9778_v63 = vmul.f32 0.044715, %v9762_v57  ;;  %v12648_v11 = vpop.f32.mrf.mxu0  ;;  %v13040_v53 = vpop.eup %13039 }
0x102c   : > { %v9848_v10 = vmul.f32 0.5, %v9832_v2  ;;  %v9777_v48 = vmul.f32 0.044715, %v9761_v19  ;;  %v9764_v27 = vmul.f32 %v9748_v17, %v15820_v51  ;;  %v15835_v3 = vadd.f32 %v12648_v11, %v15739_v38 }
0x102d   : > { %v9747_v31 = vmul.f32 %v15828_v18, %v15828_v18  ;;  %13053 = vtanh.f32 %v9808_v13  ;;  %v9807_v21 = vmul.f32 0.7978846, %v9791_v43  ;;  %v9794_v4 = vadd.f32 %v9778_v63, %v15808_v41  ;;  %v9726_v49 = vpop.f32.mrf.mxu0 }
0x102e   : > { %v9864_v7 = vmul.f32 %v9848_v10, %v15742_v22  ;;  %v9793_v59 = vadd.f32 %v9777_v48, %v15812_v20  ;;  %v9780_v37 = vmul.f32 0.044715, %v9764_v27  ;;  %v9750_v28 = vmul.f32 %v15835_v3, %v15835_v3 }
0x102f   : > { %v13042_v62 = vpop.eup %13041  ;;  %v9763_v32 = vmul.f32 %v9747_v31, %v15828_v18  ;;  %13055 = vtanh.f32 %v9807_v21  ;;  %v9810_v24 = vmul.f32 0.7978846, %v9794_v4  ;;  %v15844_v36 = vadd.f32 %v15739_v38, %v9726_v49 }
0x1030   : > { %v9831_v22 = vadd.f32 1.0, %v13040_v53  ;;  %v13044_v26 = vpop.eup %13043  ;;  %v9809_v58 = vmul.f32 0.7978846, %v9793_v59  ;;  %v9796_v55 = vadd.f32 %v9780_v37, %v15820_v51  ;;  %v9766_v40 = vmul.f32 %v9750_v28, %v15835_v3 }
0x1031   : > { %v9779_v2 = vmul.f32 0.044715, %v9763_v32  ;;  %13057 = vtanh.f32 %v9810_v24  ;;  %v9749_v0 = vmul.f32 %v15844_v36, %v15844_v36  ;;  %v9833_v30 = vadd.f32 1.0, %v13042_v62 }
0x1032   : > { %v9847_v57 = vmul.f32 0.5, %v9831_v22  ;;  %v13046_v19 = vpop.eup %13045  ;;  %13059 = vtanh.f32 %v9809_v58  ;;  %v9812_v17 = vmul.f32 0.7978846, %v9796_v55  ;;  %v9782_v10 = vmul.f32 0.044715, %v9766_v40 }
0x1033   : > { %v9795_v38 = vadd.f32 %v9779_v2, %v15828_v18  ;;  %v9765_v43 = vmul.f32 %v9749_v0, %v15844_v36  ;;  %v9849_v11 = vmul.f32 0.5, %v9833_v30  ;;  %v9834_v53 = vadd.f32 1.0, %v13044_v26 }
0x1034   : > { %v13048_v13 = vpop.eup %13047  ;;  %v9863_v63 = vmul.f32 %v9847_v57, %v15747_v34  ;;  %13061 = vtanh.f32 %v9812_v17  ;;  %v9798_v27 = vadd.f32 %v9782_v10, %v15835_v3  ;;  %v9836_v59 = vadd.f32 1.0, %v13046_v19 }
0x1035   : > { %v9811_v48 = vmul.f32 0.7978846, %v9795_v38  ;;  %v9835_v31 = vadd.f32 1.0, %v13048_v13  ;;  %v9781_v4 = vmul.f32 0.044715, %v9765_v43  ;;  %v9865_v49 = vmul.f32 %v9849_v11, %v15759_v44 }
0x1036   : > { %v13050_v21 = vpop.eup %13049  ;;  %12681 = vmatprep.mubr.f32.mxu1 %v9863_v63  ;;  %v9850_v62 = vmul.f32 0.5, %v9834_v53  ;;  %v9814_v37 = vmul.f32 0.7978846, %v9798_v27  ;;  %v9852_v58 = vmul.f32 0.5, %v9836_v59 }
0x1037   : > { %13063 = vtanh.f32 %v9811_v48  ;;  %12682 = vmatmul.mubr.f32.vlgmr.msra.gmra.mxu1 %v9864_v7  ;;  %v9851_v32 = vmul.f32 0.5, %v9835_v31  ;;  %v13052_v28 = vpop.eup %13051  ;;  %v9797_v34 = vadd.f32 %v9781_v4, %v15844_v36  ;;  %v9838_v22 = vadd.f32 1.0, %v13050_v21 }
0x1038   : > { %12684 = vmatprep.mubr.f32.mxu1 %v9865_v49  ;;  %v9866_v24 = vmul.f32 %v9850_v62, %v15753_v14  ;;  %13065 = vtanh.f32 %v9814_v37  ;;  %v9837_v55 = vadd.f32 1.0, %v13052_v28  ;;  %v9868_v57 = vmul.f32 %v9852_v58, %v15766_v45 }
0x1039   : > { %v9867_v26 = vmul.f32 %v9851_v32, %v15773_v5  ;;  %v9813_v2 = vmul.f32 0.7978846, %v9797_v34  ;;  %v9854_v19 = vmul.f32 0.5, %v9838_v22 }
0x103a   : > { %v13054_v44 = vpop.eup %13053  ;;  %v9853_v40 = vmul.f32 0.5, %v9837_v55 }
0x103b   : > { %12685 = vmatmul.mubr.f32.gmra.mxu1 %v9866_v24  ;;  %13067 = vtanh.f32 %v9813_v2  ;;  %v9840_v7 = vadd.f32 1.0, %v13054_v44  ;;  %v9870_v13 = vmul.f32 %v9854_v19, %v15780_v56 }
0x103c   : > { %12687 = vmatprep.mubr.f32.mxu1 %v9867_v26  ;;  %v13056_v0 = vpop.eup %13055  ;;  %v9869_v30 = vmul.f32 %v9853_v40, %v15787_v25  ;;  %v10062_v26 = vsub.s32 7, %v16138_v39 }
0x103d   : > { %v9839_v14 = vadd.f32 1.0, %v13056_v0  ;;  %v9856_v10 = vmul.f32 0.5, %v9840_v7 }
0x103e   : > { %v13058_v17 = vpop.eup %13057 }
0x103f   : > { %12688 = vmatmul.mubr.f32.gmra.mxu1 %v9868_v57  ;;  %v13060_v38 = vpop.eup %13059  ;;  %v9855_v5 = vmul.f32 0.5, %v9839_v14  ;;  %v9842_v63 = vadd.f32 1.0, %v13058_v17  ;;  %v9872_v25 = vmul.f32 %v9856_v10, %v15794_v1 }
0x1040   : > { %12690 = vmatprep.mubr.f32.mxu1 %v9869_v30  ;;  %v9841_v43 = vadd.f32 1.0, %v13060_v38 }
0x1041   : > { %v13062_v11 = vpop.eup %13061  ;;  %v9871_v53 = vmul.f32 %v9855_v5, %v15801_v33  ;;  %v9858_v31 = vmul.f32 0.5, %v9842_v63 }
0x1042   : > { %v9857_v48 = vmul.f32 0.5, %v9841_v43  ;;  %v9844_v4 = vadd.f32 1.0, %v13062_v11 }
0x1043   : > { %12691 = vmatmul.mubr.f32.gmra.mxu1 %v9870_v13  ;;  %v9874_v59 = vmul.f32 %v9858_v31, %v15808_v41  ;;  %v9897_v41 = vsub.s32 6, %v16138_v39 }
0x1044   : > { %v13064_v45 = vpop.eup %13063  ;;  %12693 = vmatprep.mubr.f32.mxu1 %v9871_v53  ;;  %v9873_v27 = vmul.f32 %v9857_v48, %v15812_v20  ;;  %v9860_v37 = vmul.f32 0.5, %v9844_v4 }
0x1045   : > { %v9843_v21 = vadd.f32 1.0, %v13064_v45  ;;  %v13066_v49 = vpop.eup %13065 }
0x1046   : > { %v9846_v32 = vadd.f32 1.0, %v13066_v49  ;;  %v9876_v20 = vmul.f32 %v9860_v37, %v15820_v51  ;;  %v15876_v51 = vrot.slane %v15565_v50, %v10062_v26 }
0x1047   : > { %12694 = vmatmul.mubr.f32.gmra.mxu1 %v9872_v25  ;;  %v9859_v62 = vmul.f32 0.5, %v9843_v21 }
0x1048   : > { %12696 = vmatprep.mubr.f32.mxu1 %v9873_v27  ;;  %v13068_v56 = vpop.eup %13067  ;;  %v9862_v34 = vmul.f32 0.5, %v9846_v32 }
0x1049   : > { %v9875_v33 = vmul.f32 %v9859_v62, %v15828_v18  ;;  %v9845_v28 = vadd.f32 1.0, %v13068_v56  ;;  %v15871_v18 = vrot.slane %v15565_v50, %v9897_v41 }
0x104a   : > { %v9878_v22 = vmul.f32 %v9862_v34, %v15835_v3  ;;  %v15881_v3 = vld [vmem:[%s13403_s22 + $0x8] ss:$0 sm:$0xff] }
0x104b   : > { %12697 = vmatmul.mubr.f32.gmra.mxu1 %v9874_v59  ;;  %v9861_v1 = vmul.f32 0.5, %v9845_v28 }
0x104c   : > { %12699 = vmatprep.mubr.f32.mxu1 %v9875_v33 }
0x104d   : > { %v9877_v24 = vmul.f32 %v9861_v1, %v15844_v36 }
0x104f   : > { %12700 = vmatmul.mubr.f32.gmra.mxu1 %v9876_v20 }
0x1050   : > { %12702 = vmatprep.mubr.f32.mxu1 %v9877_v24 }
0x1053   : > { %12703 = vmatmul.mubr.f32.gmra.mxu1 %v9878_v22 }
0x10f7   : > { %v12683_v58 = vpop.f32.mrf.mxu1 }
0x10f8   : > { %v9971_v55 = vadd.f32 %v12683_v58, %v15871_v18 }
0x10f9   : > { %v9965_v2 = vpop.f32.mrf.mxu1 }
0x10fa   : > { %v10045_v36 = vadd.f32 %v9971_v55, %v15600_v23  ;;  %v9966_v44 = vadd.f32 %v9965_v2, %v15871_v18 }
0x10fb   : > { %v12686_v40 = vpop.f32.mrf.mxu1 }
0x10fc   : > { %v10065_v7 = vmul.f32 %v15876_v51, %v10045_v36  ;;  %v10044_v0 = vadd.f32 %v9966_v44, %v15597_v12  ;;  %v9981_v39 = vadd.f32 %v12686_v40, %v15871_v18 }
0x10fd   : > { %v9975_v57 = vpop.f32.mrf.mxu1 }
0x10fe   : > { %v15887_v30 = vadd.f32 %v15881_v3, %v10065_v7  ;;  %v10064_v50 = vmul.f32 %v15876_v51, %v10044_v0  ;;  %v10047_v19 = vadd.f32 %v9981_v39, %v15620_v42  ;;  %v9976_v23 = vadd.f32 %v9975_v57, %v15871_v18 }
0x10ff   : > { %v12689_v14 = vpop.f32.mrf.mxu1 }
0x1100   : > { %10101 = vst.msk [vmem:[#allocation2 + $0x8] sm:$0xff] %vm567_vm1, %v15887_v30  ;;  %v15895_v17 = vadd.f32 %v15881_v3, %v10064_v50  ;;  %v10067_v12 = vmul.f32 %v15876_v51, %v10047_v19  ;;  %v10046_v38 = vadd.f32 %v9976_v23, %v15616_v6  ;;  %v9991_v5 = vadd.f32 %v12689_v14, %v15871_v18 }
0x1101   : > { %v9985_v10 = vpop.f32.mrf.mxu1 }
0x1102   : > { %10100 = vst.msk [vmem:[#allocation2] sm:$0xff] %vm567_vm1, %v15895_v17  ;;  %v15903_v42 = vadd.f32 %v15881_v3, %v10067_v12  ;;  %v10066_v13 = vmul.f32 %v15876_v51, %v10046_v38  ;;  %v10049_v43 = vadd.f32 %v9991_v5, %v15635_v54  ;;  %v9986_v63 = vadd.f32 %v9985_v10, %v15871_v18 }
0x1103   : > { %v12692_v11 = vpop.f32.mrf.mxu1 }
0x1104   : > { %10103 = vst.msk [vmem:[#allocation2 + $0x18] sm:$0xff] %vm567_vm1, %v15903_v42  ;;  %v15911_v6 = vadd.f32 %v15881_v3, %v10066_v13  ;;  %v10069_v53 = vmul.f32 %v15876_v51, %v10049_v43  ;;  %v10048_v48 = vadd.f32 %v9986_v63, %v15638_v8  ;;  %v10001_v45 = vadd.f32 %v12692_v11, %v15871_v18 }
0x1105   : > { %v9995_v25 = vpop.f32.mrf.mxu1 }
0x1106   : > { %10102 = vst.msk [vmem:[#allocation2 + $0x10] sm:$0xff] %vm567_vm1, %v15911_v6  ;;  %v15919_v54 = vadd.f32 %v15881_v3, %v10069_v53  ;;  %v10068_v27 = vmul.f32 %v15876_v51, %v10048_v48  ;;  %v10051_v31 = vadd.f32 %v10001_v45, %v15657_v15  ;;  %v9996_v21 = vadd.f32 %v9995_v25, %v15871_v18 }
0x1107   : > { %v12695_v4 = vpop.f32.mrf.mxu1 }
0x1108   : > { %10105 = vst.msk [vmem:[#allocation2 + $0x28] sm:$0xff] %vm567_vm1, %v15919_v54  ;;  %v10088_v8 = vadd.f32 %v15881_v3, %v10068_v27  ;;  %v10071_v49 = vmul.f32 %v15876_v51, %v10051_v31  ;;  %v10050_v62 = vadd.f32 %v9996_v21, %v15651_v52  ;;  %v10011_v56 = vadd.f32 %v12695_v4, %v15871_v18 }
0x1109   : > { %v10005_v59 = vpop.f32.mrf.mxu1 }
0x110a   : > { %10104 = vst.msk [vmem:[#allocation2 + $0x20] sm:$0xff] %vm567_vm1, %v10088_v8  ;;  %v10091_v33 = vadd.f32 %v15881_v3, %v10071_v49  ;;  %v10070_v15 = vmul.f32 %v15876_v51, %v10050_v62  ;;  %v10053_v37 = vadd.f32 %v10011_v56, %v15671_v47  ;;  %v10006_v32 = vadd.f32 %v10005_v59, %v15871_v18 }
0x110b   : > { %v12698_v28 = vpop.f32.mrf.mxu1 }
0x110c   : > { %10107 = vst.msk [vmem:[#allocation2 + $0x38] sm:$0xff] %vm567_vm1, %v10091_v33  ;;  %v10090_v1 = vadd.f32 %v15881_v3, %v10070_v15  ;;  %v10073_v52 = vmul.f32 %v15876_v51, %v10053_v37  ;;  %v10052_v20 = vadd.f32 %v10006_v32, %v15668_v16  ;;  %v10021_v34 = vadd.f32 %v12698_v28, %v15871_v18 }
0x110d   : > { %v10015_v24 = vpop.f32.mrf.mxu1 }
0x110e   : > { %10106 = vst.msk [vmem:[#allocation2 + $0x30] sm:$0xff] %vm567_vm1, %v10090_v1  ;;  %v10093_v22 = vadd.f32 %v15881_v3, %v10073_v52  ;;  %v10072_v47 = vmul.f32 %v15876_v51, %v10052_v20  ;;  %v10055_v41 = vadd.f32 %v10021_v34, %v15684_v9  ;;  %v10016_v26 = vadd.f32 %v10015_v24, %v15871_v18 }
0x110f   : > { %v12701_v58 = vpop.f32.mrf.mxu1 }
0x1110   : > { %10109 = vst.msk [vmem:[#allocation2 + $0x48] sm:$0xff] %vm567_vm1, %v10093_v22  ;;  %v10092_v55 = vadd.f32 %v15881_v3, %v10072_v47  ;;  %v10075_v16 = vmul.f32 %v15876_v51, %v10055_v41  ;;  %v10054_v2 = vadd.f32 %v10016_v26, %v15687_v61  ;;  %v10031_v36 = vadd.f32 %v12701_v58, %v15871_v18 }
0x1111   : > { %v10025_v44 = vpop.f32.mrf.mxu1 }
0x1112   : > { %10108 = vst.msk [vmem:[#allocation2 + $0x40] sm:$0xff] %vm567_vm1, %v10092_v55  ;;  %v10095_v40 = vadd.f32 %v15881_v3, %v10075_v16  ;;  %v10074_v9 = vmul.f32 %v15876_v51, %v10054_v2  ;;  %v10057_v7 = vadd.f32 %v10031_v36, %v15700_v29  ;;  %v10026_v0 = vadd.f32 %v10025_v44, %v15871_v18 }
0x1113   : > { %v12704_v39 = vpop.f32.mrf.mxu1 }
0x1114   : > { %10111 = vst.msk [vmem:[#allocation2 + $0x58] sm:$0xff] %vm567_vm1, %v10095_v40  ;;  %v10094_v57 = vadd.f32 %v15881_v3, %v10074_v9  ;;  %v10077_v61 = vmul.f32 %v15876_v51, %v10057_v7  ;;  %v10056_v50 = vadd.f32 %v10026_v0, %v15697_v60  ;;  %v10041_v19 = vadd.f32 %v12704_v39, %v15871_v18 }
0x1115   : > { %v10035_v23 = vpop.f32.mrf.mxu1 }
0x1116   : > { %10110 = vst.msk [vmem:[#allocation2 + $0x50] sm:$0xff] %vm567_vm1, %v10094_v57  ;;  %v10097_v14 = vadd.f32 %v15881_v3, %v10077_v61  ;;  %v10076_v29 = vmul.f32 %v15876_v51, %v10056_v50  ;;  %v10059_v12 = vadd.f32 %v10041_v19, %v15712_v46  ;;  %v10036_v38 = vadd.f32 %v10035_v23, %v15871_v18 }
0x1118   : > { %10113 = vst.msk [vmem:[#allocation2 + $0x68] sm:$0xff] %vm567_vm1, %v10097_v14  ;;  %v10096_v5 = vadd.f32 %v15881_v3, %v10076_v29  ;;  %v10079_v10 = vmul.f32 %v15876_v51, %v10059_v12  ;;  %v10058_v60 = vadd.f32 %v10036_v38, %v15709_v35 }
0x111a   : > { %10112 = vst.msk [vmem:[#allocation2 + $0x60] sm:$0xff] %vm567_vm1, %v10096_v5  ;;  %v10099_v13 = vadd.f32 %v15881_v3, %v10079_v10  ;;  %v10078_v43 = vmul.f32 %v15876_v51, %v10058_v60  ;;  %10119 = sbr.rel (%p10883_p1) target bundleno = 4391 (0x1127), region = 64 }
0x111c   : > { %10115 = vst.msk [vmem:[#allocation2 + $0x78] sm:$0xff] %vm567_vm1, %v10099_v13  ;;  %v10098_v46 = vadd.f32 %v15881_v3, %v10078_v43 }
0x111e   : > { %10114 = vst.msk [vmem:[#allocation2 + $0x70] sm:$0xff] %vm567_vm1, %v10098_v46 }
0x111f   : > { %10120 = vst.msk [vmem:[%s13409_s4] sm:$0xff] %vm567_vm1, %v15895_v17  ;;  %10121 = vst.msk [vmem:[%s13409_s4 + $0x8] sm:$0xff] %vm567_vm1, %v15887_v30 }
0x1120   : > { %10122 = vst.msk [vmem:[%s13409_s4 + $0x10] sm:$0xff] %vm567_vm1, %v15911_v6  ;;  %10123 = vst.msk [vmem:[%s13409_s4 + $0x18] sm:$0xff] %vm567_vm1, %v15903_v42 }
0x1121   : > { %10124 = vst.msk [vmem:[%s13409_s4 + $0x20] sm:$0xff] %vm567_vm1, %v10088_v8  ;;  %10125 = vst.msk [vmem:[%s13409_s4 + $0x28] sm:$0xff] %vm567_vm1, %v15919_v54 }
0x1122   : > { %10126 = vst.msk [vmem:[%s13409_s4 + $0x30] sm:$0xff] %vm567_vm1, %v10090_v1  ;;  %10127 = vst.msk [vmem:[%s13409_s4 + $0x38] sm:$0xff] %vm567_vm1, %v10091_v33 }
0x1123   : > { %10128 = vst.msk [vmem:[%s13409_s4 + $0x40] sm:$0xff] %vm567_vm1, %v10092_v55  ;;  %10129 = vst.msk [vmem:[%s13409_s4 + $0x48] sm:$0xff] %vm567_vm1, %v10093_v22 }
0x1124   : > { %10130 = vst.msk [vmem:[%s13409_s4 + $0x50] sm:$0xff] %vm567_vm1, %v10094_v57  ;;  %10131 = vst.msk [vmem:[%s13409_s4 + $0x58] sm:$0xff] %vm567_vm1, %v10095_v40 }
0x1125   : > { %10132 = vst.msk [vmem:[%s13409_s4 + $0x60] sm:$0xff] %vm567_vm1, %v10096_v5  ;;  %10133 = vst.msk [vmem:[%s13409_s4 + $0x68] sm:$0xff] %vm567_vm1, %v10097_v14 }
0x1126   : > { %10134 = vst.msk [vmem:[%s13409_s4 + $0x70] sm:$0xff] %vm567_vm1, %v10098_v46  ;;  %10135 = vst.msk [vmem:[%s13409_s4 + $0x78] sm:$0xff] %vm567_vm1, %v10099_v13 }
0x1127 PF: > { %s10896_s3 = sshll.u32 %s13214_s13, 11  ;;  %s16153_s26 = sld [smem:[#allocation37_spill]] }
0x1128   : > { %s10150_s29 = sshll.u32 %s13409_s4, 4  ;;  %s16154_s24 = sand.u32 1, %s13202_s10   ;;  %s16020_s29 = int_to_ptr.vmem [resolvable:$true] %s10150_s29 }
0x1129   : > { %s16024_s27 = scalar_lea.sflag [#allocation4], %s16154_s24  ;;  %s13134_s23 = scalar_lea.vmem %s16020_s29, 2048 }
0x112a   : > { %p13135_p2 = scmp.ne.s32.totalorder %s16020_s29, %s13134_s23  ;;  %s13231_s13 = smov [#allocation3]  }
0x112b   : > { %s13138_s15 = sshll.u32 %s13231_s13, 4  ;;  %s13139_s15 = int_to_ptr.vmem [resolvable:$false] %s13138_s15 }
0x112c   : > { %p13136_p4 = pnand %p13135_p2, %p13333_p3  ;;  %s13140_s19 = scalar_lea.vmem %s13139_s15, 4096 }
0x112d   : > { %s16017_s28 = scalar_lea.hbm %s16153_s26, %s10896_s3  ;;  %p13141_p6 = scmp.lt.s32.totalorder %s16020_s29, %s13139_s15 }
0x112e   : > { %p13137_p5 = pneg %p13136_p4  ;;  %p13142_p7 = scmp.lt.s32.totalorder %s13140_s19, %s13134_s23 }
0x1130   : > { %p13143_p8 = por %p13142_p7, %p13141_p6 }
0x1132   : > { %p13144_p10 = pnand %p13143_p8, %p13137_p5 }
0x1134   : > { %13147 = shalt.err (!%p13144_p10)
}
0x1135   : > { %s13148_s4 = scalar_lea.hbm %s16017_s28, 2048  ;;  %s13152_s30 = scalar_lea.hbm %s16153_s26, 4096 }
0x1136   : > { %p13149_p11 = scmp.ne.s32.totalorder %s16017_s28, %s13148_s4  ;;  %p13153_p0 = scmp.lt.s32.totalorder %s16017_s28, %s16153_s26 }
0x1137   : > { %p13154_p1 = scmp.lt.s32.totalorder %s13152_s30, %s13148_s4 }
0x1138   : > { %p13150_p12 = pnand %p13149_p11, %p13333_p3 }
0x1139   : > { %p13155_p2 = por %p13154_p1, %p13153_p0 }
0x113a   : > { %p13151_p13 = pneg %p13150_p12 }
0x113c   : > { %p13156_p4 = pnand %p13155_p2, %p13151_p13 }
0x113e   : > { %13159 = shalt.err (!%p13156_p4)
}
0x113f   : > { %s13232_s18 = smov 128   ;;  %s13233_s17 = smov 8  }
0x1140   : > { %12705 = dma.vmem_to_hbm [thread:$0]  (%p13333_p3), %s16020_s29, 2048, %s16017_s28, %s16024_s27, %s13232_s18, %s13232_s18, %s13233_s17  }
0x1141 PF: > { %s16155_s0 = sld [smem:[#allocation10_spill]] }
0x1142   : > { %s16156_s1 = sld [smem:[#allocation6_spill]] }
0x1147   : > { %p12711_p5 = scmp.ge.s32.totalorder %s16155_s0, 2 }
0x1148   : > { %s10165_s11 = sand.u32 1, %s16156_s1  }
0x1149   : > { %p12708_p6 = pnand %p12711_p5, %p13343_p9  ;;  %s10166_s16 = scalar_lea.sflag [#allocation4], %s10165_s11 }
0x114b   : > { %p12709_p7 = pneg %p12708_p6 }
0x114d   : > { %13193 = dma.done.wait (%p12709_p7), %s10166_s16, 2048  }
0x114e   : > { %13195 = vsyncadd (%p12709_p7), %s10166_s16, 4294965248  ;;  %s22_s16 = sadd.s32 1, %s16155_s0   ;;  %s16158_s3 = sld [smem:[#allocation7_spill]] }
0x114f   : > { %p19_p8 = scmp.ge.s32.totalorder %s22_s16, 6   ;;  %s16159_s11 = sld [smem:[#allocation14_spill]] }
0x1150   : > { %s16160_s12 = sld [smem:[#allocation8_spill]]  ;;  %s16164_s30 = smov %s13202_s10 }
0x1151   : > { %s16161_s13 = sld [smem:[#allocation9_spill]]  ;;  %21 = sbr.rel (!%p19_p8) target bundleno = 12 (0xc), region = 135 }
0x1152   : > { %s16162_s14 = sld [smem:[#allocation11_spill]] }
0x1153   : > { %s16163_s15 = sld [smem:[#allocation12_spill]] }
0x1154   : > { %s16165_s10 = smov %s16158_s3 }
0x1156   :  { %10171 = vsyncpa [#allocation4], 1 }
0x1157   :  { %10173 = vsyncpa [#allocation4 + $0x1], 1 }

</bundles_post_ra>
